<compile_context>
chip_gen: v7x
topology: tpu7x:2x2x1
jax: 0.10.0
libtpu: 0.0.40
codegen_flags: <defaults>
</compile_context>

<pallas_src>
import functools
import numpy as np
import jax
import jax.numpy as jnp
from jax.experimental import pallas as pl
from jax.experimental.pallas import tpu as pltpu


def _round_up(x, m):
    return ((x + m - 1) // m) * m


def _vmem_limit_bytes():
    """Generation-aware VMEM limit: ~40 MiB on v7x (64 MiB/core), up to 96 MiB on v5e/v6e."""
    try:
        cap = getattr(pltpu.get_tpu_info(), "vmem_capacity_bytes", None)
    except Exception:
        cap = None
    if not cap:
        return 40 * 1024 * 1024
    return int(min(max(cap - 24 * 1024 * 1024, 32 * 1024 * 1024), 96 * 1024 * 1024))


_VMEM_LIMIT = _vmem_limit_bytes()


def _pick_tile(n, cap):
    """Largest 128-multiple tile <= cap dividing n (or n itself when small)."""
    if n <= cap:
        return n
    t = cap - (cap % 128)
    while t > 128 and n % t:
        t -= 128
    return t


# ----------------------- fused matmul kernel (1x1 convs + linear) -----------------------

def _matmul_bias_act_kernel(*refs, relu, has_res):
    """acc += A@W over the K grid axis; epilogue: + bias (+ residual) (+ ReLU), cast, store."""
    if has_res:
        a_ref, w_ref, b_ref, r_ref, o_ref, acc_ref = refs
    else:
        a_ref, w_ref, b_ref, o_ref, acc_ref = refs
        r_ref = None

    @pl.when(pl.program_id(2) == 0)
    def _init():
        acc_ref[...] = jnp.zeros_like(acc_ref)

    acc_ref[...] += jnp.dot(a_ref[...], w_ref[...], preferred_element_type=jnp.float32)

    @pl.when(pl.program_id(2) == pl.num_programs(2) - 1)
    def _epilogue():
        out = acc_ref[...] + b_ref[...]
        if has_res:
            out = out + r_ref[...].astype(jnp.float32)
        if relu:
            out = jnp.maximum(out, 0.0)
        o_ref[...] = out.astype(o_ref.dtype)


def _mm_tiles(M, Kp, Np):
    """Tile sizes for the fused matmul.  Big tiles (VMEM budget), K kept whole when possible,
    and >=2 N tiles for the small-M, N>=1024 deep layers so both TensorCores stay busy."""
    if M <= 512:
        tm = _round_up(max(M, 8), 16)
        Mp = tm
    else:
        tm = 512
        Mp = _round_up(M, tm)
    tk = _pick_tile(Kp, 2048)
    if Np <= 512:
        tn = Np
    elif Mp <= 256 and Np % 1024 == 0:
        tn = max(512, Np // 2)
        while Np % tn:
            tn //= 2
    else:
        tn = _pick_tile(Np, 512)
    return tm, tk, tn, Mp


def _fused_matmul(a, w_packed, b_packed, residual, relu, out_dtype):
    """(M,K) @ pre-packed (Kp,Np) bf16 weight + bias (+ residual) (+ ReLU), f32 accumulation."""
    M, K = a.shape
    Kp, Np = w_packed.shape
    tm, tk, tn, Mp = _mm_tiles(M, Kp, Np)

    a_p = a.astype(jnp.bfloat16)
    if (Mp, Kp) != (M, K):
        a_p = jnp.pad(a_p, ((0, Mp - M), (0, Kp - K)))

    operands = [a_p, w_packed, b_packed]
    in_specs = [
        pl.BlockSpec((tm, tk), lambda i, j, k: (i, k)),
        pl.BlockSpec((tk, tn), lambda i, j, k: (k, j)),
        pl.BlockSpec((1, tn), lambda i, j, k: (0, j)),
    ]
    has_res = residual is not None
    if has_res:
        r_p = residual.astype(jnp.bfloat16)
        if r_p.shape != (Mp, Np):
            r_p = jnp.pad(r_p, ((0, Mp - r_p.shape[0]), (0, Np - r_p.shape[1])))
        operands.append(r_p)
        in_specs.append(pl.BlockSpec((tm, tn), lambda i, j, k: (i, j)))

    out = pl.pallas_call(
        functools.partial(_matmul_bias_act_kernel, relu=relu, has_res=has_res),
        grid=(Mp // tm, Np // tn, Kp // tk),
        out_shape=jax.ShapeDtypeStruct((Mp, Np), out_dtype),
        in_specs=in_specs,
        out_specs=pl.BlockSpec((tm, tn), lambda i, j, k: (i, j)),
        scratch_shapes=[pltpu.VMEM((tm, tn), jnp.float32)],
        compiler_params=pltpu.CompilerParams(
            dimension_semantics=("parallel", "parallel", "arbitrary"),
            vmem_limit_bytes=_VMEM_LIMIT),
    )(*operands)
    return out[:M] if Mp != M else out


@functools.partial(jax.jit, static_argnames=("stride", "relu"))
def conv1x1_bn_act(x, packed, residual=None, *, stride, relu):
    """1x1 conv (BN scale pre-folded) + bias (+ residual) (+ ReLU) as one fused MXU matmul."""
    B = x.shape[0]
    if stride > 1:
        x = x[:, ::stride, ::stride, :]
    Ho, Wo, C = x.shape[1], x.shape[2], x.shape[3]
    Np = packed["w"].shape[1]
    a = x.reshape(B * Ho * Wo, C)
    res2d = residual.reshape(B * Ho * Wo, Np) if residual is not None else None
    out = _fused_matmul(a, packed["w"], packed["b"], res2d, relu, jnp.bfloat16)
    return out.reshape(B, Ho, Wo, Np)


# ---------------------- direct (im2col-free) spatial convolution ----------------------

def _conv_tap_kernel(*refs, kh, kw, cin, wo, stride, relu):
    """kh*kw taps read straight from the padded activation rows; per-tap MXU dots, f32 accum."""
    a_refs = refs[:kh]                       # kh aliases of the padded input, one per tap row
    w_ref, b_ref, o_ref = refs[kh:kh + 3]
    bsz = a_refs[0].shape[0]
    m = bsz * wo
    mp = _round_up(m, 8)
    tn = o_ref.shape[-1]
    acc = jnp.zeros((mp, tn), jnp.float32)
    for di in range(kh):
        for dj in range(kw):
            if stride == 1:
                t = a_refs[di][:, 0, dj:dj + wo, :]
            else:  # stride 2: width-folded row (Wq, 2*cin); even/odd columns are lane halves
                w0 = dj // 2
                c0 = (dj % 2) * cin
                t = a_refs[di][:, 0, w0:w0 + wo, c0:c0 + cin]
            t = t.reshape(m, cin)
            if mp != m:
                t = jnp.pad(t, ((0, mp - m), (0, 0)))
            acc = acc + jnp.dot(t, w_ref[di, dj], preferred_element_type=jnp.float32)
    out = acc[:m] + b_ref[...]
    if relu:
        out = jnp.maximum(out, 0.0)
    o_ref[...] = out.reshape(bsz, 1, wo, tn).astype(o_ref.dtype)


@functools.partial(jax.jit, static_argnames=("kh", "kw", "stride", "pad", "relu"))
def conv_tap_bn_act(x, packed, *, kh, kw, stride, pad, relu):
    """KxK conv (BN folded) + bias + optional ReLU, NHWC bf16 -> NHWC bf16, no im2col in HBM."""
    assert stride in (1, 2)
    B, H, W, C = x.shape
    w, b = packed["w"], packed["b"]
    cin_p, Np = w.shape[2], w.shape[3]
    if cin_p > C:                             # stem: channels padded 3 -> 8 (cheap, MXU-friendly K)
        x = jnp.pad(x, ((0, 0), (0, 0), (0, 0), (0, cin_p - C)))
        C = cin_p
    Ho = (H + 2 * pad - kh) // stride + 1
    Wo = (W + 2 * pad - kw) // stride + 1
    Hp = H + 2 * pad
    if stride == 1:
        Wq, Cq = W + 2 * pad, C
        xq = jnp.pad(x, ((0, 0), (pad, pad), (pad, pad), (0, 0)))
    else:
        Wq = max(-(-(W + 2 * pad) // 2), (kw - 1) // 2 + Wo)
        Cq = 2 * C
        xq = jnp.pad(x, ((0, 0), (pad, pad), (pad, 2 * Wq - W - pad), (0, 0)))
        xq = xq.reshape(B, Hp, Wq, Cq)        # free view: column parity folded into lanes

    tn = _pick_tile(Np, 512)
    grid = (Np // tn, Ho)                     # y innermost: weight tile stays VMEM-resident

    def _row_spec(di):
        return pl.BlockSpec((B, 1, Wq, Cq),
                            lambda n, y, di=di: (0, stride * y + di, 0, 0))

    out = pl.pallas_call(
        functools.partial(_conv_tap_kernel, kh=kh, kw=kw, cin=C, wo=Wo,
                          stride=stride, relu=relu),
        grid=grid,
        out_shape=jax.ShapeDtypeStruct((B, Ho, Wo, Np), jnp.bfloat16),
        in_specs=[_row_spec(di) for di in range(kh)]
        + [pl.BlockSpec((kh, kw, cin_p, tn), lambda n, y: (0, 0, 0, n)),
           pl.BlockSpec((1, tn), lambda n, y: (0, n))],
        out_specs=pl.BlockSpec((B, 1, Wo, tn), lambda n, y: (0, y, 0, n)),
        compiler_params=pltpu.CompilerParams(
            dimension_semantics=("parallel", "parallel"),
            vmem_limit_bytes=_VMEM_LIMIT),
    )(*([xq] * kh), w, b)
    return out


# --------------------------------- pooling kernels ---------------------------------

def _maxpool9_kernel(r0, r1, r2, o_ref, *, c, wo2):
    """3x3/stride-2 max pool on width-4-folded rows; 9 taps as static slices, lane-dense output."""
    def _rowmax(r):
        ce = jnp.maximum(jnp.maximum(r[:, 0, :wo2, 0:c], r[:, 0, :wo2, c:2 * c]),
                         r[:, 0, :wo2, 2 * c:3 * c])
        co = jnp.maximum(jnp.maximum(r[:, 0, :wo2, 2 * c:3 * c], r[:, 0, :wo2, 3 * c:4 * c]),
                         r[:, 0, 1:wo2 + 1, 0:c])
        return jnp.concatenate([ce, co], axis=-1)   # (B, wo2, 2c) lane-dense
    m = jnp.maximum(jnp.maximum(_rowmax(r0), _rowmax(r1)), _rowmax(r2))
    o_ref[...] = m.reshape(o_ref.shape)


@jax.jit
def maxpool2d_3x3_s2_p1(x):
    """PyTorch MaxPool2d(kernel_size=3, stride=2, padding=1) on NHWC; single read of the input."""
    B, H, W, C = x.shape
    p = 1
    Ho = (H + 2 * p - 3) // 2 + 1
    Wo = (W + 2 * p - 3) // 2 + 1
    assert Wo % 2 == 0, "maxpool lane-folding assumes even output width"
    Wo2 = Wo // 2
    Hp = H + 2 * p
    Wp4 = max(-(-(W + 2 * p) // 4), Wo2 + 1)
    xq = jnp.pad(x, ((0, 0), (p, p), (p, 4 * Wp4 - W - p), (0, 0)),
                 constant_values=-jnp.inf)
    xq = xq.reshape(B, Hp, Wp4, 4 * C)              # free view: 4 columns folded into lanes

    def _row_spec(di):
        return pl.BlockSpec((B, 1, Wp4, 4 * C), lambda y, di=di: (0, 2 * y + di, 0, 0))

    out = pl.pallas_call(
        functools.partial(_maxpool9_kernel, c=C, wo2=Wo2),
        grid=(Ho,),
        out_shape=jax.ShapeDtypeStruct((B, Ho, Wo2, 2 * C), x.dtype),
        in_specs=[_row_spec(0), _row_spec(1), _row_spec(2)],
        out_specs=pl.BlockSpec((B, 1, Wo2, 2 * C), lambda y: (0, y, 0, 0)),
        compiler_params=pltpu.CompilerParams(
            dimension_semantics=("parallel",),
            vmem_limit_bytes=_VMEM_LIMIT),
    )(xq, xq, xq)
    return out.reshape(B, Ho, Wo, C)


def _avgpool_kernel(x_ref, o_ref):
    o_ref[...] = jnp.mean(x_ref[...].astype(jnp.float32), axis=1)


@jax.jit
def global_avgpool(x):
    """AdaptiveAvgPool2d((1,1)) + flatten on NHWC -> (B, C) f32, tiled over channels."""
    B, H, W, C = x.shape
    HW = H * W
    xr = x.reshape(B, HW, C)
    tc = _pick_tile(C, 512)
    return pl.pallas_call(
        _avgpool_kernel,
        grid=(C // tc,),
        out_shape=jax.ShapeDtypeStruct((B, C), jnp.float32),
        in_specs=[pl.BlockSpec((B, HW, tc), lambda c: (0, 0, c))],
        out_specs=pl.BlockSpec((B, tc), lambda c: (0, c)),
        compiler_params=pltpu.CompilerParams(
            dimension_semantics=("parallel",),
            vmem_limit_bytes=_VMEM_LIMIT),
    )(xr)


@functools.partial(jax.jit, static_argnames=("num_classes",))
def classifier_forward(feat, packed, *, num_classes):
    # Dropout is identity in eval mode.  TODO(synk): train-mode stochastic dropout not modeled.
    out = _fused_matmul(feat, packed["w"], packed["b"], None, False, jnp.float32)
    return out[:feat.shape[0], :num_classes]


# --------------------------- parameter construction (packed once) ------------------------

class _KeyGen:
    def __init__(self, key):
        self._key = key

    def __call__(self):
        self._key, sub = jax.random.split(self._key)
        return sub


def _fold_bn_conv(kg, cout, cin, kh, kw):
    """Synthetic conv weight with eval-mode BN scale folded in: y = conv(x, w*scale) + bias."""
    std = np.sqrt(2.0 / (cin * kh * kw))
    w = jax.random.normal(kg(), (cout, cin, kh, kw), jnp.float32) * std
    scale = 0.5 + 0.05 * jax.random.normal(kg(), (cout,), jnp.float32)
    bias = 0.05 * jax.random.normal(kg(), (cout,), jnp.float32)
    return w * scale[:, None, None, None], bias


def _pack_dense(w2d, bias):
    """(cout,cin) -> MXU-ready (Kp,Np) bf16 matrix + (1,Np) f32 bias; K<128 stays unpadded."""
    cout, cin = w2d.shape
    Kp = cin if (cin % 128 == 0 or cin <= 128) else _round_up(cin, 128)
    Np = cout if (cout % 128 == 0 or cout == 64) else _round_up(cout, 128)
    wm = jnp.pad(jnp.transpose(w2d).astype(jnp.bfloat16), ((0, Kp - cin), (0, Np - cout)))
    bm = jnp.pad(bias.astype(jnp.float32).reshape(1, cout), ((0, 0), (0, Np - cout)))
    return {"w": wm, "b": bm}


def _pack_taps(w, bias):
    """OIHW conv weight -> (kh, kw, cin_p, cout) bf16 per-tap matrices (cin padded to >=8)."""
    cout, cin, kh, kw = w.shape
    cin_p = max(cin, 8)
    wt = jnp.transpose(w, (2, 3, 1, 0))
    wt = jnp.pad(wt, ((0, 0), (0, 0), (0, cin_p - cin), (0, 0))).astype(jnp.bfloat16)
    return {"w": wt, "b": bias.astype(jnp.float32).reshape(1, cout)}


def _make_dense(kg, cout, cin):
    w, b = _fold_bn_conv(kg, cout, cin, 1, 1)
    return _pack_dense(w.reshape(cout, cin), b)


def _make_taps(kg, cout, cin, k):
    w, b = _fold_bn_conv(kg, cout, cin, k, k)
    return _pack_taps(w, b)


_LAYER_CFG = ((64, 3, 1), (128, 4, 2), (256, 6, 2), (512, 3, 2))


def init_resnet50_params(key, num_classes):
    kg = _KeyGen(key)
    params = {"conv1": _make_taps(kg, 64, 3, 7)}
    inplanes = 64
    for li, (planes, nblocks, stride) in enumerate(_LAYER_CFG, start=1):
        blocks = []
        for b in range(nblocks):
            s = stride if b == 0 else 1
            blk = {
                "conv1": _make_dense(kg, planes, inplanes),
                "conv2": _make_taps(kg, planes, planes, 3),
                "conv3": _make_dense(kg, planes * 4, planes),
            }
            if b == 0 and (s != 1 or inplanes != planes * 4):
                blk["down"] = _make_dense(kg, planes * 4, inplanes)
            inplanes = planes * 4
            blocks.append(blk)
        params[f"layer{li}"] = blocks
    # Classifier(num_classes, in_features=2048): Dropout (eval identity) + Linear(2048 -> num_classes)
    fc_w = jax.random.normal(kg(), (num_classes, 2048), jnp.float32) / np.sqrt(2048.0)
    fc_b = 0.01 * jax.random.normal(kg(), (num_classes,), jnp.float32)
    params["fc"] = _pack_dense(fc_w, fc_b)
    return params


# --------------------------------- forward ---------------------------------

def _bottleneck_forward(x, blk, stride):
    out = conv1x1_bn_act(x, blk["conv1"], stride=1, relu=True)
    out = conv_tap_bn_act(out, blk["conv2"], kh=3, kw=3, stride=stride, pad=1, relu=True)
    if "down" in blk:
        identity = conv1x1_bn_act(x, blk["down"], stride=stride, relu=False)
    else:
        identity = x
    # conv3 + bn3 + residual add + ReLU fused into one matmul epilogue
    return conv1x1_bn_act(out, blk["conv3"], identity, stride=1, relu=True)


def resnet_backbone_forward(params, x_nchw, num_classes):
    """Matches ResNetBackbone.forward: backbone(x) -> Classifier(x). NCHW in, (B, num_classes) out."""
    x = jnp.transpose(x_nchw, (0, 2, 3, 1)).astype(jnp.bfloat16)          # NCHW -> NHWC bf16
    x = conv_tap_bn_act(x, params["conv1"], kh=7, kw=7, stride=2, pad=3, relu=True)
    x = maxpool2d_3x3_s2_p1(x)
    for li, (planes, nblocks, stride) in enumerate(_LAYER_CFG, start=1):
        for b in range(nblocks):
            s = stride if b == 0 else 1
            x = _bottleneck_forward(x, params[f"layer{li}"][b], s)
    feat = global_avgpool(x)                                              # (B, 2048) == x.view(B,-1)
    return classifier_forward(feat, params["fc"], num_classes=num_classes)


# ----------------------------------- main -----------------------------------

if __name__ == "__main__":
    key = jax.random.PRNGKey(0)
    k_params, k_input = jax.random.split(key)

    NUM_CLASSES = 5
    params = init_resnet50_params(k_params, NUM_CLASSES)

    # small NCHW input consistent with the module (3-channel images)
    x = jax.random.normal(k_input, (2, 3, 32, 32), jnp.float32)

    logits = resnet_backbone_forward(params, x, NUM_CLASSES)
    logits = jax.block_until_ready(logits)

    assert logits.shape == (2, NUM_CLASSES)
    assert bool(jnp.all(jnp.isfinite(logits)))
    print("KERNEL_OK")
</pallas_src>

<mosaic_0001>
module attributes {stable_mosaic.version = 11 : i64} {
  func.func @_conv_tap_kernel(%arg0: i32, %arg1: i32, %arg2: memref<2x1x19x16xbf16, #tpu.memory_space<vmem>>, %arg3: memref<2x1x19x16xbf16, #tpu.memory_space<vmem>>, %arg4: memref<2x1x19x16xbf16, #tpu.memory_space<vmem>>, %arg5: memref<2x1x19x16xbf16, #tpu.memory_space<vmem>>, %arg6: memref<2x1x19x16xbf16, #tpu.memory_space<vmem>>, %arg7: memref<2x1x19x16xbf16, #tpu.memory_space<vmem>>, %arg8: memref<2x1x19x16xbf16, #tpu.memory_space<vmem>>, %arg9: memref<7x7x8x64xbf16, #tpu.memory_space<vmem>>, %arg10: memref<1x64xf32, #tpu.memory_space<vmem>>, %arg11: memref<2x1x16x64xbf16, #tpu.memory_space<vmem>>) attributes {dimension_semantics = [#tpu.dimension_semantics<parallel>, #tpu.dimension_semantics<parallel>], iteration_bounds = array<i64: 1, 16>, scalar_prefetch = 0 : i64, scratch_operands = 0 : i64, tpu.core_type = #tpu.core_type<tc>, window_params = [{transform_indices = @transform_0, window_bounds = array<i64: 2, 1, 19, 16>}, {transform_indices = @transform_1, window_bounds = array<i64: 2, 1, 19, 16>}, {transform_indices = @transform_2, window_bounds = array<i64: 2, 1, 19, 16>}, {transform_indices = @transform_3, window_bounds = array<i64: 2, 1, 19, 16>}, {transform_indices = @transform_4, window_bounds = array<i64: 2, 1, 19, 16>}, {transform_indices = @transform_5, window_bounds = array<i64: 2, 1, 19, 16>}, {transform_indices = @transform_6, window_bounds = array<i64: 2, 1, 19, 16>}, {transform_indices = @transform_7, window_bounds = array<i64: 7, 7, 8, 64>}, {transform_indices = @transform_8, window_bounds = array<i64: 1, 64>}, {transform_indices = @transform_9, window_bounds = array<i64: 2, 1, 16, 64>}]} {
    %cst = arith.constant 0.000000e+00 : f32
    %0 = vector.broadcast %cst : f32 to vector<32x64xf32>
    %c0 = arith.constant 0 : index
    %c0_0 = arith.constant 0 : index
    %c0_1 = arith.constant 0 : index
    %c0_2 = arith.constant 0 : index
    %1 = vector.load %arg2[%c0, %c0_0, %c0_1, %c0_2] : memref<2x1x19x16xbf16, #tpu.memory_space<vmem>>, vector<2x1x16x8xbf16>
    %2 = vector.shape_cast %1 : vector<2x1x16x8xbf16> to vector<2x16x8xbf16>
    %3 = vector.shape_cast %2 : vector<2x16x8xbf16> to vector<32x8xbf16>
    %c0_3 = arith.constant 0 : index
    %c0_4 = arith.constant 0 : index
    %c0_5 = arith.constant 0 : index
    %c0_6 = arith.constant 0 : index
    %4 = vector.load %arg9[%c0_3, %c0_4, %c0_5, %c0_6] : memref<7x7x8x64xbf16, #tpu.memory_space<vmem>>, vector<1x1x8x64xbf16>
    %5 = vector.shape_cast %4 : vector<1x1x8x64xbf16> to vector<8x64xbf16>
    %cst_7 = arith.constant dense<0.000000e+00> : vector<32x64xf32>
    %6 = tpu.matmul %3, %5, %cst_7 {dimension_numbers = #tpu.dot_dimension_numbers<[1], [0], [0], [1], [0, 0, 1, 1], [], []>} : vector<32x8xbf16>, vector<8x64xbf16>, vector<32x64xf32> -> vector<32x64xf32>
    %7 = arith.addf %0, %6 : vector<32x64xf32>
    %c0_8 = arith.constant 0 : index
    %c0_9 = arith.constant 0 : index
    %c0_10 = arith.constant 0 : index
    %c8 = arith.constant 8 : index
    %8 = vector.load %arg2[%c0_8, %c0_9, %c0_10, %c8] : memref<2x1x19x16xbf16, #tpu.memory_space<vmem>>, vector<2x1x16x8xbf16>
    %9 = vector.shape_cast %8 : vector<2x1x16x8xbf16> to vector<2x16x8xbf16>
    %10 = vector.shape_cast %9 : vector<2x16x8xbf16> to vector<32x8xbf16>
    %c0_11 = arith.constant 0 : index
    %c1 = arith.constant 1 : index
    %c0_12 = arith.constant 0 : index
    %c0_13 = arith.constant 0 : index
    %11 = vector.load %arg9[%c0_11, %c1, %c0_12, %c0_13] : memref<7x7x8x64xbf16, #tpu.memory_space<vmem>>, vector<1x1x8x64xbf16>
    %12 = vector.shape_cast %11 : vector<1x1x8x64xbf16> to vector<8x64xbf16>
    %cst_14 = arith.constant dense<0.000000e+00> : vector<32x64xf32>
    %13 = tpu.matmul %10, %12, %cst_14 {dimension_numbers = #tpu.dot_dimension_numbers<[1], [0], [0], [1], [0, 0, 1, 1], [], []>} : vector<32x8xbf16>, vector<8x64xbf16>, vector<32x64xf32> -> vector<32x64xf32>
    %14 = arith.addf %7, %13 : vector<32x64xf32>
    %c0_15 = arith.constant 0 : index
    %c0_16 = arith.constant 0 : index
    %c1_17 = arith.constant 1 : index
    %c0_18 = arith.constant 0 : index
    %15 = vector.load %arg2[%c0_15, %c0_16, %c1_17, %c0_18] : memref<2x1x19x16xbf16, #tpu.memory_space<vmem>>, vector<2x1x16x8xbf16>
    %16 = vector.shape_cast %15 : vector<2x1x16x8xbf16> to vector<2x16x8xbf16>
    %17 = vector.shape_cast %16 : vector<2x16x8xbf16> to vector<32x8xbf16>
    %c0_19 = arith.constant 0 : index
    %c2 = arith.constant 2 : index
    %c0_20 = arith.constant 0 : index
    %c0_21 = arith.constant 0 : index
    %18 = vector.load %arg9[%c0_19, %c2, %c0_20, %c0_21] : memref<7x7x8x64xbf16, #tpu.memory_space<vmem>>, vector<1x1x8x64xbf16>
    %19 = vector.shape_cast %18 : vector<1x1x8x64xbf16> to vector<8x64xbf16>
    %cst_22 = arith.constant dense<0.000000e+00> : vector<32x64xf32>
    %20 = tpu.matmul %17, %19, %cst_22 {dimension_numbers = #tpu.dot_dimension_numbers<[1], [0], [0], [1], [0, 0, 1, 1], [], []>} : vector<32x8xbf16>, vector<8x64xbf16>, vector<32x64xf32> -> vector<32x64xf32>
    %21 = arith.addf %14, %20 : vector<32x64xf32>
    %c0_23 = arith.constant 0 : index
    %c0_24 = arith.constant 0 : index
    %c1_25 = arith.constant 1 : index
    %c8_26 = arith.constant 8 : index
    %22 = vector.load %arg2[%c0_23, %c0_24, %c1_25, %c8_26] : memref<2x1x19x16xbf16, #tpu.memory_space<vmem>>, vector<2x1x16x8xbf16>
    %23 = vector.shape_cast %22 : vector<2x1x16x8xbf16> to vector<2x16x8xbf16>
    %24 = vector.shape_cast %23 : vector<2x16x8xbf16> to vector<32x8xbf16>
    %c0_27 = arith.constant 0 : index
    %c3 = arith.constant 3 : index
    %c0_28 = arith.constant 0 : index
    %c0_29 = arith.constant 0 : index
    %25 = vector.load %arg9[%c0_27, %c3, %c0_28, %c0_29] : memref<7x7x8x64xbf16, #tpu.memory_space<vmem>>, vector<1x1x8x64xbf16>
    %26 = vector.shape_cast %25 : vector<1x1x8x64xbf16> to vector<8x64xbf16>
    %cst_30 = arith.constant dense<0.000000e+00> : vector<32x64xf32>
    %27 = tpu.matmul %24, %26, %cst_30 {dimension_numbers = #tpu.dot_dimension_numbers<[1], [0], [0], [1], [0, 0, 1, 1], [], []>} : vector<32x8xbf16>, vector<8x64xbf16>, vector<32x64xf32> -> vector<32x64xf32>
    %28 = arith.addf %21, %27 : vector<32x64xf32>
    %c0_31 = arith.constant 0 : index
    %c0_32 = arith.constant 0 : index
    %c2_33 = arith.constant 2 : index
    %c0_34 = arith.constant 0 : index
    %29 = vector.load %arg2[%c0_31, %c0_32, %c2_33, %c0_34] : memref<2x1x19x16xbf16, #tpu.memory_space<vmem>>, vector<2x1x16x8xbf16>
    %30 = vector.shape_cast %29 : vector<2x1x16x8xbf16> to vector<2x16x8xbf16>
    %31 = vector.shape_cast %30 : vector<2x16x8xbf16> to vector<32x8xbf16>
    %c0_35 = arith.constant 0 : index
    %c4 = arith.constant 4 : index
    %c0_36 = arith.constant 0 : index
    %c0_37 = arith.constant 0 : index
    %32 = vector.load %arg9[%c0_35, %c4, %c0_36, %c0_37] : memref<7x7x8x64xbf16, #tpu.memory_space<vmem>>, vector<1x1x8x64xbf16>
    %33 = vector.shape_cast %32 : vector<1x1x8x64xbf16> to vector<8x64xbf16>
    %cst_38 = arith.constant dense<0.000000e+00> : vector<32x64xf32>
    %34 = tpu.matmul %31, %33, %cst_38 {dimension_numbers = #tpu.dot_dimension_numbers<[1], [0], [0], [1], [0, 0, 1, 1], [], []>} : vector<32x8xbf16>, vector<8x64xbf16>, vector<32x64xf32> -> vector<32x64xf32>
    %35 = arith.addf %28, %34 : vector<32x64xf32>
    %c0_39 = arith.constant 0 : index
    %c0_40 = arith.constant 0 : index
    %c2_41 = arith.constant 2 : index
    %c8_42 = arith.constant 8 : index
    %36 = vector.load %arg2[%c0_39, %c0_40, %c2_41, %c8_42] : memref<2x1x19x16xbf16, #tpu.memory_space<vmem>>, vector<2x1x16x8xbf16>
    %37 = vector.shape_cast %36 : vector<2x1x16x8xbf16> to vector<2x16x8xbf16>
    %38 = vector.shape_cast %37 : vector<2x16x8xbf16> to vector<32x8xbf16>
    %c0_43 = arith.constant 0 : index
    %c5 = arith.constant 5 : index
    %c0_44 = arith.constant 0 : index
    %c0_45 = arith.constant 0 : index
    %39 = vector.load %arg9[%c0_43, %c5, %c0_44, %c0_45] : memref<7x7x8x64xbf16, #tpu.memory_space<vmem>>, vector<1x1x8x64xbf16>
    %40 = vector.shape_cast %39 : vector<1x1x8x64xbf16> to vector<8x64xbf16>
    %cst_46 = arith.constant dense<0.000000e+00> : vector<32x64xf32>
    %41 = tpu.matmul %38, %40, %cst_46 {dimension_numbers = #tpu.dot_dimension_numbers<[1], [0], [0], [1], [0, 0, 1, 1], [], []>} : vector<32x8xbf16>, vector<8x64xbf16>, vector<32x64xf32> -> vector<32x64xf32>
    %42 = arith.addf %35, %41 : vector<32x64xf32>
    %c0_47 = arith.constant 0 : index
    %c0_48 = arith.constant 0 : index
    %c3_49 = arith.constant 3 : index
    %c0_50 = arith.constant 0 : index
    %43 = vector.load %arg2[%c0_47, %c0_48, %c3_49, %c0_50] : memref<2x1x19x16xbf16, #tpu.memory_space<vmem>>, vector<2x1x16x8xbf16>
    %44 = vector.shape_cast %43 : vector<2x1x16x8xbf16> to vector<2x16x8xbf16>
    %45 = vector.shape_cast %44 : vector<2x16x8xbf16> to vector<32x8xbf16>
    %c0_51 = arith.constant 0 : index
    %c6 = arith.constant 6 : index
    %c0_52 = arith.constant 0 : index
    %c0_53 = arith.constant 0 : index
    %46 = vector.load %arg9[%c0_51, %c6, %c0_52, %c0_53] : memref<7x7x8x64xbf16, #tpu.memory_space<vmem>>, vector<1x1x8x64xbf16>
    %47 = vector.shape_cast %46 : vector<1x1x8x64xbf16> to vector<8x64xbf16>
    %cst_54 = arith.constant dense<0.000000e+00> : vector<32x64xf32>
    %48 = tpu.matmul %45, %47, %cst_54 {dimension_numbers = #tpu.dot_dimension_numbers<[1], [0], [0], [1], [0, 0, 1, 1], [], []>} : vector<32x8xbf16>, vector<8x64xbf16>, vector<32x64xf32> -> vector<32x64xf32>
    %49 = arith.addf %42, %48 : vector<32x64xf32>
    %c0_55 = arith.constant 0 : index
    %c0_56 = arith.constant 0 : index
    %c0_57 = arith.constant 0 : index
    %c0_58 = arith.constant 0 : index
    %50 = vector.load %arg3[%c0_55, %c0_56, %c0_57, %c0_58] : memref<2x1x19x16xbf16, #tpu.memory_space<vmem>>, vector<2x1x16x8xbf16>
    %51 = vector.shape_cast %50 : vector<2x1x16x8xbf16> to vector<2x16x8xbf16>
    %52 = vector.shape_cast %51 : vector<2x16x8xbf16> to vector<32x8xbf16>
    %c1_59 = arith.constant 1 : index
    %c0_60 = arith.constant 0 : index
    %c0_61 = arith.constant 0 : index
    %c0_62 = arith.constant 0 : index
    %53 = vector.load %arg9[%c1_59, %c0_60, %c0_61, %c0_62] : memref<7x7x8x64xbf16, #tpu.memory_space<vmem>>, vector<1x1x8x64xbf16>
    %54 = vector.shape_cast %53 : vector<1x1x8x64xbf16> to vector<8x64xbf16>
    %cst_63 = arith.constant dense<0.000000e+00> : vector<32x64xf32>
    %55 = tpu.matmul %52, %54, %cst_63 {dimension_numbers = #tpu.dot_dimension_numbers<[1], [0], [0], [1], [0, 0, 1, 1], [], []>} : vector<32x8xbf16>, vector<8x64xbf16>, vector<32x64xf32> -> vector<32x64xf32>
    %56 = arith.addf %49, %55 : vector<32x64xf32>
    %c0_64 = arith.constant 0 : index
    %c0_65 = arith.constant 0 : index
    %c0_66 = arith.constant 0 : index
    %c8_67 = arith.constant 8 : index
    %57 = vector.load %arg3[%c0_64, %c0_65, %c0_66, %c8_67] : memref<2x1x19x16xbf16, #tpu.memory_space<vmem>>, vector<2x1x16x8xbf16>
    %58 = vector.shape_cast %57 : vector<2x1x16x8xbf16> to vector<2x16x8xbf16>
    %59 = vector.shape_cast %58 : vector<2x16x8xbf16> to vector<32x8xbf16>
    %c1_68 = arith.constant 1 : index
    %c1_69 = arith.constant 1 : index
    %c0_70 = arith.constant 0 : index
    %c0_71 = arith.constant 0 : index
    %60 = vector.load %arg9[%c1_68, %c1_69, %c0_70, %c0_71] : memref<7x7x8x64xbf16, #tpu.memory_space<vmem>>, vector<1x1x8x64xbf16>
    %61 = vector.shape_cast %60 : vector<1x1x8x64xbf16> to vector<8x64xbf16>
    %cst_72 = arith.constant dense<0.000000e+00> : vector<32x64xf32>
    %62 = tpu.matmul %59, %61, %cst_72 {dimension_numbers = #tpu.dot_dimension_numbers<[1], [0], [0], [1], [0, 0, 1, 1], [], []>} : vector<32x8xbf16>, vector<8x64xbf16>, vector<32x64xf32> -> vector<32x64xf32>
    %63 = arith.addf %56, %62 : vector<32x64xf32>
    %c0_73 = arith.constant 0 : index
    %c0_74 = arith.constant 0 : index
    %c1_75 = arith.constant 1 : index
    %c0_76 = arith.constant 0 : index
    %64 = vector.load %arg3[%c0_73, %c0_74, %c1_75, %c0_76] : memref<2x1x19x16xbf16, #tpu.memory_space<vmem>>, vector<2x1x16x8xbf16>
    %65 = vector.shape_cast %64 : vector<2x1x16x8xbf16> to vector<2x16x8xbf16>
    %66 = vector.shape_cast %65 : vector<2x16x8xbf16> to vector<32x8xbf16>
    %c1_77 = arith.constant 1 : index
    %c2_78 = arith.constant 2 : index
    %c0_79 = arith.constant 0 : index
    %c0_80 = arith.constant 0 : index
    %67 = vector.load %arg9[%c1_77, %c2_78, %c0_79, %c0_80] : memref<7x7x8x64xbf16, #tpu.memory_space<vmem>>, vector<1x1x8x64xbf16>
    %68 = vector.shape_cast %67 : vector<1x1x8x64xbf16> to vector<8x64xbf16>
    %cst_81 = arith.constant dense<0.000000e+00> : vector<32x64xf32>
    %69 = tpu.matmul %66, %68, %cst_81 {dimension_numbers = #tpu.dot_dimension_numbers<[1], [0], [0], [1], [0, 0, 1, 1], [], []>} : vector<32x8xbf16>, vector<8x64xbf16>, vector<32x64xf32> -> vector<32x64xf32>
    %70 = arith.addf %63, %69 : vector<32x64xf32>
    %c0_82 = arith.constant 0 : index
    %c0_83 = arith.constant 0 : index
    %c1_84 = arith.constant 1 : index
    %c8_85 = arith.constant 8 : index
    %71 = vector.load %arg3[%c0_82, %c0_83, %c1_84, %c8_85] : memref<2x1x19x16xbf16, #tpu.memory_space<vmem>>, vector<2x1x16x8xbf16>
    %72 = vector.shape_cast %71 : vector<2x1x16x8xbf16> to vector<2x16x8xbf16>
    %73 = vector.shape_cast %72 : vector<2x16x8xbf16> to vector<32x8xbf16>
    %c1_86 = arith.constant 1 : index
    %c3_87 = arith.constant 3 : index
    %c0_88 = arith.constant 0 : index
    %c0_89 = arith.constant 0 : index
    %74 = vector.load %arg9[%c1_86, %c3_87, %c0_88, %c0_89] : memref<7x7x8x64xbf16, #tpu.memory_space<vmem>>, vector<1x1x8x64xbf16>
    %75 = vector.shape_cast %74 : vector<1x1x8x64xbf16> to vector<8x64xbf16>
    %cst_90 = arith.constant dense<0.000000e+00> : vector<32x64xf32>
    %76 = tpu.matmul %73, %75, %cst_90 {dimension_numbers = #tpu.dot_dimension_numbers<[1], [0], [0], [1], [0, 0, 1, 1], [], []>} : vector<32x8xbf16>, vector<8x64xbf16>, vector<32x64xf32> -> vector<32x64xf32>
    %77 = arith.addf %70, %76 : vector<32x64xf32>
    %c0_91 = arith.constant 0 : index
    %c0_92 = arith.constant 0 : index
    %c2_93 = arith.constant 2 : index
    %c0_94 = arith.constant 0 : index
    %78 = vector.load %arg3[%c0_91, %c0_92, %c2_93, %c0_94] : memref<2x1x19x16xbf16, #tpu.memory_space<vmem>>, vector<2x1x16x8xbf16>
    %79 = vector.shape_cast %78 : vector<2x1x16x8xbf16> to vector<2x16x8xbf16>
    %80 = vector.shape_cast %79 : vector<2x16x8xbf16> to vector<32x8xbf16>
    %c1_95 = arith.constant 1 : index
    %c4_96 = arith.constant 4 : index
    %c0_97 = arith.constant 0 : index
    %c0_98 = arith.constant 0 : index
    %81 = vector.load %arg9[%c1_95, %c4_96, %c0_97, %c0_98] : memref<7x7x8x64xbf16, #tpu.memory_space<vmem>>, vector<1x1x8x64xbf16>
    %82 = vector.shape_cast %81 : vector<1x1x8x64xbf16> to vector<8x64xbf16>
    %cst_99 = arith.constant dense<0.000000e+00> : vector<32x64xf32>
    %83 = tpu.matmul %80, %82, %cst_99 {dimension_numbers = #tpu.dot_dimension_numbers<[1], [0], [0], [1], [0, 0, 1, 1], [], []>} : vector<32x8xbf16>, vector<8x64xbf16>, vector<32x64xf32> -> vector<32x64xf32>
    %84 = arith.addf %77, %83 : vector<32x64xf32>
    %c0_100 = arith.constant 0 : index
    %c0_101 = arith.constant 0 : index
    %c2_102 = arith.constant 2 : index
    %c8_103 = arith.constant 8 : index
    %85 = vector.load %arg3[%c0_100, %c0_101, %c2_102, %c8_103] : memref<2x1x19x16xbf16, #tpu.memory_space<vmem>>, vector<2x1x16x8xbf16>
    %86 = vector.shape_cast %85 : vector<2x1x16x8xbf16> to vector<2x16x8xbf16>
    %87 = vector.shape_cast %86 : vector<2x16x8xbf16> to vector<32x8xbf16>
    %c1_104 = arith.constant 1 : index
    %c5_105 = arith.constant 5 : index
    %c0_106 = arith.constant 0 : index
    %c0_107 = arith.constant 0 : index
    %88 = vector.load %arg9[%c1_104, %c5_105, %c0_106, %c0_107] : memref<7x7x8x64xbf16, #tpu.memory_space<vmem>>, vector<1x1x8x64xbf16>
    %89 = vector.shape_cast %88 : vector<1x1x8x64xbf16> to vector<8x64xbf16>
    %cst_108 = arith.constant dense<0.000000e+00> : vector<32x64xf32>
    %90 = tpu.matmul %87, %89, %cst_108 {dimension_numbers = #tpu.dot_dimension_numbers<[1], [0], [0], [1], [0, 0, 1, 1], [], []>} : vector<32x8xbf16>, vector<8x64xbf16>, vector<32x64xf32> -> vector<32x64xf32>
    %91 = arith.addf %84, %90 : vector<32x64xf32>
    %c0_109 = arith.constant 0 : index
    %c0_110 = arith.constant 0 : index
    %c3_111 = arith.constant 3 : index
    %c0_112 = arith.constant 0 : index
    %92 = vector.load %arg3[%c0_109, %c0_110, %c3_111, %c0_112] : memref<2x1x19x16xbf16, #tpu.memory_space<vmem>>, vector<2x1x16x8xbf16>
    %93 = vector.shape_cast %92 : vector<2x1x16x8xbf16> to vector<2x16x8xbf16>
    %94 = vector.shape_cast %93 : vector<2x16x8xbf16> to vector<32x8xbf16>
    %c1_113 = arith.constant 1 : index
    %c6_114 = arith.constant 6 : index
    %c0_115 = arith.constant 0 : index
    %c0_116 = arith.constant 0 : index
    %95 = vector.load %arg9[%c1_113, %c6_114, %c0_115, %c0_116] : memref<7x7x8x64xbf16, #tpu.memory_space<vmem>>, vector<1x1x8x64xbf16>
    %96 = vector.shape_cast %95 : vector<1x1x8x64xbf16> to vector<8x64xbf16>
    %cst_117 = arith.constant dense<0.000000e+00> : vector<32x64xf32>
    %97 = tpu.matmul %94, %96, %cst_117 {dimension_numbers = #tpu.dot_dimension_numbers<[1], [0], [0], [1], [0, 0, 1, 1], [], []>} : vector<32x8xbf16>, vector<8x64xbf16>, vector<32x64xf32> -> vector<32x64xf32>
    %98 = arith.addf %91, %97 : vector<32x64xf32>
    %c0_118 = arith.constant 0 : index
    %c0_119 = arith.constant 0 : index
    %c0_120 = arith.constant 0 : index
    %c0_121 = arith.constant 0 : index
    %99 = vector.load %arg4[%c0_118, %c0_119, %c0_120, %c0_121] : memref<2x1x19x16xbf16, #tpu.memory_space<vmem>>, vector<2x1x16x8xbf16>
    %100 = vector.shape_cast %99 : vector<2x1x16x8xbf16> to vector<2x16x8xbf16>
    %101 = vector.shape_cast %100 : vector<2x16x8xbf16> to vector<32x8xbf16>
    %c2_122 = arith.constant 2 : index
    %c0_123 = arith.constant 0 : index
    %c0_124 = arith.constant 0 : index
    %c0_125 = arith.constant 0 : index
    %102 = vector.load %arg9[%c2_122, %c0_123, %c0_124, %c0_125] : memref<7x7x8x64xbf16, #tpu.memory_space<vmem>>, vector<1x1x8x64xbf16>
    %103 = vector.shape_cast %102 : vector<1x1x8x64xbf16> to vector<8x64xbf16>
    %cst_126 = arith.constant dense<0.000000e+00> : vector<32x64xf32>
    %104 = tpu.matmul %101, %103, %cst_126 {dimension_numbers = #tpu.dot_dimension_numbers<[1], [0], [0], [1], [0, 0, 1, 1], [], []>} : vector<32x8xbf16>, vector<8x64xbf16>, vector<32x64xf32> -> vector<32x64xf32>
    %105 = arith.addf %98, %104 : vector<32x64xf32>
    %c0_127 = arith.constant 0 : index
    %c0_128 = arith.constant 0 : index
    %c0_129 = arith.constant 0 : index
    %c8_130 = arith.constant 8 : index
    %106 = vector.load %arg4[%c0_127, %c0_128, %c0_129, %c8_130] : memref<2x1x19x16xbf16, #tpu.memory_space<vmem>>, vector<2x1x16x8xbf16>
    %107 = vector.shape_cast %106 : vector<2x1x16x8xbf16> to vector<2x16x8xbf16>
    %108 = vector.shape_cast %107 : vector<2x16x8xbf16> to vector<32x8xbf16>
    %c2_131 = arith.constant 2 : index
    %c1_132 = arith.constant 1 : index
    %c0_133 = arith.constant 0 : index
    %c0_134 = arith.constant 0 : index
    %109 = vector.load %arg9[%c2_131, %c1_132, %c0_133, %c0_134] : memref<7x7x8x64xbf16, #tpu.memory_space<vmem>>, vector<1x1x8x64xbf16>
    %110 = vector.shape_cast %109 : vector<1x1x8x64xbf16> to vector<8x64xbf16>
    %cst_135 = arith.constant dense<0.000000e+00> : vector<32x64xf32>
    %111 = tpu.matmul %108, %110, %cst_135 {dimension_numbers = #tpu.dot_dimension_numbers<[1], [0], [0], [1], [0, 0, 1, 1], [], []>} : vector<32x8xbf16>, vector<8x64xbf16>, vector<32x64xf32> -> vector<32x64xf32>
    %112 = arith.addf %105, %111 : vector<32x64xf32>
    %c0_136 = arith.constant 0 : index
    %c0_137 = arith.constant 0 : index
    %c1_138 = arith.constant 1 : index
    %c0_139 = arith.constant 0 : index
    %113 = vector.load %arg4[%c0_136, %c0_137, %c1_138, %c0_139] : memref<2x1x19x16xbf16, #tpu.memory_space<vmem>>, vector<2x1x16x8xbf16>
    %114 = vector.shape_cast %113 : vector<2x1x16x8xbf16> to vector<2x16x8xbf16>
    %115 = vector.shape_cast %114 : vector<2x16x8xbf16> to vector<32x8xbf16>
    %c2_140 = arith.constant 2 : index
    %c2_141 = arith.constant 2 : index
    %c0_142 = arith.constant 0 : index
    %c0_143 = arith.constant 0 : index
    %116 = vector.load %arg9[%c2_140, %c2_141, %c0_142, %c0_143] : memref<7x7x8x64xbf16, #tpu.memory_space<vmem>>, vector<1x1x8x64xbf16>
    %117 = vector.shape_cast %116 : vector<1x1x8x64xbf16> to vector<8x64xbf16>
    %cst_144 = arith.constant dense<0.000000e+00> : vector<32x64xf32>
    %118 = tpu.matmul %115, %117, %cst_144 {dimension_numbers = #tpu.dot_dimension_numbers<[1], [0], [0], [1], [0, 0, 1, 1], [], []>} : vector<32x8xbf16>, vector<8x64xbf16>, vector<32x64xf32> -> vector<32x64xf32>
    %119 = arith.addf %112, %118 : vector<32x64xf32>
    %c0_145 = arith.constant 0 : index
    %c0_146 = arith.constant 0 : index
    %c1_147 = arith.constant 1 : index
    %c8_148 = arith.constant 8 : index
    %120 = vector.load %arg4[%c0_145, %c0_146, %c1_147, %c8_148] : memref<2x1x19x16xbf16, #tpu.memory_space<vmem>>, vector<2x1x16x8xbf16>
    %121 = vector.shape_cast %120 : vector<2x1x16x8xbf16> to vector<2x16x8xbf16>
    %122 = vector.shape_cast %121 : vector<2x16x8xbf16> to vector<32x8xbf16>
    %c2_149 = arith.constant 2 : index
    %c3_150 = arith.constant 3 : index
    %c0_151 = arith.constant 0 : index
    %c0_152 = arith.constant 0 : index
    %123 = vector.load %arg9[%c2_149, %c3_150, %c0_151, %c0_152] : memref<7x7x8x64xbf16, #tpu.memory_space<vmem>>, vector<1x1x8x64xbf16>
    %124 = vector.shape_cast %123 : vector<1x1x8x64xbf16> to vector<8x64xbf16>
    %cst_153 = arith.constant dense<0.000000e+00> : vector<32x64xf32>
    %125 = tpu.matmul %122, %124, %cst_153 {dimension_numbers = #tpu.dot_dimension_numbers<[1], [0], [0], [1], [0, 0, 1, 1], [], []>} : vector<32x8xbf16>, vector<8x64xbf16>, vector<32x64xf32> -> vector<32x64xf32>
    %126 = arith.addf %119, %125 : vector<32x64xf32>
    %c0_154 = arith.constant 0 : index
    %c0_155 = arith.constant 0 : index
    %c2_156 = arith.constant 2 : index
    %c0_157 = arith.constant 0 : index
    %127 = vector.load %arg4[%c0_154, %c0_155, %c2_156, %c0_157] : memref<2x1x19x16xbf16, #tpu.memory_space<vmem>>, vector<2x1x16x8xbf16>
    %128 = vector.shape_cast %127 : vector<2x1x16x8xbf16> to vector<2x16x8xbf16>
    %129 = vector.shape_cast %128 : vector<2x16x8xbf16> to vector<32x8xbf16>
    %c2_158 = arith.constant 2 : index
    %c4_159 = arith.constant 4 : index
    %c0_160 = arith.constant 0 : index
    %c0_161 = arith.constant 0 : index
    %130 = vector.load %arg9[%c2_158, %c4_159, %c0_160, %c0_161] : memref<7x7x8x64xbf16, #tpu.memory_space<vmem>>, vector<1x1x8x64xbf16>
    %131 = vector.shape_cast %130 : vector<1x1x8x64xbf16> to vector<8x64xbf16>
    %cst_162 = arith.constant dense<0.000000e+00> : vector<32x64xf32>
    %132 = tpu.matmul %129, %131, %cst_162 {dimension_numbers = #tpu.dot_dimension_numbers<[1], [0], [0], [1], [0, 0, 1, 1], [], []>} : vector<32x8xbf16>, vector<8x64xbf16>, vector<32x64xf32> -> vector<32x64xf32>
    %133 = arith.addf %126, %132 : vector<32x64xf32>
    %c0_163 = arith.constant 0 : index
    %c0_164 = arith.constant 0 : index
    %c2_165 = arith.constant 2 : index
    %c8_166 = arith.constant 8 : index
    %134 = vector.load %arg4[%c0_163, %c0_164, %c2_165, %c8_166] : memref<2x1x19x16xbf16, #tpu.memory_space<vmem>>, vector<2x1x16x8xbf16>
    %135 = vector.shape_cast %134 : vector<2x1x16x8xbf16> to vector<2x16x8xbf16>
    %136 = vector.shape_cast %135 : vector<2x16x8xbf16> to vector<32x8xbf16>
    %c2_167 = arith.constant 2 : index
    %c5_168 = arith.constant 5 : index
    %c0_169 = arith.constant 0 : index
    %c0_170 = arith.constant 0 : index
    %137 = vector.load %arg9[%c2_167, %c5_168, %c0_169, %c0_170] : memref<7x7x8x64xbf16, #tpu.memory_space<vmem>>, vector<1x1x8x64xbf16>
    %138 = vector.shape_cast %137 : vector<1x1x8x64xbf16> to vector<8x64xbf16>
    %cst_171 = arith.constant dense<0.000000e+00> : vector<32x64xf32>
    %139 = tpu.matmul %136, %138, %cst_171 {dimension_numbers = #tpu.dot_dimension_numbers<[1], [0], [0], [1], [0, 0, 1, 1], [], []>} : vector<32x8xbf16>, vector<8x64xbf16>, vector<32x64xf32> -> vector<32x64xf32>
    %140 = arith.addf %133, %139 : vector<32x64xf32>
    %c0_172 = arith.constant 0 : index
    %c0_173 = arith.constant 0 : index
    %c3_174 = arith.constant 3 : index
    %c0_175 = arith.constant 0 : index
    %141 = vector.load %arg4[%c0_172, %c0_173, %c3_174, %c0_175] : memref<2x1x19x16xbf16, #tpu.memory_space<vmem>>, vector<2x1x16x8xbf16>
    %142 = vector.shape_cast %141 : vector<2x1x16x8xbf16> to vector<2x16x8xbf16>
    %143 = vector.shape_cast %142 : vector<2x16x8xbf16> to vector<32x8xbf16>
    %c2_176 = arith.constant 2 : index
    %c6_177 = arith.constant 6 : index
    %c0_178 = arith.constant 0 : index
    %c0_179 = arith.constant 0 : index
    %144 = vector.load %arg9[%c2_176, %c6_177, %c0_178, %c0_179] : memref<7x7x8x64xbf16, #tpu.memory_space<vmem>>, vector<1x1x8x64xbf16>
    %145 = vector.shape_cast %144 : vector<1x1x8x64xbf16> to vector<8x64xbf16>
    %cst_180 = arith.constant dense<0.000000e+00> : vector<32x64xf32>
    %146 = tpu.matmul %143, %145, %cst_180 {dimension_numbers = #tpu.dot_dimension_numbers<[1], [0], [0], [1], [0, 0, 1, 1], [], []>} : vector<32x8xbf16>, vector<8x64xbf16>, vector<32x64xf32> -> vector<32x64xf32>
    %147 = arith.addf %140, %146 : vector<32x64xf32>
    %c0_181 = arith.constant 0 : index
    %c0_182 = arith.constant 0 : index
    %c0_183 = arith.constant 0 : index
    %c0_184 = arith.constant 0 : index
    %148 = vector.load %arg5[%c0_181, %c0_182, %c0_183, %c0_184] : memref<2x1x19x16xbf16, #tpu.memory_space<vmem>>, vector<2x1x16x8xbf16>
    %149 = vector.shape_cast %148 : vector<2x1x16x8xbf16> to vector<2x16x8xbf16>
    %150 = vector.shape_cast %149 : vector<2x16x8xbf16> to vector<32x8xbf16>
    %c3_185 = arith.constant 3 : index
    %c0_186 = arith.constant 0 : index
    %c0_187 = arith.constant 0 : index
    %c0_188 = arith.constant 0 : index
    %151 = vector.load %arg9[%c3_185, %c0_186, %c0_187, %c0_188] : memref<7x7x8x64xbf16, #tpu.memory_space<vmem>>, vector<1x1x8x64xbf16>
    %152 = vector.shape_cast %151 : vector<1x1x8x64xbf16> to vector<8x64xbf16>
    %cst_189 = arith.constant dense<0.000000e+00> : vector<32x64xf32>
    %153 = tpu.matmul %150, %152, %cst_189 {dimension_numbers = #tpu.dot_dimension_numbers<[1], [0], [0], [1], [0, 0, 1, 1], [], []>} : vector<32x8xbf16>, vector<8x64xbf16>, vector<32x64xf32> -> vector<32x64xf32>
    %154 = arith.addf %147, %153 : vector<32x64xf32>
    %c0_190 = arith.constant 0 : index
    %c0_191 = arith.constant 0 : index
    %c0_192 = arith.constant 0 : index
    %c8_193 = arith.constant 8 : index
    %155 = vector.load %arg5[%c0_190, %c0_191, %c0_192, %c8_193] : memref<2x1x19x16xbf16, #tpu.memory_space<vmem>>, vector<2x1x16x8xbf16>
    %156 = vector.shape_cast %155 : vector<2x1x16x8xbf16> to vector<2x16x8xbf16>
    %157 = vector.shape_cast %156 : vector<2x16x8xbf16> to vector<32x8xbf16>
    %c3_194 = arith.constant 3 : index
    %c1_195 = arith.constant 1 : index
    %c0_196 = arith.constant 0 : index
    %c0_197 = arith.constant 0 : index
    %158 = vector.load %arg9[%c3_194, %c1_195, %c0_196, %c0_197] : memref<7x7x8x64xbf16, #tpu.memory_space<vmem>>, vector<1x1x8x64xbf16>
    %159 = vector.shape_cast %158 : vector<1x1x8x64xbf16> to vector<8x64xbf16>
    %cst_198 = arith.constant dense<0.000000e+00> : vector<32x64xf32>
    %160 = tpu.matmul %157, %159, %cst_198 {dimension_numbers = #tpu.dot_dimension_numbers<[1], [0], [0], [1], [0, 0, 1, 1], [], []>} : vector<32x8xbf16>, vector<8x64xbf16>, vector<32x64xf32> -> vector<32x64xf32>
    %161 = arith.addf %154, %160 : vector<32x64xf32>
    %c0_199 = arith.constant 0 : index
    %c0_200 = arith.constant 0 : index
    %c1_201 = arith.constant 1 : index
    %c0_202 = arith.constant 0 : index
    %162 = vector.load %arg5[%c0_199, %c0_200, %c1_201, %c0_202] : memref<2x1x19x16xbf16, #tpu.memory_space<vmem>>, vector<2x1x16x8xbf16>
    %163 = vector.shape_cast %162 : vector<2x1x16x8xbf16> to vector<2x16x8xbf16>
    %164 = vector.shape_cast %163 : vector<2x16x8xbf16> to vector<32x8xbf16>
    %c3_203 = arith.constant 3 : index
    %c2_204 = arith.constant 2 : index
    %c0_205 = arith.constant 0 : index
    %c0_206 = arith.constant 0 : index
    %165 = vector.load %arg9[%c3_203, %c2_204, %c0_205, %c0_206] : memref<7x7x8x64xbf16, #tpu.memory_space<vmem>>, vector<1x1x8x64xbf16>
    %166 = vector.shape_cast %165 : vector<1x1x8x64xbf16> to vector<8x64xbf16>
    %cst_207 = arith.constant dense<0.000000e+00> : vector<32x64xf32>
    %167 = tpu.matmul %164, %166, %cst_207 {dimension_numbers = #tpu.dot_dimension_numbers<[1], [0], [0], [1], [0, 0, 1, 1], [], []>} : vector<32x8xbf16>, vector<8x64xbf16>, vector<32x64xf32> -> vector<32x64xf32>
    %168 = arith.addf %161, %167 : vector<32x64xf32>
    %c0_208 = arith.constant 0 : index
    %c0_209 = arith.constant 0 : index
    %c1_210 = arith.constant 1 : index
    %c8_211 = arith.constant 8 : index
    %169 = vector.load %arg5[%c0_208, %c0_209, %c1_210, %c8_211] : memref<2x1x19x16xbf16, #tpu.memory_space<vmem>>, vector<2x1x16x8xbf16>
    %170 = vector.shape_cast %169 : vector<2x1x16x8xbf16> to vector<2x16x8xbf16>
    %171 = vector.shape_cast %170 : vector<2x16x8xbf16> to vector<32x8xbf16>
    %c3_212 = arith.constant 3 : index
    %c3_213 = arith.constant 3 : index
    %c0_214 = arith.constant 0 : index
    %c0_215 = arith.constant 0 : index
    %172 = vector.load %arg9[%c3_212, %c3_213, %c0_214, %c0_215] : memref<7x7x8x64xbf16, #tpu.memory_space<vmem>>, vector<1x1x8x64xbf16>
    %173 = vector.shape_cast %172 : vector<1x1x8x64xbf16> to vector<8x64xbf16>
    %cst_216 = arith.constant dense<0.000000e+00> : vector<32x64xf32>
    %174 = tpu.matmul %171, %173, %cst_216 {dimension_numbers = #tpu.dot_dimension_numbers<[1], [0], [0], [1], [0, 0, 1, 1], [], []>} : vector<32x8xbf16>, vector<8x64xbf16>, vector<32x64xf32> -> vector<32x64xf32>
    %175 = arith.addf %168, %174 : vector<32x64xf32>
    %c0_217 = arith.constant 0 : index
    %c0_218 = arith.constant 0 : index
    %c2_219 = arith.constant 2 : index
    %c0_220 = arith.constant 0 : index
    %176 = vector.load %arg5[%c0_217, %c0_218, %c2_219, %c0_220] : memref<2x1x19x16xbf16, #tpu.memory_space<vmem>>, vector<2x1x16x8xbf16>
    %177 = vector.shape_cast %176 : vector<2x1x16x8xbf16> to vector<2x16x8xbf16>
    %178 = vector.shape_cast %177 : vector<2x16x8xbf16> to vector<32x8xbf16>
    %c3_221 = arith.constant 3 : index
    %c4_222 = arith.constant 4 : index
    %c0_223 = arith.constant 0 : index
    %c0_224 = arith.constant 0 : index
    %179 = vector.load %arg9[%c3_221, %c4_222, %c0_223, %c0_224] : memref<7x7x8x64xbf16, #tpu.memory_space<vmem>>, vector<1x1x8x64xbf16>
    %180 = vector.shape_cast %179 : vector<1x1x8x64xbf16> to vector<8x64xbf16>
    %cst_225 = arith.constant dense<0.000000e+00> : vector<32x64xf32>
    %181 = tpu.matmul %178, %180, %cst_225 {dimension_numbers = #tpu.dot_dimension_numbers<[1], [0], [0], [1], [0, 0, 1, 1], [], []>} : vector<32x8xbf16>, vector<8x64xbf16>, vector<32x64xf32> -> vector<32x64xf32>
    %182 = arith.addf %175, %181 : vector<32x64xf32>
    %c0_226 = arith.constant 0 : index
    %c0_227 = arith.constant 0 : index
    %c2_228 = arith.constant 2 : index
    %c8_229 = arith.constant 8 : index
    %183 = vector.load %arg5[%c0_226, %c0_227, %c2_228, %c8_229] : memref<2x1x19x16xbf16, #tpu.memory_space<vmem>>, vector<2x1x16x8xbf16>
    %184 = vector.shape_cast %183 : vector<2x1x16x8xbf16> to vector<2x16x8xbf16>
    %185 = vector.shape_cast %184 : vector<2x16x8xbf16> to vector<32x8xbf16>
    %c3_230 = arith.constant 3 : index
    %c5_231 = arith.constant 5 : index
    %c0_232 = arith.constant 0 : index
    %c0_233 = arith.constant 0 : index
    %186 = vector.load %arg9[%c3_230, %c5_231, %c0_232, %c0_233] : memref<7x7x8x64xbf16, #tpu.memory_space<vmem>>, vector<1x1x8x64xbf16>
    %187 = vector.shape_cast %186 : vector<1x1x8x64xbf16> to vector<8x64xbf16>
    %cst_234 = arith.constant dense<0.000000e+00> : vector<32x64xf32>
    %188 = tpu.matmul %185, %187, %cst_234 {dimension_numbers = #tpu.dot_dimension_numbers<[1], [0], [0], [1], [0, 0, 1, 1], [], []>} : vector<32x8xbf16>, vector<8x64xbf16>, vector<32x64xf32> -> vector<32x64xf32>
    %189 = arith.addf %182, %188 : vector<32x64xf32>
    %c0_235 = arith.constant 0 : index
    %c0_236 = arith.constant 0 : index
    %c3_237 = arith.constant 3 : index
    %c0_238 = arith.constant 0 : index
    %190 = vector.load %arg5[%c0_235, %c0_236, %c3_237, %c0_238] : memref<2x1x19x16xbf16, #tpu.memory_space<vmem>>, vector<2x1x16x8xbf16>
    %191 = vector.shape_cast %190 : vector<2x1x16x8xbf16> to vector<2x16x8xbf16>
    %192 = vector.shape_cast %191 : vector<2x16x8xbf16> to vector<32x8xbf16>
    %c3_239 = arith.constant 3 : index
    %c6_240 = arith.constant 6 : index
    %c0_241 = arith.constant 0 : index
    %c0_242 = arith.constant 0 : index
    %193 = vector.load %arg9[%c3_239, %c6_240, %c0_241, %c0_242] : memref<7x7x8x64xbf16, #tpu.memory_space<vmem>>, vector<1x1x8x64xbf16>
    %194 = vector.shape_cast %193 : vector<1x1x8x64xbf16> to vector<8x64xbf16>
    %cst_243 = arith.constant dense<0.000000e+00> : vector<32x64xf32>
    %195 = tpu.matmul %192, %194, %cst_243 {dimension_numbers = #tpu.dot_dimension_numbers<[1], [0], [0], [1], [0, 0, 1, 1], [], []>} : vector<32x8xbf16>, vector<8x64xbf16>, vector<32x64xf32> -> vector<32x64xf32>
    %196 = arith.addf %189, %195 : vector<32x64xf32>
    %c0_244 = arith.constant 0 : index
    %c0_245 = arith.constant 0 : index
    %c0_246 = arith.constant 0 : index
    %c0_247 = arith.constant 0 : index
    %197 = vector.load %arg6[%c0_244, %c0_245, %c0_246, %c0_247] : memref<2x1x19x16xbf16, #tpu.memory_space<vmem>>, vector<2x1x16x8xbf16>
    %198 = vector.shape_cast %197 : vector<2x1x16x8xbf16> to vector<2x16x8xbf16>
    %199 = vector.shape_cast %198 : vector<2x16x8xbf16> to vector<32x8xbf16>
    %c4_248 = arith.constant 4 : index
    %c0_249 = arith.constant 0 : index
    %c0_250 = arith.constant 0 : index
    %c0_251 = arith.constant 0 : index
    %200 = vector.load %arg9[%c4_248, %c0_249, %c0_250, %c0_251] : memref<7x7x8x64xbf16, #tpu.memory_space<vmem>>, vector<1x1x8x64xbf16>
    %201 = vector.shape_cast %200 : vector<1x1x8x64xbf16> to vector<8x64xbf16>
    %cst_252 = arith.constant dense<0.000000e+00> : vector<32x64xf32>
    %202 = tpu.matmul %199, %201, %cst_252 {dimension_numbers = #tpu.dot_dimension_numbers<[1], [0], [0], [1], [0, 0, 1, 1], [], []>} : vector<32x8xbf16>, vector<8x64xbf16>, vector<32x64xf32> -> vector<32x64xf32>
    %203 = arith.addf %196, %202 : vector<32x64xf32>
    %c0_253 = arith.constant 0 : index
    %c0_254 = arith.constant 0 : index
    %c0_255 = arith.constant 0 : index
    %c8_256 = arith.constant 8 : index
    %204 = vector.load %arg6[%c0_253, %c0_254, %c0_255, %c8_256] : memref<2x1x19x16xbf16, #tpu.memory_space<vmem>>, vector<2x1x16x8xbf16>
    %205 = vector.shape_cast %204 : vector<2x1x16x8xbf16> to vector<2x16x8xbf16>
    %206 = vector.shape_cast %205 : vector<2x16x8xbf16> to vector<32x8xbf16>
    %c4_257 = arith.constant 4 : index
    %c1_258 = arith.constant 1 : index
    %c0_259 = arith.constant 0 : index
    %c0_260 = arith.constant 0 : index
    %207 = vector.load %arg9[%c4_257, %c1_258, %c0_259, %c0_260] : memref<7x7x8x64xbf16, #tpu.memory_space<vmem>>, vector<1x1x8x64xbf16>
    %208 = vector.shape_cast %207 : vector<1x1x8x64xbf16> to vector<8x64xbf16>
    %cst_261 = arith.constant dense<0.000000e+00> : vector<32x64xf32>
    %209 = tpu.matmul %206, %208, %cst_261 {dimension_numbers = #tpu.dot_dimension_numbers<[1], [0], [0], [1], [0, 0, 1, 1], [], []>} : vector<32x8xbf16>, vector<8x64xbf16>, vector<32x64xf32> -> vector<32x64xf32>
    %210 = arith.addf %203, %209 : vector<32x64xf32>
    %c0_262 = arith.constant 0 : index
    %c0_263 = arith.constant 0 : index
    %c1_264 = arith.constant 1 : index
    %c0_265 = arith.constant 0 : index
    %211 = vector.load %arg6[%c0_262, %c0_263, %c1_264, %c0_265] : memref<2x1x19x16xbf16, #tpu.memory_space<vmem>>, vector<2x1x16x8xbf16>
    %212 = vector.shape_cast %211 : vector<2x1x16x8xbf16> to vector<2x16x8xbf16>
    %213 = vector.shape_cast %212 : vector<2x16x8xbf16> to vector<32x8xbf16>
    %c4_266 = arith.constant 4 : index
    %c2_267 = arith.constant 2 : index
    %c0_268 = arith.constant 0 : index
    %c0_269 = arith.constant 0 : index
    %214 = vector.load %arg9[%c4_266, %c2_267, %c0_268, %c0_269] : memref<7x7x8x64xbf16, #tpu.memory_space<vmem>>, vector<1x1x8x64xbf16>
    %215 = vector.shape_cast %214 : vector<1x1x8x64xbf16> to vector<8x64xbf16>
    %cst_270 = arith.constant dense<0.000000e+00> : vector<32x64xf32>
    %216 = tpu.matmul %213, %215, %cst_270 {dimension_numbers = #tpu.dot_dimension_numbers<[1], [0], [0], [1], [0, 0, 1, 1], [], []>} : vector<32x8xbf16>, vector<8x64xbf16>, vector<32x64xf32> -> vector<32x64xf32>
    %217 = arith.addf %210, %216 : vector<32x64xf32>
    %c0_271 = arith.constant 0 : index
    %c0_272 = arith.constant 0 : index
    %c1_273 = arith.constant 1 : index
    %c8_274 = arith.constant 8 : index
    %218 = vector.load %arg6[%c0_271, %c0_272, %c1_273, %c8_274] : memref<2x1x19x16xbf16, #tpu.memory_space<vmem>>, vector<2x1x16x8xbf16>
    %219 = vector.shape_cast %218 : vector<2x1x16x8xbf16> to vector<2x16x8xbf16>
    %220 = vector.shape_cast %219 : vector<2x16x8xbf16> to vector<32x8xbf16>
    %c4_275 = arith.constant 4 : index
    %c3_276 = arith.constant 3 : index
    %c0_277 = arith.constant 0 : index
    %c0_278 = arith.constant 0 : index
    %221 = vector.load %arg9[%c4_275, %c3_276, %c0_277, %c0_278] : memref<7x7x8x64xbf16, #tpu.memory_space<vmem>>, vector<1x1x8x64xbf16>
    %222 = vector.shape_cast %221 : vector<1x1x8x64xbf16> to vector<8x64xbf16>
    %cst_279 = arith.constant dense<0.000000e+00> : vector<32x64xf32>
    %223 = tpu.matmul %220, %222, %cst_279 {dimension_numbers = #tpu.dot_dimension_numbers<[1], [0], [0], [1], [0, 0, 1, 1], [], []>} : vector<32x8xbf16>, vector<8x64xbf16>, vector<32x64xf32> -> vector<32x64xf32>
    %224 = arith.addf %217, %223 : vector<32x64xf32>
    %c0_280 = arith.constant 0 : index
    %c0_281 = arith.constant 0 : index
    %c2_282 = arith.constant 2 : index
    %c0_283 = arith.constant 0 : index
    %225 = vector.load %arg6[%c0_280, %c0_281, %c2_282, %c0_283] : memref<2x1x19x16xbf16, #tpu.memory_space<vmem>>, vector<2x1x16x8xbf16>
    %226 = vector.shape_cast %225 : vector<2x1x16x8xbf16> to vector<2x16x8xbf16>
    %227 = vector.shape_cast %226 : vector<2x16x8xbf16> to vector<32x8xbf16>
    %c4_284 = arith.constant 4 : index
    %c4_285 = arith.constant 4 : index
    %c0_286 = arith.constant 0 : index
    %c0_287 = arith.constant 0 : index
    %228 = vector.load %arg9[%c4_284, %c4_285, %c0_286, %c0_287] : memref<7x7x8x64xbf16, #tpu.memory_space<vmem>>, vector<1x1x8x64xbf16>
    %229 = vector.shape_cast %228 : vector<1x1x8x64xbf16> to vector<8x64xbf16>
    %cst_288 = arith.constant dense<0.000000e+00> : vector<32x64xf32>
    %230 = tpu.matmul %227, %229, %cst_288 {dimension_numbers = #tpu.dot_dimension_numbers<[1], [0], [0], [1], [0, 0, 1, 1], [], []>} : vector<32x8xbf16>, vector<8x64xbf16>, vector<32x64xf32> -> vector<32x64xf32>
    %231 = arith.addf %224, %230 : vector<32x64xf32>
    %c0_289 = arith.constant 0 : index
    %c0_290 = arith.constant 0 : index
    %c2_291 = arith.constant 2 : index
    %c8_292 = arith.constant 8 : index
    %232 = vector.load %arg6[%c0_289, %c0_290, %c2_291, %c8_292] : memref<2x1x19x16xbf16, #tpu.memory_space<vmem>>, vector<2x1x16x8xbf16>
    %233 = vector.shape_cast %232 : vector<2x1x16x8xbf16> to vector<2x16x8xbf16>
    %234 = vector.shape_cast %233 : vector<2x16x8xbf16> to vector<32x8xbf16>
    %c4_293 = arith.constant 4 : index
    %c5_294 = arith.constant 5 : index
    %c0_295 = arith.constant 0 : index
    %c0_296 = arith.constant 0 : index
    %235 = vector.load %arg9[%c4_293, %c5_294, %c0_295, %c0_296] : memref<7x7x8x64xbf16, #tpu.memory_space<vmem>>, vector<1x1x8x64xbf16>
    %236 = vector.shape_cast %235 : vector<1x1x8x64xbf16> to vector<8x64xbf16>
    %cst_297 = arith.constant dense<0.000000e+00> : vector<32x64xf32>
    %237 = tpu.matmul %234, %236, %cst_297 {dimension_numbers = #tpu.dot_dimension_numbers<[1], [0], [0], [1], [0, 0, 1, 1], [], []>} : vector<32x8xbf16>, vector<8x64xbf16>, vector<32x64xf32> -> vector<32x64xf32>
    %238 = arith.addf %231, %237 : vector<32x64xf32>
    %c0_298 = arith.constant 0 : index
    %c0_299 = arith.constant 0 : index
    %c3_300 = arith.constant 3 : index
    %c0_301 = arith.constant 0 : index
    %239 = vector.load %arg6[%c0_298, %c0_299, %c3_300, %c0_301] : memref<2x1x19x16xbf16, #tpu.memory_space<vmem>>, vector<2x1x16x8xbf16>
    %240 = vector.shape_cast %239 : vector<2x1x16x8xbf16> to vector<2x16x8xbf16>
    %241 = vector.shape_cast %240 : vector<2x16x8xbf16> to vector<32x8xbf16>
    %c4_302 = arith.constant 4 : index
    %c6_303 = arith.constant 6 : index
    %c0_304 = arith.constant 0 : index
    %c0_305 = arith.constant 0 : index
    %242 = vector.load %arg9[%c4_302, %c6_303, %c0_304, %c0_305] : memref<7x7x8x64xbf16, #tpu.memory_space<vmem>>, vector<1x1x8x64xbf16>
    %243 = vector.shape_cast %242 : vector<1x1x8x64xbf16> to vector<8x64xbf16>
    %cst_306 = arith.constant dense<0.000000e+00> : vector<32x64xf32>
    %244 = tpu.matmul %241, %243, %cst_306 {dimension_numbers = #tpu.dot_dimension_numbers<[1], [0], [0], [1], [0, 0, 1, 1], [], []>} : vector<32x8xbf16>, vector<8x64xbf16>, vector<32x64xf32> -> vector<32x64xf32>
    %245 = arith.addf %238, %244 : vector<32x64xf32>
    %c0_307 = arith.constant 0 : index
    %c0_308 = arith.constant 0 : index
    %c0_309 = arith.constant 0 : index
    %c0_310 = arith.constant 0 : index
    %246 = vector.load %arg7[%c0_307, %c0_308, %c0_309, %c0_310] : memref<2x1x19x16xbf16, #tpu.memory_space<vmem>>, vector<2x1x16x8xbf16>
    %247 = vector.shape_cast %246 : vector<2x1x16x8xbf16> to vector<2x16x8xbf16>
    %248 = vector.shape_cast %247 : vector<2x16x8xbf16> to vector<32x8xbf16>
    %c5_311 = arith.constant 5 : index
    %c0_312 = arith.constant 0 : index
    %c0_313 = arith.constant 0 : index
    %c0_314 = arith.constant 0 : index
    %249 = vector.load %arg9[%c5_311, %c0_312, %c0_313, %c0_314] : memref<7x7x8x64xbf16, #tpu.memory_space<vmem>>, vector<1x1x8x64xbf16>
    %250 = vector.shape_cast %249 : vector<1x1x8x64xbf16> to vector<8x64xbf16>
    %cst_315 = arith.constant dense<0.000000e+00> : vector<32x64xf32>
    %251 = tpu.matmul %248, %250, %cst_315 {dimension_numbers = #tpu.dot_dimension_numbers<[1], [0], [0], [1], [0, 0, 1, 1], [], []>} : vector<32x8xbf16>, vector<8x64xbf16>, vector<32x64xf32> -> vector<32x64xf32>
    %252 = arith.addf %245, %251 : vector<32x64xf32>
    %c0_316 = arith.constant 0 : index
    %c0_317 = arith.constant 0 : index
    %c0_318 = arith.constant 0 : index
    %c8_319 = arith.constant 8 : index
    %253 = vector.load %arg7[%c0_316, %c0_317, %c0_318, %c8_319] : memref<2x1x19x16xbf16, #tpu.memory_space<vmem>>, vector<2x1x16x8xbf16>
    %254 = vector.shape_cast %253 : vector<2x1x16x8xbf16> to vector<2x16x8xbf16>
    %255 = vector.shape_cast %254 : vector<2x16x8xbf16> to vector<32x8xbf16>
    %c5_320 = arith.constant 5 : index
    %c1_321 = arith.constant 1 : index
    %c0_322 = arith.constant 0 : index
    %c0_323 = arith.constant 0 : index
    %256 = vector.load %arg9[%c5_320, %c1_321, %c0_322, %c0_323] : memref<7x7x8x64xbf16, #tpu.memory_space<vmem>>, vector<1x1x8x64xbf16>
    %257 = vector.shape_cast %256 : vector<1x1x8x64xbf16> to vector<8x64xbf16>
    %cst_324 = arith.constant dense<0.000000e+00> : vector<32x64xf32>
    %258 = tpu.matmul %255, %257, %cst_324 {dimension_numbers = #tpu.dot_dimension_numbers<[1], [0], [0], [1], [0, 0, 1, 1], [], []>} : vector<32x8xbf16>, vector<8x64xbf16>, vector<32x64xf32> -> vector<32x64xf32>
    %259 = arith.addf %252, %258 : vector<32x64xf32>
    %c0_325 = arith.constant 0 : index
    %c0_326 = arith.constant 0 : index
    %c1_327 = arith.constant 1 : index
    %c0_328 = arith.constant 0 : index
    %260 = vector.load %arg7[%c0_325, %c0_326, %c1_327, %c0_328] : memref<2x1x19x16xbf16, #tpu.memory_space<vmem>>, vector<2x1x16x8xbf16>
    %261 = vector.shape_cast %260 : vector<2x1x16x8xbf16> to vector<2x16x8xbf16>
    %262 = vector.shape_cast %261 : vector<2x16x8xbf16> to vector<32x8xbf16>
    %c5_329 = arith.constant 5 : index
    %c2_330 = arith.constant 2 : index
    %c0_331 = arith.constant 0 : index
    %c0_332 = arith.constant 0 : index
    %263 = vector.load %arg9[%c5_329, %c2_330, %c0_331, %c0_332] : memref<7x7x8x64xbf16, #tpu.memory_space<vmem>>, vector<1x1x8x64xbf16>
    %264 = vector.shape_cast %263 : vector<1x1x8x64xbf16> to vector<8x64xbf16>
    %cst_333 = arith.constant dense<0.000000e+00> : vector<32x64xf32>
    %265 = tpu.matmul %262, %264, %cst_333 {dimension_numbers = #tpu.dot_dimension_numbers<[1], [0], [0], [1], [0, 0, 1, 1], [], []>} : vector<32x8xbf16>, vector<8x64xbf16>, vector<32x64xf32> -> vector<32x64xf32>
    %266 = arith.addf %259, %265 : vector<32x64xf32>
    %c0_334 = arith.constant 0 : index
    %c0_335 = arith.constant 0 : index
    %c1_336 = arith.constant 1 : index
    %c8_337 = arith.constant 8 : index
    %267 = vector.load %arg7[%c0_334, %c0_335, %c1_336, %c8_337] : memref<2x1x19x16xbf16, #tpu.memory_space<vmem>>, vector<2x1x16x8xbf16>
    %268 = vector.shape_cast %267 : vector<2x1x16x8xbf16> to vector<2x16x8xbf16>
    %269 = vector.shape_cast %268 : vector<2x16x8xbf16> to vector<32x8xbf16>
    %c5_338 = arith.constant 5 : index
    %c3_339 = arith.constant 3 : index
    %c0_340 = arith.constant 0 : index
    %c0_341 = arith.constant 0 : index
    %270 = vector.load %arg9[%c5_338, %c3_339, %c0_340, %c0_341] : memref<7x7x8x64xbf16, #tpu.memory_space<vmem>>, vector<1x1x8x64xbf16>
    %271 = vector.shape_cast %270 : vector<1x1x8x64xbf16> to vector<8x64xbf16>
    %cst_342 = arith.constant dense<0.000000e+00> : vector<32x64xf32>
    %272 = tpu.matmul %269, %271, %cst_342 {dimension_numbers = #tpu.dot_dimension_numbers<[1], [0], [0], [1], [0, 0, 1, 1], [], []>} : vector<32x8xbf16>, vector<8x64xbf16>, vector<32x64xf32> -> vector<32x64xf32>
    %273 = arith.addf %266, %272 : vector<32x64xf32>
    %c0_343 = arith.constant 0 : index
    %c0_344 = arith.constant 0 : index
    %c2_345 = arith.constant 2 : index
    %c0_346 = arith.constant 0 : index
    %274 = vector.load %arg7[%c0_343, %c0_344, %c2_345, %c0_346] : memref<2x1x19x16xbf16, #tpu.memory_space<vmem>>, vector<2x1x16x8xbf16>
    %275 = vector.shape_cast %274 : vector<2x1x16x8xbf16> to vector<2x16x8xbf16>
    %276 = vector.shape_cast %275 : vector<2x16x8xbf16> to vector<32x8xbf16>
    %c5_347 = arith.constant 5 : index
    %c4_348 = arith.constant 4 : index
    %c0_349 = arith.constant 0 : index
    %c0_350 = arith.constant 0 : index
    %277 = vector.load %arg9[%c5_347, %c4_348, %c0_349, %c0_350] : memref<7x7x8x64xbf16, #tpu.memory_space<vmem>>, vector<1x1x8x64xbf16>
    %278 = vector.shape_cast %277 : vector<1x1x8x64xbf16> to vector<8x64xbf16>
    %cst_351 = arith.constant dense<0.000000e+00> : vector<32x64xf32>
    %279 = tpu.matmul %276, %278, %cst_351 {dimension_numbers = #tpu.dot_dimension_numbers<[1], [0], [0], [1], [0, 0, 1, 1], [], []>} : vector<32x8xbf16>, vector<8x64xbf16>, vector<32x64xf32> -> vector<32x64xf32>
    %280 = arith.addf %273, %279 : vector<32x64xf32>
    %c0_352 = arith.constant 0 : index
    %c0_353 = arith.constant 0 : index
    %c2_354 = arith.constant 2 : index
    %c8_355 = arith.constant 8 : index
    %281 = vector.load %arg7[%c0_352, %c0_353, %c2_354, %c8_355] : memref<2x1x19x16xbf16, #tpu.memory_space<vmem>>, vector<2x1x16x8xbf16>
    %282 = vector.shape_cast %281 : vector<2x1x16x8xbf16> to vector<2x16x8xbf16>
    %283 = vector.shape_cast %282 : vector<2x16x8xbf16> to vector<32x8xbf16>
    %c5_356 = arith.constant 5 : index
    %c5_357 = arith.constant 5 : index
    %c0_358 = arith.constant 0 : index
    %c0_359 = arith.constant 0 : index
    %284 = vector.load %arg9[%c5_356, %c5_357, %c0_358, %c0_359] : memref<7x7x8x64xbf16, #tpu.memory_space<vmem>>, vector<1x1x8x64xbf16>
    %285 = vector.shape_cast %284 : vector<1x1x8x64xbf16> to vector<8x64xbf16>
    %cst_360 = arith.constant dense<0.000000e+00> : vector<32x64xf32>
    %286 = tpu.matmul %283, %285, %cst_360 {dimension_numbers = #tpu.dot_dimension_numbers<[1], [0], [0], [1], [0, 0, 1, 1], [], []>} : vector<32x8xbf16>, vector<8x64xbf16>, vector<32x64xf32> -> vector<32x64xf32>
    %287 = arith.addf %280, %286 : vector<32x64xf32>
    %c0_361 = arith.constant 0 : index
    %c0_362 = arith.constant 0 : index
    %c3_363 = arith.constant 3 : index
    %c0_364 = arith.constant 0 : index
    %288 = vector.load %arg7[%c0_361, %c0_362, %c3_363, %c0_364] : memref<2x1x19x16xbf16, #tpu.memory_space<vmem>>, vector<2x1x16x8xbf16>
    %289 = vector.shape_cast %288 : vector<2x1x16x8xbf16> to vector<2x16x8xbf16>
    %290 = vector.shape_cast %289 : vector<2x16x8xbf16> to vector<32x8xbf16>
    %c5_365 = arith.constant 5 : index
    %c6_366 = arith.constant 6 : index
    %c0_367 = arith.constant 0 : index
    %c0_368 = arith.constant 0 : index
    %291 = vector.load %arg9[%c5_365, %c6_366, %c0_367, %c0_368] : memref<7x7x8x64xbf16, #tpu.memory_space<vmem>>, vector<1x1x8x64xbf16>
    %292 = vector.shape_cast %291 : vector<1x1x8x64xbf16> to vector<8x64xbf16>
    %cst_369 = arith.constant dense<0.000000e+00> : vector<32x64xf32>
    %293 = tpu.matmul %290, %292, %cst_369 {dimension_numbers = #tpu.dot_dimension_numbers<[1], [0], [0], [1], [0, 0, 1, 1], [], []>} : vector<32x8xbf16>, vector<8x64xbf16>, vector<32x64xf32> -> vector<32x64xf32>
    %294 = arith.addf %287, %293 : vector<32x64xf32>
    %c0_370 = arith.constant 0 : index
    %c0_371 = arith.constant 0 : index
    %c0_372 = arith.constant 0 : index
    %c0_373 = arith.constant 0 : index
    %295 = vector.load %arg8[%c0_370, %c0_371, %c0_372, %c0_373] : memref<2x1x19x16xbf16, #tpu.memory_space<vmem>>, vector<2x1x16x8xbf16>
    %296 = vector.shape_cast %295 : vector<2x1x16x8xbf16> to vector<2x16x8xbf16>
    %297 = vector.shape_cast %296 : vector<2x16x8xbf16> to vector<32x8xbf16>
    %c6_374 = arith.constant 6 : index
    %c0_375 = arith.constant 0 : index
    %c0_376 = arith.constant 0 : index
    %c0_377 = arith.constant 0 : index
    %298 = vector.load %arg9[%c6_374, %c0_375, %c0_376, %c0_377] : memref<7x7x8x64xbf16, #tpu.memory_space<vmem>>, vector<1x1x8x64xbf16>
    %299 = vector.shape_cast %298 : vector<1x1x8x64xbf16> to vector<8x64xbf16>
    %cst_378 = arith.constant dense<0.000000e+00> : vector<32x64xf32>
    %300 = tpu.matmul %297, %299, %cst_378 {dimension_numbers = #tpu.dot_dimension_numbers<[1], [0], [0], [1], [0, 0, 1, 1], [], []>} : vector<32x8xbf16>, vector<8x64xbf16>, vector<32x64xf32> -> vector<32x64xf32>
    %301 = arith.addf %294, %300 : vector<32x64xf32>
    %c0_379 = arith.constant 0 : index
    %c0_380 = arith.constant 0 : index
    %c0_381 = arith.constant 0 : index
    %c8_382 = arith.constant 8 : index
    %302 = vector.load %arg8[%c0_379, %c0_380, %c0_381, %c8_382] : memref<2x1x19x16xbf16, #tpu.memory_space<vmem>>, vector<2x1x16x8xbf16>
    %303 = vector.shape_cast %302 : vector<2x1x16x8xbf16> to vector<2x16x8xbf16>
    %304 = vector.shape_cast %303 : vector<2x16x8xbf16> to vector<32x8xbf16>
    %c6_383 = arith.constant 6 : index
    %c1_384 = arith.constant 1 : index
    %c0_385 = arith.constant 0 : index
    %c0_386 = arith.constant 0 : index
    %305 = vector.load %arg9[%c6_383, %c1_384, %c0_385, %c0_386] : memref<7x7x8x64xbf16, #tpu.memory_space<vmem>>, vector<1x1x8x64xbf16>
    %306 = vector.shape_cast %305 : vector<1x1x8x64xbf16> to vector<8x64xbf16>
    %cst_387 = arith.constant dense<0.000000e+00> : vector<32x64xf32>
    %307 = tpu.matmul %304, %306, %cst_387 {dimension_numbers = #tpu.dot_dimension_numbers<[1], [0], [0], [1], [0, 0, 1, 1], [], []>} : vector<32x8xbf16>, vector<8x64xbf16>, vector<32x64xf32> -> vector<32x64xf32>
    %308 = arith.addf %301, %307 : vector<32x64xf32>
    %c0_388 = arith.constant 0 : index
    %c0_389 = arith.constant 0 : index
    %c1_390 = arith.constant 1 : index
    %c0_391 = arith.constant 0 : index
    %309 = vector.load %arg8[%c0_388, %c0_389, %c1_390, %c0_391] : memref<2x1x19x16xbf16, #tpu.memory_space<vmem>>, vector<2x1x16x8xbf16>
    %310 = vector.shape_cast %309 : vector<2x1x16x8xbf16> to vector<2x16x8xbf16>
    %311 = vector.shape_cast %310 : vector<2x16x8xbf16> to vector<32x8xbf16>
    %c6_392 = arith.constant 6 : index
    %c2_393 = arith.constant 2 : index
    %c0_394 = arith.constant 0 : index
    %c0_395 = arith.constant 0 : index
    %312 = vector.load %arg9[%c6_392, %c2_393, %c0_394, %c0_395] : memref<7x7x8x64xbf16, #tpu.memory_space<vmem>>, vector<1x1x8x64xbf16>
    %313 = vector.shape_cast %312 : vector<1x1x8x64xbf16> to vector<8x64xbf16>
    %cst_396 = arith.constant dense<0.000000e+00> : vector<32x64xf32>
    %314 = tpu.matmul %311, %313, %cst_396 {dimension_numbers = #tpu.dot_dimension_numbers<[1], [0], [0], [1], [0, 0, 1, 1], [], []>} : vector<32x8xbf16>, vector<8x64xbf16>, vector<32x64xf32> -> vector<32x64xf32>
    %315 = arith.addf %308, %314 : vector<32x64xf32>
    %c0_397 = arith.constant 0 : index
    %c0_398 = arith.constant 0 : index
    %c1_399 = arith.constant 1 : index
    %c8_400 = arith.constant 8 : index
    %316 = vector.load %arg8[%c0_397, %c0_398, %c1_399, %c8_400] : memref<2x1x19x16xbf16, #tpu.memory_space<vmem>>, vector<2x1x16x8xbf16>
    %317 = vector.shape_cast %316 : vector<2x1x16x8xbf16> to vector<2x16x8xbf16>
    %318 = vector.shape_cast %317 : vector<2x16x8xbf16> to vector<32x8xbf16>
    %c6_401 = arith.constant 6 : index
    %c3_402 = arith.constant 3 : index
    %c0_403 = arith.constant 0 : index
    %c0_404 = arith.constant 0 : index
    %319 = vector.load %arg9[%c6_401, %c3_402, %c0_403, %c0_404] : memref<7x7x8x64xbf16, #tpu.memory_space<vmem>>, vector<1x1x8x64xbf16>
    %320 = vector.shape_cast %319 : vector<1x1x8x64xbf16> to vector<8x64xbf16>
    %cst_405 = arith.constant dense<0.000000e+00> : vector<32x64xf32>
    %321 = tpu.matmul %318, %320, %cst_405 {dimension_numbers = #tpu.dot_dimension_numbers<[1], [0], [0], [1], [0, 0, 1, 1], [], []>} : vector<32x8xbf16>, vector<8x64xbf16>, vector<32x64xf32> -> vector<32x64xf32>
    %322 = arith.addf %315, %321 : vector<32x64xf32>
    %c0_406 = arith.constant 0 : index
    %c0_407 = arith.constant 0 : index
    %c2_408 = arith.constant 2 : index
    %c0_409 = arith.constant 0 : index
    %323 = vector.load %arg8[%c0_406, %c0_407, %c2_408, %c0_409] : memref<2x1x19x16xbf16, #tpu.memory_space<vmem>>, vector<2x1x16x8xbf16>
    %324 = vector.shape_cast %323 : vector<2x1x16x8xbf16> to vector<2x16x8xbf16>
    %325 = vector.shape_cast %324 : vector<2x16x8xbf16> to vector<32x8xbf16>
    %c6_410 = arith.constant 6 : index
    %c4_411 = arith.constant 4 : index
    %c0_412 = arith.constant 0 : index
    %c0_413 = arith.constant 0 : index
    %326 = vector.load %arg9[%c6_410, %c4_411, %c0_412, %c0_413] : memref<7x7x8x64xbf16, #tpu.memory_space<vmem>>, vector<1x1x8x64xbf16>
    %327 = vector.shape_cast %326 : vector<1x1x8x64xbf16> to vector<8x64xbf16>
    %cst_414 = arith.constant dense<0.000000e+00> : vector<32x64xf32>
    %328 = tpu.matmul %325, %327, %cst_414 {dimension_numbers = #tpu.dot_dimension_numbers<[1], [0], [0], [1], [0, 0, 1, 1], [], []>} : vector<32x8xbf16>, vector<8x64xbf16>, vector<32x64xf32> -> vector<32x64xf32>
    %329 = arith.addf %322, %328 : vector<32x64xf32>
    %c0_415 = arith.constant 0 : index
    %c0_416 = arith.constant 0 : index
    %c2_417 = arith.constant 2 : index
    %c8_418 = arith.constant 8 : index
    %330 = vector.load %arg8[%c0_415, %c0_416, %c2_417, %c8_418] : memref<2x1x19x16xbf16, #tpu.memory_space<vmem>>, vector<2x1x16x8xbf16>
    %331 = vector.shape_cast %330 : vector<2x1x16x8xbf16> to vector<2x16x8xbf16>
    %332 = vector.shape_cast %331 : vector<2x16x8xbf16> to vector<32x8xbf16>
    %c6_419 = arith.constant 6 : index
    %c5_420 = arith.constant 5 : index
    %c0_421 = arith.constant 0 : index
    %c0_422 = arith.constant 0 : index
    %333 = vector.load %arg9[%c6_419, %c5_420, %c0_421, %c0_422] : memref<7x7x8x64xbf16, #tpu.memory_space<vmem>>, vector<1x1x8x64xbf16>
    %334 = vector.shape_cast %333 : vector<1x1x8x64xbf16> to vector<8x64xbf16>
    %cst_423 = arith.constant dense<0.000000e+00> : vector<32x64xf32>
    %335 = tpu.matmul %332, %334, %cst_423 {dimension_numbers = #tpu.dot_dimension_numbers<[1], [0], [0], [1], [0, 0, 1, 1], [], []>} : vector<32x8xbf16>, vector<8x64xbf16>, vector<32x64xf32> -> vector<32x64xf32>
    %336 = arith.addf %329, %335 : vector<32x64xf32>
    %c0_424 = arith.constant 0 : index
    %c0_425 = arith.constant 0 : index
    %c3_426 = arith.constant 3 : index
    %c0_427 = arith.constant 0 : index
    %337 = vector.load %arg8[%c0_424, %c0_425, %c3_426, %c0_427] : memref<2x1x19x16xbf16, #tpu.memory_space<vmem>>, vector<2x1x16x8xbf16>
    %338 = vector.shape_cast %337 : vector<2x1x16x8xbf16> to vector<2x16x8xbf16>
    %339 = vector.shape_cast %338 : vector<2x16x8xbf16> to vector<32x8xbf16>
    %c6_428 = arith.constant 6 : index
    %c6_429 = arith.constant 6 : index
    %c0_430 = arith.constant 0 : index
    %c0_431 = arith.constant 0 : index
    %340 = vector.load %arg9[%c6_428, %c6_429, %c0_430, %c0_431] : memref<7x7x8x64xbf16, #tpu.memory_space<vmem>>, vector<1x1x8x64xbf16>
    %341 = vector.shape_cast %340 : vector<1x1x8x64xbf16> to vector<8x64xbf16>
    %cst_432 = arith.constant dense<0.000000e+00> : vector<32x64xf32>
    %342 = tpu.matmul %339, %341, %cst_432 {dimension_numbers = #tpu.dot_dimension_numbers<[1], [0], [0], [1], [0, 0, 1, 1], [], []>} : vector<32x8xbf16>, vector<8x64xbf16>, vector<32x64xf32> -> vector<32x64xf32>
    %343 = arith.addf %336, %342 : vector<32x64xf32>
    %c0_433 = arith.constant 0 : index
    %c0_434 = arith.constant 0 : index
    %344 = vector.load %arg10[%c0_433, %c0_434] : memref<1x64xf32, #tpu.memory_space<vmem>>, vector<1x64xf32>
    %345 = vector.broadcast %344 : vector<1x64xf32> to vector<32x64xf32>
    %346 = arith.addf %343, %345 : vector<32x64xf32>
    %cst_435 = arith.constant 0.000000e+00 : f32
    %347 = vector.broadcast %cst_435 : f32 to vector<32x64xf32>
    %348 = arith.maximumf %346, %347 : vector<32x64xf32>
    %349 = vector.shape_cast %348 : vector<32x64xf32> to vector<2x1x16x64xf32>
    %350 = arith.truncf %349 : vector<2x1x16x64xf32> to vector<2x1x16x64xbf16>
    %c0_436 = arith.constant 0 : index
    %c0_437 = arith.constant 0 : index
    %c0_438 = arith.constant 0 : index
    %c0_439 = arith.constant 0 : index
    %351 = vector.load %arg11[%c0_436, %c0_437, %c0_438, %c0_439] : memref<2x1x16x64xbf16, #tpu.memory_space<vmem>>, vector<2x1x16x64xbf16>
    tpu.vector_store %arg11[%c0_436, %c0_437, %c0_438, %c0_439], %350 {strides = array<i32>} : memref<2x1x16x64xbf16, #tpu.memory_space<vmem>>, vector<2x1x16x64xbf16>,
    return
  }
  func.func @transform_0(%arg0: i32, %arg1: i32) -> (i32, i32, i32, i32) {
    %c2_i32 = arith.constant 2 : i32
    %0 = arith.muli %c2_i32, %arg1 : i32
    %c0_i32 = arith.constant 0 : i32
    %1 = arith.addi %0, %c0_i32 : i32
    %c0_i32_0 = arith.constant 0 : i32
    %c0_i32_1 = arith.constant 0 : i32
    %c0_i32_2 = arith.constant 0 : i32
    %c0_i32_3 = arith.constant 0 : i32
    return %c0_i32_0, %1, %c0_i32_1, %c0_i32_2 : i32, i32, i32, i32
  }
  func.func @transform_1(%arg0: i32, %arg1: i32) -> (i32, i32, i32, i32) {
    %c2_i32 = arith.constant 2 : i32
    %0 = arith.muli %c2_i32, %arg1 : i32
    %c1_i32 = arith.constant 1 : i32
    %1 = arith.addi %0, %c1_i32 : i32
    %c0_i32 = arith.constant 0 : i32
    %c0_i32_0 = arith.constant 0 : i32
    %c0_i32_1 = arith.constant 0 : i32
    %c0_i32_2 = arith.constant 0 : i32
    return %c0_i32, %1, %c0_i32_0, %c0_i32_1 : i32, i32, i32, i32
  }
  func.func @transform_2(%arg0: i32, %arg1: i32) -> (i32, i32, i32, i32) {
    %c2_i32 = arith.constant 2 : i32
    %0 = arith.muli %c2_i32, %arg1 : i32
    %c2_i32_0 = arith.constant 2 : i32
    %1 = arith.addi %0, %c2_i32_0 : i32
    %c0_i32 = arith.constant 0 : i32
    %c0_i32_1 = arith.constant 0 : i32
    %c0_i32_2 = arith.constant 0 : i32
    %c0_i32_3 = arith.constant 0 : i32
    return %c0_i32, %1, %c0_i32_1, %c0_i32_2 : i32, i32, i32, i32
  }
  func.func @transform_3(%arg0: i32, %arg1: i32) -> (i32, i32, i32, i32) {
    %c2_i32 = arith.constant 2 : i32
    %0 = arith.muli %c2_i32, %arg1 : i32
    %c3_i32 = arith.constant 3 : i32
    %1 = arith.addi %0, %c3_i32 : i32
    %c0_i32 = arith.constant 0 : i32
    %c0_i32_0 = arith.constant 0 : i32
    %c0_i32_1 = arith.constant 0 : i32
    %c0_i32_2 = arith.constant 0 : i32
    return %c0_i32, %1, %c0_i32_0, %c0_i32_1 : i32, i32, i32, i32
  }
  func.func @transform_4(%arg0: i32, %arg1: i32) -> (i32, i32, i32, i32) {
    %c2_i32 = arith.constant 2 : i32
    %0 = arith.muli %c2_i32, %arg1 : i32
    %c4_i32 = arith.constant 4 : i32
    %1 = arith.addi %0, %c4_i32 : i32
    %c0_i32 = arith.constant 0 : i32
    %c0_i32_0 = arith.constant 0 : i32
    %c0_i32_1 = arith.constant 0 : i32
    %c0_i32_2 = arith.constant 0 : i32
    return %c0_i32, %1, %c0_i32_0, %c0_i32_1 : i32, i32, i32, i32
  }
  func.func @transform_5(%arg0: i32, %arg1: i32) -> (i32, i32, i32, i32) {
    %c2_i32 = arith.constant 2 : i32
    %0 = arith.muli %c2_i32, %arg1 : i32
    %c5_i32 = arith.constant 5 : i32
    %1 = arith.addi %0, %c5_i32 : i32
    %c0_i32 = arith.constant 0 : i32
    %c0_i32_0 = arith.constant 0 : i32
    %c0_i32_1 = arith.constant 0 : i32
    %c0_i32_2 = arith.constant 0 : i32
    return %c0_i32, %1, %c0_i32_0, %c0_i32_1 : i32, i32, i32, i32
  }
  func.func @transform_6(%arg0: i32, %arg1: i32) -> (i32, i32, i32, i32) {
    %c2_i32 = arith.constant 2 : i32
    %0 = arith.muli %c2_i32, %arg1 : i32
    %c6_i32 = arith.constant 6 : i32
    %1 = arith.addi %0, %c6_i32 : i32
    %c0_i32 = arith.constant 0 : i32
    %c0_i32_0 = arith.constant 0 : i32
    %c0_i32_1 = arith.constant 0 : i32
    %c0_i32_2 = arith.constant 0 : i32
    return %c0_i32, %1, %c0_i32_0, %c0_i32_1 : i32, i32, i32, i32
  }
  func.func @transform_7(%arg0: i32, %arg1: i32) -> (i32, i32, i32, i32) {
    %c0_i32 = arith.constant 0 : i32
    %c0_i32_0 = arith.constant 0 : i32
    %c0_i32_1 = arith.constant 0 : i32
    %c0_i32_2 = arith.constant 0 : i32
    return %c0_i32, %c0_i32_0, %c0_i32_1, %arg0 : i32, i32, i32, i32
  }
  func.func @transform_8(%arg0: i32, %arg1: i32) -> (i32, i32) {
    %c0_i32 = arith.constant 0 : i32
    %c0_i32_0 = arith.constant 0 : i32
    return %c0_i32, %arg0 : i32, i32
  }
  func.func @transform_9(%arg0: i32, %arg1: i32) -> (i32, i32, i32, i32) {
    %c0_i32 = arith.constant 0 : i32
    %c0_i32_0 = arith.constant 0 : i32
    %c0_i32_1 = arith.constant 0 : i32
    return %c0_i32, %arg1, %c0_i32_0, %arg0 : i32, i32, i32, i32
  }
}

</mosaic_0001>

<bundles_post_ra>
// kernel: conv_tap_bn_act.1
= control target key start
LH: loop header
LB: loop body
LE: loop exit
PB: predicated region body
PF: predicated region fallthrough
CT: control target
= control target key end

     0   :  { %s8545_s0 = inlined_call_operand.vmem [shape: bf16[2,38,19,16], index: 0, kind: input, shape index: {}, may-alias: {0,1,2,3,4,5,6}]   ;;  %s8546_s1 = inlined_call_operand.vmem [shape: bf16[2,38,19,16], index: 1, kind: input, shape index: {}, may-alias: {0,1,2,3,4,5,6}]   ;;  %s8547_s2 = inlined_call_operand.vmem [shape: bf16[2,38,19,16], index: 2, kind: input, shape index: {}, may-alias: {0,1,2,3,4,5,6}]   ;;  %s8548_s3 = inlined_call_operand.vmem [shape: bf16[2,38,19,16], index: 3, kind: input, shape index: {}, may-alias: {0,1,2,3,4,5,6}]   ;;  %s8549_s4 = inlined_call_operand.vmem [shape: bf16[2,38,19,16], index: 4, kind: input, shape index: {}, may-alias: {0,1,2,3,4,5,6}]   ;;  %s8550_s5 = inlined_call_operand.vmem [shape: bf16[2,38,19,16], index: 5, kind: input, shape index: {}, may-alias: {0,1,2,3,4,5,6}]   ;;  %s8551_s6 = inlined_call_operand.vmem [shape: bf16[2,38,19,16], index: 6, kind: input, shape index: {}, may-alias: {0,1,2,3,4,5,6}]   ;;  %s8552_s7 = inlined_call_operand.vmem [shape: bf16[7,7,8,64], index: 7, kind: input, shape index: {}]   ;;  %s8553_s8 = inlined_call_operand.vmem [shape: f32[1,64], index: 8, kind: input, shape index: {}]   ;;  %s8554_s9 = inlined_call_operand.hbm [shape: bf16[2,16,16,64], index: 9, kind: output, shape index: {}]  }
   0x1   :  { %8583 = sst [smem:[#allocation40_spill]] %s8545_s0 }
   0x2   :  { %8584 = sst [smem:[#allocation41_spill]] %s8546_s1 }
   0x3   :  { %8585 = sst [smem:[#allocation42_spill]] %s8547_s2 }
   0x4   :  { %8586 = sst [smem:[#allocation43_spill]] %s8548_s3 }
   0x5   :  { %8587 = sst [smem:[#allocation44_spill]] %s8549_s4 }
   0x6   :  { %8588 = sst [smem:[#allocation45_spill]] %s8550_s5 }
   0x7   :  { %8589 = sst [smem:[#allocation46_spill]] %s8551_s6 }
   0x8   :  { %8590 = sst [smem:[#allocation47_spill]] %s8552_s7 }
   0x9   :  { %8591 = sst [smem:[#allocation48_spill]] %s8553_s8 }
   0xa   :  { %8592 = sst [smem:[#allocation49_spill]] %s8554_s9 }
   0xb   :  { %14 = vsyncpa [#allocation10], 0 }
   0xc   :  { %16 = vsyncpa [#allocation10 + $0x1], 0  ;;  %s7031_s30 = smov 0   ;;  %s7033_s10 = smov 0  }
   0xd   :  { %s7035_s11 = smov 0   ;;  %s7037_s12 = smov 0  }
   0xe   :  { %s7039_s13 = smov 0   ;;  %s7041_s14 = smov 0  }
   0xf   :  { %s7043_s15 = smov 0   ;;  %s7045_s16 = smov 0  }
  0x10   :  { %s7047_s17 = smov 0   ;;  %s7049_s18 = smov 0  }
  0x11   :  { %s7051_s19 = smov 0   ;;  %s7053_s20 = smov 0  }
  0x12   :  { %s7055_s21 = smov 0   ;;  %s7057_s22 = smov 0  }
  0x13   :  { %s7059_s23 = smov 0   ;;  %s7061_s24 = smov 0  }
  0x14   :  { %s7063_s25 = smov 0   ;;  %s7065_s26 = smov 0  }
  0x15   :  { %s7067_s27 = smov 0   ;;  %s7069_s28 = smov 0  }
  0x16 LB: > { %8593 = sst [smem:[#allocation14_spill]] %s6903_s11  ;;  %s31_s8 = sadd.s32 1, %s6967_s27  ;;  %s6971_s28 = sphi %s7069_s28, %s22_s28   ;;  %s6967_s27 = sphi %s7067_s27, %s8704_s27   ;;  %s6963_s26 = sphi %s7065_s26, %s8703_s26   ;;  %s6959_s25 = sphi %s7063_s25, %s8702_s25   ;;  %s6955_s24 = sphi %s7061_s24, %s8701_s24   ;;  %s6951_s23 = sphi %s7059_s23, %s8700_s23   ;;  %s6947_s22 = sphi %s7057_s22, %s8699_s22   ;;  %s6943_s21 = sphi %s7055_s21, %s8698_s21   ;;  %s6939_s20 = sphi %s7053_s20, %s8697_s20   ;;  %s6935_s19 = sphi %s7051_s19, %s8696_s19   ;;  %s6931_s18 = sphi %s7049_s18, %s8695_s18   ;;  %s6927_s17 = sphi %s7047_s17, %s8694_s17   ;;  %s6923_s16 = sphi %s7045_s16, %s8693_s16   ;;  %s6919_s15 = sphi %s7043_s15, %s8692_s15   ;;  %s6915_s14 = sphi %s7041_s14, %s8691_s14   ;;  %s6911_s13 = sphi %s7039_s13, %s8689_s13   ;;  %s6907_s12 = sphi %s7037_s12, %s8688_s12   ;;  %s6903_s11 = sphi %s7035_s11, %s8676_s11   ;;  %s6899_s10 = sphi %s7033_s10, %s8686_s10   ;;  %s6895_s30 = sphi %s7031_s30, %s8684_s30  }
  0x17   : > { %8594 = sst [smem:[#allocation15_spill]] %s6923_s16  ;;  %s7135_s7 = sshll.u32 %s6967_s27, 1 }
  0x18   : > { %8595 = sst [smem:[#allocation16_spill]] %s6939_s20  ;;  %p32_p0 = scmp.ge.s32.totalorder %s31_s8, 16 }
  0x19   : > { %8596 = sst [smem:[#allocation17_spill]] %s6947_s22  ;;  %p50_p1 = scmp.ne.s32.totalorder %s6959_s25, %s6955_s24 }
  0x1a   : > { %8597 = sst [smem:[#allocation18_spill]] %s6955_s24  ;;  %p51_p2 = scmp.eq.s32.totalorder %s6971_s28, 0 }
  0x1b   : > { %8598 = sst [smem:[#allocation19_spill]] %s6959_s25  ;;  %s8706_s8 = smov (%p32_p0, %s31_s8), 0 }
  0x1c   : > { %8599 = sst [smem:[#allocation20_spill]] %s6963_s26  ;;  %s43_s26 = sadd.s32 1, %s6959_s25 }
  0x1d   : > { %8600 = sst [smem:[#allocation21_spill]] %s8706_s8  ;;  %p7145_p3 = por %p51_p2, %p50_p1 }
  0x1e   : > { %s67_s29 = sadd.s32 1, %s7135_s7  ;;  %s7151_s6 = sshll.u32 %s8706_s8, 1 }
  0x1f   : > { %s8601_s9 = scalar_select %p7145_p3, 1, 0 }
  0x20   : > { %s73_s24 = sadd.s32 1, %s6951_s23  ;;  %s40_s5 = ssub.s32 %s7135_s7, %s7151_s6 }
  0x21   : > { %8602 = sst [smem:[#allocation22_spill]] %s8601_s9  ;;  %s69_s4 = sadd.s32 1, %s7151_s6 }
  0x22   : > { %p41_p4 = scmp.eq.s32.totalorder %s40_s5, 0  ;;  %s70_s3 = ssub.s32 %s67_s29, %s69_s4 }
  0x23   : > { %p71_p5 = scmp.eq.s32.totalorder %s70_s3, 0  ;;  %p80_p6 = scmp.ne.s32.totalorder %s6951_s23, %s6947_s22 }
  0x24   : > { %s7160_s2 = scalar_select %p41_p4, %s6959_s25, %s43_s26  }
  0x25   : > { %s7163_s1 = scalar_select %p71_p5, %s6951_s23, %s73_s24  }
  0x26   : > { %8603 = sst [smem:[#allocation23_spill]] %s7160_s2  ;;  %p7167_p7 = por %p80_p6, %p51_p2 }
  0x27   : > { %8604 = sst [smem:[#allocation24_spill]] %s7163_s1  ;;  %s97_s9 = sadd.s32 2, %s7135_s7 }
  0x28   : > { %s99_s5 = sadd.s32 2, %s7151_s6  ;;  %s103_s3 = sadd.s32 1, %s6943_s21 }
  0x29   : > { %s100_s4 = ssub.s32 %s97_s9, %s99_s5  ;;  %p110_p8 = scmp.ne.s32.totalorder %s6943_s21, %s6939_s20 }
  0x2a   : > { %p101_p9 = scmp.eq.s32.totalorder %s100_s4, 0  ;;  %s127_s24 = sadd.s32 3, %s7135_s7 }
  0x2b   : > { %p7179_p10 = por %p110_p8, %p51_p2  ;;  %s129_s29 = sadd.s32 3, %s7151_s6 }
  0x2c   : > { %s7185_s2 = scalar_select %p101_p9, %s6943_s21, %s103_s3  }
  0x2d   : > { %s130_s1 = ssub.s32 %s127_s24, %s129_s29  ;;  %s133_s9 = sadd.s32 1, %s6935_s19 }
  0x2e   : > { %8607 = sst [smem:[#allocation25_spill]] %s7185_s2  ;;  %p131_p11 = scmp.eq.s32.totalorder %s130_s1, 0 }
  0x2f   : > { %p140_p12 = scmp.ne.s32.totalorder %s6935_s19, %s6931_s18  ;;  %s157_s5 = sadd.s32 4, %s7135_s7 }
  0x30   : > { %s159_s4 = sadd.s32 4, %s7151_s6  ;;  %s163_s24 = sadd.s32 1, %s6927_s17 }
  0x31   : > { %s7193_s20 = scalar_select %p131_p11, %s6935_s19, %s133_s9  }
  0x32   : > { %p7197_p13 = por %p140_p12, %p51_p2  ;;  %s160_s3 = ssub.s32 %s157_s5, %s159_s4 }
  0x33   : > { %8608 = sst [smem:[#allocation26_spill]] %s7193_s20  ;;  %p161_p0 = scmp.eq.s32.totalorder %s160_s3, 0 }
  0x34   : > { %p170_p1 = scmp.ne.s32.totalorder %s6927_s17, %s6923_s16  ;;  %s187_s1 = sadd.s32 5, %s7135_s7 }
  0x35   : > { %s7206_s29 = scalar_select %p161_p0, %s6927_s17, %s163_s24  }
  0x36   : > { %p7210_p4 = por %p170_p1, %p51_p2  ;;  %s189_s2 = sadd.s32 5, %s7151_s6 }
  0x37   : > { %8610 = sst [smem:[#allocation27_spill]] %s7206_s29  ;;  %s190_s5 = ssub.s32 %s187_s1, %s189_s2 }
  0x38   : > { %s8611_s9 = scalar_select %p7210_p4, 1, 0 }
  0x39   : > { %s193_s4 = sadd.s32 1, %s6919_s15  ;;  %p191_p5 = scmp.eq.s32.totalorder %s190_s5, 0 }
  0x3a   : > { %p200_p6 = scmp.ne.s32.totalorder %s6919_s15, %s6915_s14  ;;  %s217_s3 = sadd.s32 6, %s7135_s7 }
  0x3b   : > { %s219_s24 = sadd.s32 6, %s7151_s6  ;;  %s223_s1 = sadd.s32 1, %s6911_s13 }
  0x3c   : > { %s7221_s20 = scalar_select %p191_p5, %s6919_s15, %s193_s4  }
  0x3d   : > { %p7225_p8 = por %p200_p6, %p51_p2  ;;  %s220_s2 = ssub.s32 %s217_s3, %s219_s24 }
  0x3e   : > { %8612 = sst [smem:[#allocation28_spill]] %s7221_s20  ;;  %p221_p9 = scmp.eq.s32.totalorder %s220_s2, 0 }
  0x3f   : > { %s8613_s29 = scalar_select %p7225_p8, 1, 0 }
  0x40   : > { %p230_p11 = scmp.ne.s32.totalorder %s6911_s13, %s6907_s12  ;;  %s298_s5 = ssub.s32 %s6967_s27, %s8706_s8 }
  0x41   : > { %s7235_s16 = scalar_select %p221_p9, %s6911_s13, %s223_s1  }
  0x42   : > { %p7239_p12 = por %p230_p11, %p51_p2  ;;  %p301_p0 = scmp.eq.s32.totalorder %s298_s5, 0 }
  0x43   : > { %8614 = sst [smem:[#allocation29_spill]] %s7235_s16  ;;  %s303_s6 = sadd.s32 1, %s6903_s11 }
  0x44   : > { %p313_p1 = scmp.ne.s32.totalorder %s6903_s11, %s6899_s10  ;;  %s8617_s20 = sadd.s32 4294967295, %s6971_s28  }
  0x45   : > { %s7247_s4 = scalar_select %p301_p0, %s6903_s11, %s303_s6  }
  0x46   : > { %p314_p5 = scmp.eq.s32.totalorder %s8617_s20, 15  ;;  %p319_p6 = scmp.ne.s32.totalorder %s6899_s10, %s6895_s30 }
  0x47   : > { %8616 = sst [smem:[#allocation30_spill]] %s7247_s4  ;;  %s8618_s3 = sadd.s32 4294967294, %s6971_s28  }
  0x48   : > { %p320_p8 = scmp.eq.s32.totalorder %s8618_s3, 15  ;;  %p7255_p4 = por %p314_p5, %p313_p1 }
  0x49   : > { %p5621_p2 = scmp.ge.s32.totalorder %s6971_s28, 16 }
  0x4a   : > { %p7259_p9 = por %p320_p8, %p319_p6 }
  0x4b   : > { %349 = sbr.rel (%p5621_p2) target bundleno = 161 (0xa1), region = 24 }
  0x52   : > { %352 = sbr.rel (!%p7145_p3) target bundleno = 93 (0x5d), region = 28  ;;  %s354_s20 = sand.u32 (%p7145_p3), 1, %s6959_s25  }
  0x53   : > { %s6589_s5 = smul.u32 (%p7145_p3), 24, %s6967_s27  ;;  %s8622_s16 = sld [smem:[#allocation40_spill]] (%p7145_p3) }
  0x54   : > { %s6588_s6 = smul.u32 (%p7145_p3), 24, %s354_s20 }
  0x56   : > { %s356_s11 = scalar_lea.vmem (%p7145_p3), [#allocation2], %s6588_s6 }
  0x59   : > { %s360_s4 = scalar_lea.vmem %s8622_s16, %s6589_s5 }
  0x5a   : > { %v376_v0 = vld [vmem:[%s360_s4] sm:$0xff]   ;;  %v380_v1 = vld [vmem:[%s360_s4 + $0x8] sm:$0xf]  ;;  %v386_v3 = vld [vmem:[%s360_s4 + $0x1d0] sm:$0xf] }
  0x5b   : > { %v382_v2 = vld [vmem:[%s360_s4 + $0x1c8] sm:$0xff]   ;;  %377 = vst [vmem:[%s356_s11] sm:$0xff] %v376_v0   ;;  %381 = vst [vmem:[%s356_s11 + $0x8] sm:$0xf] %v380_v1 }
  0x5c   : > { %383 = vst [vmem:[%s356_s11 + $0xc] sm:$0xff] %v382_v2   ;;  %387 = vst [vmem:[%s356_s11 + $0x14] sm:$0xf] %v386_v3 }
  0x5d PF: > { %422 = sbr.rel (!%p7167_p7) target bundleno = 104 (0x68), region = 69  ;;  %s424_s1 = sand.u32 (%p7167_p7), 1, %s6951_s23  }
  0x5e   : > { %s5626_s20 = smul.u32 (%p7167_p7), 24, %s6967_s27  ;;  %s8623_s5 = sld [smem:[#allocation41_spill]] (%p7167_p7) }
  0x5f   : > { %s6590_s25 = smul.u32 (%p7167_p7), 24, %s424_s1 }
  0x61   : > { %s426_s6 = scalar_lea.vmem (%p7167_p7), [#allocation3], %s6590_s25 }
  0x64   : > { %s5412_s3 = scalar_lea.vmem %s8623_s5, %s5626_s20 }
  0x65   : > { %v5627_v4 = vld [vmem:[%s5412_s3 + $0xc] sm:$0xff]   ;;  %v5629_v5 = vld [vmem:[%s5412_s3 + $0x14] sm:$0xf]  ;;  %v5632_v7 = vld [vmem:[%s5412_s3 + $0x1dc] sm:$0xf] }
  0x66   : > { %v5630_v6 = vld [vmem:[%s5412_s3 + $0x1d4] sm:$0xff]   ;;  %448 = vst [vmem:[%s426_s6] sm:$0xff] %v5627_v4   ;;  %452 = vst [vmem:[%s426_s6 + $0x8] sm:$0xf] %v5629_v5 }
  0x67   : > { %454 = vst [vmem:[%s426_s6 + $0xc] sm:$0xff] %v5630_v6   ;;  %458 = vst [vmem:[%s426_s6 + $0x14] sm:$0xf] %v5632_v7 }
  0x68 PF: > { %493 = sbr.rel (!%p7179_p10) target bundleno = 115 (0x73), region = 110  ;;  %s495_s0 = sand.u32 (%p7179_p10), 1, %s6943_s21  }
  0x69   : > { %s5634_s11 = smul.u32 (%p7179_p10), 24, %s6967_s27  ;;  %s8624_s8 = sld [smem:[#allocation42_spill]] (%p7179_p10) }
  0x6a   : > { %s6591_s4 = smul.u32 (%p7179_p10), 24, %s495_s0 }
  0x6c   : > { %s497_s25 = scalar_lea.vmem (%p7179_p10), [#allocation4], %s6591_s4 }
  0x6f   : > { %s5418_s16 = scalar_lea.vmem %s8624_s8, %s5634_s11 }
  0x70   : > { %v5635_v8 = vld [vmem:[%s5418_s16 + $0x18] sm:$0xff]   ;;  %v5637_v9 = vld [vmem:[%s5418_s16 + $0x20] sm:$0xf]  ;;  %v5640_v11 = vld [vmem:[%s5418_s16 + $0x1e8] sm:$0xf] }
  0x71   : > { %v5638_v10 = vld [vmem:[%s5418_s16 + $0x1e0] sm:$0xff]   ;;  %519 = vst [vmem:[%s497_s25] sm:$0xff] %v5635_v8   ;;  %523 = vst [vmem:[%s497_s25 + $0x8] sm:$0xf] %v5637_v9 }
  0x72   : > { %525 = vst [vmem:[%s497_s25 + $0xc] sm:$0xff] %v5638_v10   ;;  %529 = vst [vmem:[%s497_s25 + $0x14] sm:$0xf] %v5640_v11 }
  0x73 PF: > { %564 = sbr.rel (!%p7197_p13) target bundleno = 126 (0x7e), region = 151  ;;  %s566_s26 = sand.u32 (%p7197_p13), 1, %s6935_s19  }
  0x74   : > { %s5642_s5 = smul.u32 (%p7197_p13), 24, %s6967_s27  ;;  %s8625_s11 = sld [smem:[#allocation43_spill]] (%p7197_p13) }
  0x75   : > { %s6592_s3 = smul.u32 (%p7197_p13), 24, %s566_s26 }
  0x77   : > { %s568_s4 = scalar_lea.vmem (%p7197_p13), [#allocation5], %s6592_s3 }
  0x7a   : > { %s5424_s1 = scalar_lea.vmem %s8625_s11, %s5642_s5 }
  0x7b   : > { %v5643_v12 = vld [vmem:[%s5424_s1 + $0x24] sm:$0xff]   ;;  %v5645_v13 = vld [vmem:[%s5424_s1 + $0x2c] sm:$0xf]  ;;  %v5648_v15 = vld [vmem:[%s5424_s1 + $0x1f4] sm:$0xf] }
  0x7c   : > { %v5646_v14 = vld [vmem:[%s5424_s1 + $0x1ec] sm:$0xff]   ;;  %590 = vst [vmem:[%s568_s4] sm:$0xff] %v5643_v12   ;;  %594 = vst [vmem:[%s568_s4 + $0x8] sm:$0xf] %v5645_v13 }
  0x7d   : > { %596 = vst [vmem:[%s568_s4 + $0xc] sm:$0xff] %v5646_v14   ;;  %600 = vst [vmem:[%s568_s4 + $0x14] sm:$0xf] %v5648_v15 }
  0x7e PF: > { %p8626_p3 = scmp.ne.s32.totalorder %s8611_s9, 0 }
  0x7f   : > { %s637_s22 = sand.u32 (%p8626_p3), 1, %s6927_s17   ;;  %s5650_s20 = smul.u32 (%p8626_p3), 24, %s6967_s27 }
  0x80   : > { %635 = sbr.rel (!%p8626_p3) target bundleno = 138 (0x8a), region = 192  ;;  %s8627_s26 = sld [smem:[#allocation44_spill]] (%p8626_p3) }
  0x81   : > { %s6593_s8 = smul.u32 (%p8626_p3), 24, %s637_s22 }
  0x83   : > { %s639_s3 = scalar_lea.vmem (%p8626_p3), [#allocation6], %s6593_s8 }
  0x86   : > { %s5430_s5 = scalar_lea.vmem (%p8626_p3), %s8627_s26, %s5650_s20 }
  0x87   : > { %v5651_v16 = vld [vmem:[%s5430_s5 + $0x30] sm:$0xff]   ;;  %v5653_v17 = vld [vmem:[%s5430_s5 + $0x38] sm:$0xf]  ;;  %v5656_v19 = vld [vmem:[%s5430_s5 + $0x200] sm:$0xf] }
  0x88   : > { %v5654_v18 = vld [vmem:[%s5430_s5 + $0x1f8] sm:$0xff]   ;;  %661 = vst [vmem:[%s639_s3] sm:$0xff] %v5651_v16   ;;  %665 = vst [vmem:[%s639_s3 + $0x8] sm:$0xf] %v5653_v17 }
  0x89   : > { %667 = vst [vmem:[%s639_s3 + $0xc] sm:$0xff] %v5654_v18   ;;  %671 = vst [vmem:[%s639_s3 + $0x14] sm:$0xf] %v5656_v19 }
  0x8a PF: > { %p8628_p7 = scmp.ne.s32.totalorder %s8613_s29, 0 }
  0x8b   : > { %s708_s9 = sand.u32 (%p8628_p7), 1, %s6919_s15   ;;  %s5658_s6 = smul.u32 (%p8628_p7), 24, %s6967_s27 }
  0x8c   : > { %706 = sbr.rel (!%p8628_p7) target bundleno = 150 (0x96), region = 233  ;;  %s8629_s4 = sld [smem:[#allocation45_spill]] (%p8628_p7) }
  0x8d   : > { %s6594_s0 = smul.u32 (%p8628_p7), 24, %s708_s9 }
  0x8f   : > { %s710_s20 = scalar_lea.vmem (%p8628_p7), [#allocation7], %s6594_s0 }
  0x92   : > { %s5436_s22 = scalar_lea.vmem (%p8628_p7), %s8629_s4, %s5658_s6 }
  0x93   : > { %v5659_v20 = vld [vmem:[%s5436_s22 + $0x3c] sm:$0xff]   ;;  %v5661_v21 = vld [vmem:[%s5436_s22 + $0x44] sm:$0xf]  ;;  %v5664_v23 = vld [vmem:[%s5436_s22 + $0x20c] sm:$0xf] }
  0x94   : > { %v5662_v22 = vld [vmem:[%s5436_s22 + $0x204] sm:$0xff]   ;;  %732 = vst [vmem:[%s710_s20] sm:$0xff] %v5659_v20   ;;  %736 = vst [vmem:[%s710_s20 + $0x8] sm:$0xf] %v5661_v21 }
  0x95   : > { %738 = vst [vmem:[%s710_s20 + $0xc] sm:$0xff] %v5662_v22   ;;  %742 = vst [vmem:[%s710_s20 + $0x14] sm:$0xf] %v5664_v23 }
  0x96 PF: > { %777 = sbr.rel (!%p7239_p12) target bundleno = 161 (0xa1), region = 274  ;;  %s779_s29 = sand.u32 (%p7239_p12), 1, %s6911_s13  }
  0x97   : > { %s5666_s8 = smul.u32 (%p7239_p12), 24, %s6967_s27  ;;  %s8630_s5 = sld [smem:[#allocation46_spill]] (%p7239_p12) }
  0x98   : > { %s6595_s16 = smul.u32 (%p7239_p12), 24, %s779_s29 }
  0x9a   : > { %s781_s9 = scalar_lea.vmem (%p7239_p12), [#allocation8], %s6595_s16 }
  0x9d   : > { %s5442_s3 = scalar_lea.vmem %s8630_s5, %s5666_s8 }
  0x9e   : > { %v5667_v24 = vld [vmem:[%s5442_s3 + $0x48] sm:$0xff]   ;;  %v5669_v25 = vld [vmem:[%s5442_s3 + $0x50] sm:$0xf]  ;;  %v5672_v27 = vld [vmem:[%s5442_s3 + $0x218] sm:$0xf] }
  0x9f   : > { %v5670_v26 = vld [vmem:[%s5442_s3 + $0x210] sm:$0xff]   ;;  %803 = vst [vmem:[%s781_s9] sm:$0xff] %v5667_v24   ;;  %807 = vst [vmem:[%s781_s9 + $0x8] sm:$0xf] %v5669_v25 }
  0xa0   : > { %809 = vst [vmem:[%s781_s9 + $0xc] sm:$0xff] %v5670_v26   ;;  %813 = vst [vmem:[%s781_s9 + $0x14] sm:$0xf] %v5672_v27 }
  0xa1 PF: > { %p5673_p10 = scmp.ge.s32.totalorder %s6971_s28, 1  ;;  %p847_p13 = scmp.lt.s32.totalorder %s6971_s28, 17 }
  0xa3   : > { %p848_p8 = pnand %p5673_p10, %p847_p13 }
  0xa5   : > { %851 = sbr.rel (%p848_p8) target bundleno = 831 (0x33f), region = 315 }
  0xac   : > { %s8631_s7 = sld [smem:[#allocation18_spill]]  ;;  %s8632_s0 = sld [smem:[#allocation15_spill]]  ;;  %vm1011_vm0 = vcmask 1043456   ;;  %vm1128_vm1 = vsmask.f32 3328  ;;  %vm1325_vm3 = vcmask 1042432  }
  0xad   : > { %s875_s1 = sand.u32 1, %s6931_s18   ;;  %s8633_s20 = sld [smem:[#allocation47_spill]]  ;;  %vm1129_vm2 = vsmask.f32 7440  ;;  %vm1326_vm5 = vcmask 1046532   ;;  %vm1004_vm10 = vcmask 64512  }
  0xae   : > { %s6599_s8 = smul.u32 24, %s875_s1  ;;  %s6973_s5 = smov 120   ;;  %vm7362_vm4 = vmor %vm1128_vm1, %vm1129_vm2  ;;  %vm1482_vm7 = vsmask.f32 2304  ;;  %vm1483_vm8 = vsmask.f32 6416 }
  0xaf   : > { %vm7384_vm6 = vmor %vm1325_vm3, %vm1326_vm5  ;;  %s889_s4 = sand.u32 1, %s6915_s14   ;;  %s8642_s16 = sld [smem:[#allocation16_spill]]  ;;  %vm5328_vm11 = vcmask 519168  }
  0xb0   : > { %s7335_s3 = scalar_lea.vmem [#allocation5], %s6599_s8  ;;  %s6601_s14 = smul.u32 24, %s889_s4  ;;  %vm7662_vm9 = vmor %vm1482_vm7, %vm1483_vm8 }
  0xb1   : > { %v2979_v33 = vld [vmem:[%s7335_s3] sm:$0xf]  ;;  %v7339_v34 = vld [vmem:[%s7335_s3 + $0x4] sm:$0xf]  ;;  %v7342_v35 = vld [vmem:[%s7335_s3 + $0x8] sm:$0x1] }
  0xb2   : > { %s854_s6 = sand.u32 1, %s8631_s7   ;;  %s882_s26 = sand.u32 1, %s8632_s0   ;;  %v2986_v36 = vshrl.u32 %v2979_v33, 16  ;;  %v2989_v37 = vshll.u32 %v2979_v33, 16  ;;  %v2995_v38 = vshll.u32 %v7339_v34, 16  ;;  %v2999_v39 = vshrl.u32 %v7339_v34, 16 }
  0xb3   : > { %s6596_s11 = smul.u32 24, %s854_s6  ;;  %s8634_s29 = smov %s8633_s20  ;;  %v5675_v28 = vld [vmem:[%s8633_s20 + $0x4] sm:$0xf]  ;;  %v2982_v40 = vld [vmem:[%s7335_s3 + $0xc] sm:$0xf]  ;;  %v3005_v41 = vshll.u32 %v7342_v35, 16 }
  0xb4   : > { %v7323_v29 = vld [vmem:[%s8634_s29 + $0x60] sm:$0xf]  ;;  %6539 = vmatprep.subr.msk.bf16.mxu1 %vm1011_vm0, %v5675_v28  ;;  %v1013_v30 = vsel %vm1011_vm0, %v5675_v28, 0  ;;  %v3010_v43 = vshrl.u32 %v2982_v40, 16  ;;  %s7349_s9 = smul.u32 24, %s882_s26  ;;  %v2988_v44 = vrot.slane %v2986_v36, 4 }
  0xb5   : > { %6563 = vmatprep.subr.msk.bf16.mxu0 %vm1011_vm0, %v7323_v29  ;;  %s7329_s18 = scalar_lea.vmem [#allocation2], %s6596_s11  ;;  %6054 = vmatpush3.bf16.msra.mxu1 %v1013_v30  ;;  %v2983_v42 = vld [vmem:[%s7335_s3 + $0x10] sm:$0xf]  ;;  %v2991_v45 = vrot.slane %v2989_v37, 5  ;;  %v2997_v46 = vrot.slane %v2995_v38, 5  ;;  %v3001_v47 = vrot.slane %v2999_v39, 4 }
  0xb6   : > { %v6784_v31 = vld [vmem:[%s7329_s18] sm:$0xff]   ;;  %v6785_v32 = vld [vmem:[%s7329_s18 + $0xc] sm:$0xff]   ;;  %v3007_v49 = vrot.slane %v3005_v41, 5  ;;  %v3012_v50 = vrot.slane %v3010_v43, 4  ;;  %v3013_v53 = vshll.u32 %v2982_v40, 16  ;;  %v3019_v54 = vshll.u32 %v2983_v42, 16 }
  0xb7   : > { %1000 = vrot.lane.b32.xlu1 %v6784_v31, %s6973_s5  ;;  %v2984_v48 = vld [vmem:[%s7335_s3 + $0x14] sm:$0x1]  ;;  %v2992_v51 = vor.u32 %v2991_v45, %v2988_v44  ;;  %v3002_v52 = vor.u32 %v3001_v47, %v2997_v46  ;;  %v7358_v55 = vld [vmem:[%s7335_s3] sm:$0xe]  ;;  %v3023_v57 = vshrl.u32 %v2983_v42, 16  ;;  %v3181_v59 = vrot.slane %v7339_v34, 5 }
  0xb8   : > { %v3029_v58 = vshll.u32 %v2984_v48, 16  ;;  %v3015_v62 = vrot.slane %v3013_v53, 5  ;;  %v3021_v63 = vrot.slane %v3019_v54, 5  ;;  %s8637_s7 = sld [smem:[#allocation17_spill]]  ;;  %v3366_v2 = vrot.slane %v3019_v54, 6  ;;  %s7376_s6 = scalar_lea.vmem [#allocation6], %s7349_s9 }
  0xb9   : > { %v2993_v60 = vrot.slane %v2992_v51, 4  ;;  %v3003_v61 = vrot.slane %v3002_v52, 4  ;;  %v3025_v0 = vrot.slane %v3023_v57, 4  ;;  %v3365_v1 = vrot.slane %v3023_v57, 5  ;;  %v7369_v4 = vld [vmem:[%s7335_s3 + $0xc] sm:$0xe] }
  0xba   : > { %v5783_v3 = vrot.slane %v7358_v55, 9  ;;  %v3016_v7 = vor.u32 %v3015_v62, %v3012_v50  ;;  %v3031_v8 = vrot.slane %v3029_v58, 5  ;;  %v3183_v13 = vrot.slane %v3181_v59, 4  ;;  %v1122_v20 = vld [vmem:[%s7329_s18] sm:$0xf]  ;;  %s7488_s8 = scalar_lea.vmem [#allocation7], %s6601_s14 }
  0xbb   : > { %1002 = vrot.lane.b32.xlu1 %v6785_v32, %s6973_s5  ;;  %v2998_v5 = vsel %vm7362_vm4, %v2993_v60, %v2997_v46  ;;  %v3008_v6 = vsel %vm7362_vm4, %v3003_v61, %v3007_v49  ;;  %v3026_v10 = vor.u32 %v3025_v0, %v3021_v63  ;;  %v7380_v11 = vor.u32 %v3366_v2, %v3365_v1  ;;  %v7399_v23 = vld [vmem:[%s7329_s18 + $0x4] sm:$0xf]  ;;  %v7410_v30 = vld [vmem:[%s7329_s18 + $0x8] sm:$0x1]  ;;  %v1125_v37 = vld [vmem:[%s7329_s18 + $0xc] sm:$0xf] }
  0xbc   : > { %v7378_v9 = vcombine.low %v2998_v5, %v3008_v6  ;;  %v3017_v14 = vrot.slane %v3016_v7, 4  ;;  %v3184_v15 = vrot.slane %v7342_v35, 5  ;;  %v5784_v17 = vrot.slane %v7369_v4, 9  ;;  %v7424_v43 = vld [vmem:[%s7329_s18 + $0x10] sm:$0xf]  ;;  %s868_s9 = sand.u32 1, %s8642_s16  }
  0xbd   : > { %v3027_v16 = vrot.slane %v3026_v10, 4  ;;  %v3188_v18 = vrot.slane %v2983_v42, 5  ;;  %v3191_v19 = vrot.slane %v2984_v48, 5  ;;  %v3182_v22 = vsel %vm7384_vm6, %v5783_v3, %v3181_v59  ;;  %v1127_v48 = vld [vmem:[%s7329_s18 + $0x14] sm:$0x1] }
  0xbe   : > { %8638 = vst [vmem:[#allocation31_spill] sm:$0xff] %v7378_v9  ;;  %s861_s0 = sand.u32 1, %s8637_s7   ;;  %3105 = vrot.lane.b32.xlu0 %v7378_v9, %s6973_s5  ;;  %v3022_v21 = vsel %vm7362_vm4, %v3017_v14, %v3021_v63  ;;  %v3185_v25 = vsel %vm7384_vm6, %v3183_v13, %v3184_v15  ;;  %v1132_v31 = vshrl.u32 %v1122_v20, 16  ;;  %v1135_v33 = vshll.u32 %v1122_v20, 16  ;;  %v7441_v60 = vld [vmem:[%s7329_s18] sm:$0xe] }
  0xbf   : > { %v3032_v24 = vsel %vm7362_vm4, %v3027_v16, %v3031_v8  ;;  %v3189_v26 = vsel %vm7384_vm6, %v5784_v17, %v3188_v18  ;;  %v3190_v27 = vrot.slane %v3188_v18, 4  ;;  %s6597_s11 = smul.u32 24, %s861_s0  ;;  %v1141_v35 = vshll.u32 %v7399_v23, 16  ;;  %v7454_v17 = vld [vmem:[%s7329_s18 + $0xc] sm:$0xe] }
  0xc0   : > { %v7407_v28 = vcombine.low %v3022_v21, %v3032_v24  ;;  %v1145_v36 = vshrl.u32 %v7399_v23, 16  ;;  %v7419_v40 = vcombine.low %v3182_v22, %v3185_v25  ;;  %v1134_v42 = vrot.slane %v1132_v31, 4  ;;  %v6786_v22 = vld [vmem:[%s7376_s6] sm:$0xff]   ;;  %s6598_s7 = smul.u32 24, %s868_s9  ;;  %v1481_v9 = vld [vmem:[%s7329_s18 + $0x14] sm:$0x3] }
  0xc1   : > { %v3192_v32 = vsel %vm7384_vm6, %v3190_v27, %v3191_v19  ;;  %s7426_s1 = scalar_lea.vmem [#allocation3], %s6597_s11  ;;  %v1137_v44 = vrot.slane %v1135_v33, 5  ;;  %v1143_v45 = vrot.slane %v1141_v35, 5  ;;  %v1151_v47 = vshll.u32 %v7410_v30, 16  ;;  %v7467_v25 = vld [vmem:[%s8634_s29] sm:$0xf] }
  0xc2   : > { %8641 = vst [vmem:[#allocation32_spill] sm:$0xff] %v7407_v28  ;;  %3107 = vrot.lane.b32.xlu0 %v7407_v28, %s6973_s5  ;;  %v7421_v41 = vcombine.low %v3189_v26, %v3192_v32  ;;  %v1147_v46 = vrot.slane %v1145_v36, 4  ;;  %v1156_v49 = vshrl.u32 %v1125_v37, 16  ;;  %v1159_v50 = vshll.u32 %v1125_v37, 16  ;;  %v3595_v31 = vld [vmem:[%s7376_s6] sm:$0xf]  ;;  %6540 = vmatprep.subr.msk.bf16.mxu1 %vm1011_vm0, %v7467_v25 }
  0xc3   : > { %v1138_v51 = vor.u32 %v1137_v44, %v1134_v42  ;;  %v1153_v53 = vrot.slane %v1151_v47, 5  ;;  %v1165_v54 = vshll.u32 %v7424_v43, 16  ;;  %v1169_v59 = vshrl.u32 %v7424_v43, 16  ;;  %v7474_v32 = vld [vmem:[%s7376_s6 + $0x4] sm:$0xf]  ;;  %s7605_s0 = scalar_lea.vmem [#allocation4], %s6598_s7 }
  0xc4   : > { %3267 = vrot.lane.b32.xlu1 %v7421_v41, %s6973_s5  ;;  %v1148_v52 = vor.u32 %v1147_v46, %v1143_v45  ;;  %v1158_v57 = vrot.slane %v1156_v49, 4  ;;  %v1161_v58 = vrot.slane %v1159_v50, 5  ;;  %v1175_v0 = vshll.u32 %v1127_v48, 16  ;;  %v3598_v46 = vld [vmem:[%s7376_s6 + $0xc] sm:$0xf]  ;;  %s896_s11 = sand.u32 1, %s6907_s12  }
  0xc5   : > { %v1139_v61 = vrot.slane %v1138_v51, 4  ;;  %v1167_v63 = vrot.slane %v1165_v54, 5  ;;  %v1171_v2 = vrot.slane %v1169_v59, 4  ;;  %v1517_v3 = vrot.slane %v1169_v59, 5  ;;  %s6602_s4 = smul.u32 24, %s896_s11 }
  0xc6   : > { %3265 = vrot.lane.b32.xlu0 %v7419_v40, %s6973_s5  ;;  %v1149_v62 = vrot.slane %v1148_v52, 4  ;;  %v1162_v1 = vor.u32 %v1161_v58, %v1158_v57  ;;  %v1518_v5 = vrot.slane %v1165_v54, 6  ;;  %v1177_v8 = vrot.slane %v1175_v0, 5  ;;  %v5700_v12 = vld [vmem:[%s8634_s29 + $0x18] sm:$0xf] }
  0xc7   : > { %v1144_v6 = vsel %vm7362_vm4, %v1139_v61, %v1143_v45  ;;  %v5690_v10 = vrot.slane %v7441_v60, 9  ;;  %v1172_v15 = vor.u32 %v1171_v2, %v1167_v63  ;;  %v1330_v18 = vrot.slane %v7399_v23, 5  ;;  %v3599_v61 = vld [vmem:[%s7376_s6 + $0x10] sm:$0xf]  ;;  %s7813_s12 = scalar_lea.vmem [#allocation8], %s6602_s4 }
  0xc8   : > { %v1154_v7 = vsel %vm7362_vm4, %v1149_v62, %v1153_v53  ;;  %v1163_v14 = vrot.slane %v1162_v1, 4  ;;  %v7451_v16 = vor.u32 %v1518_v5, %v1517_v3  ;;  %v1333_v19 = vrot.slane %v7410_v30, 5 }
  0xc9   : > { %v7449_v13 = vcombine.low %v1144_v6, %v1154_v7  ;;  %v1173_v21 = vrot.slane %v1172_v15, 4  ;;  %v1337_v24 = vrot.slane %v7424_v43, 5  ;;  %v1331_v26 = vsel %vm7384_vm6, %v5690_v10, %v1330_v18  ;;  %v7481_v43 = vld [vmem:[%s7376_s6 + $0x8] sm:$0x1] }
  0xca   : > { %v1168_v20 = vsel %vm7362_vm4, %v1163_v14, %v1167_v63  ;;  %v1332_v27 = vrot.slane %v1330_v18, 4  ;;  %v5691_v30 = vrot.slane %v7454_v17, 9  ;;  %v1340_v42 = vrot.slane %v1127_v48, 5  ;;  %v6787_v48 = vld [vmem:[%s7376_s6 + $0xc] sm:$0xff]   ;;  %v7507_v63 = vld [vmem:[%s7376_s6 + $0x14] sm:$0x1] }
  0xcb   : > { %1251 = vrot.lane.b32.xlu0 %v7449_v13, %s6973_s5  ;;  %v1178_v33 = vsel %vm7362_vm4, %v1173_v21, %v1177_v8  ;;  %v1339_v37 = vrot.slane %v1337_v24, 4  ;;  %v3602_v49 = vshrl.u32 %v3595_v31, 16  ;;  %v3605_v50 = vshll.u32 %v3595_v31, 16 }
  0xcc   : > { %v7483_v44 = vcombine.low %v1168_v20, %v1178_v33  ;;  %v1334_v45 = vsel %vm7384_vm6, %v1332_v27, %v1333_v19  ;;  %v1338_v51 = vsel %vm7384_vm6, %v5691_v30, %v1337_v24  ;;  %v8569_v53 = vshll.u32 %v7474_v32, 16  ;;  %v7518_v20 = vld [vmem:[%s7376_s6] sm:$0xe] }
  0xcd   : > { %v7491_v47 = vcombine.low %v1331_v26, %v1334_v45  ;;  %v1341_v52 = vsel %vm7384_vm6, %v1339_v37, %v1340_v42  ;;  %v3604_v54 = vrot.slane %v3602_v49, 4  ;;  %v3607_v57 = vrot.slane %v3605_v50, 5  ;;  %v7529_v49 = vld [vmem:[%s7376_s6 + $0xc] sm:$0xe] }
  0xce   : > { %1253 = vrot.lane.b32.xlu1 %v7483_v44, %s6973_s5  ;;  %v8568_v58 = vshrl.u32 %v7474_v32, 16  ;;  %v3621_v59 = vshll.u32 %v7481_v43, 16  ;;  %v3613_v62 = vrot.slane %v8569_v53, 5  ;;  %v3626_v0 = vshrl.u32 %v3598_v46, 16 }
  0xcf   : > { %3529 = vrot.lane.b32.xlu0 %v6786_v22, %s6973_s5  ;;  %v7511_v1 = vcombine.low %v1338_v51, %v1341_v52  ;;  %v3608_v2 = vor.u32 %v3607_v57, %v3604_v54  ;;  %v3629_v5 = vshll.u32 %v3598_v46, 16  ;;  %v3635_v8 = vshll.u32 %v3599_v61, 16 }
  0xd0   : > { %v3617_v3 = vrot.slane %v8568_v58, 4  ;;  %v3623_v6 = vrot.slane %v3621_v59, 5  ;;  %v3628_v7 = vrot.slane %v3626_v0, 4  ;;  %v3639_v10 = vshrl.u32 %v3599_v61, 16  ;;  %v1747_v59 = vld [vmem:[%s7426_s1] sm:$0xf] }
  0xd1   : > { %v3609_v14 = vrot.slane %v3608_v2, 4  ;;  %v3631_v18 = vrot.slane %v3629_v5, 5  ;;  %v3645_v19 = vshll.u32 %v7507_v63, 16  ;;  %v3637_v21 = vrot.slane %v3635_v8, 5  ;;  %v7544_v5 = vld [vmem:[%s7426_s1 + $0x4] sm:$0xf] }
  0xd2   : > { %3531 = vrot.lane.b32.xlu1 %v6787_v48, %s6973_s5  ;;  %v3618_v15 = vor.u32 %v3617_v3, %v3613_v62  ;;  %v3641_v22 = vrot.slane %v3639_v10, 4  ;;  %v3981_v24 = vrot.slane %v3639_v10, 5  ;;  %v3982_v26 = vrot.slane %v3635_v8, 6 }
  0xd3   : > { %1414 = vrot.lane.b32.xlu0 %v7491_v47, %s6973_s5  ;;  %v3614_v27 = vsel %vm7362_vm4, %v3609_v14, %v3613_v62  ;;  %v3632_v31 = vor.u32 %v3631_v18, %v3628_v7  ;;  %v3647_v33 = vrot.slane %v3645_v19, 5  ;;  %v5814_v45 = vrot.slane %v7518_v20, 9  ;;  %v6788_v62 = vld [vmem:[%s7426_s1] sm:$0xff]  }
  0xd4   : > { %v3619_v30 = vrot.slane %v3618_v15, 4  ;;  %v3642_v37 = vor.u32 %v3641_v22, %v3637_v21  ;;  %v7524_v42 = vor.u32 %v3982_v26, %v3981_v24  ;;  %v3797_v46 = vrot.slane %v7474_v32, 5  ;;  %v7557_v15 = vld [vmem:[%s7426_s1 + $0x8] sm:$0x1] }
  0xd5   : > { %v3633_v48 = vrot.slane %v3632_v31, 4  ;;  %v3800_v51 = vrot.slane %v7481_v43, 5  ;;  %v5815_v3 = vrot.slane %v7529_v49, 9  ;;  %v3804_v7 = vrot.slane %v3599_v61, 5  ;;  %v6789_v61 = vld [vmem:[%s7426_s1 + $0xc] sm:$0xff]  }
  0xd6   : > { %1416 = vrot.lane.b32.xlu1 %v7511_v1, %s6973_s5  ;;  %v3624_v50 = vsel %vm7362_vm4, %v3619_v30, %v3623_v6  ;;  %v3643_v54 = vrot.slane %v3642_v37, 4  ;;  %v3799_v57 = vrot.slane %v3797_v46, 4  ;;  %v3798_v2 = vsel %vm7384_vm6, %v5814_v45, %v3797_v46  ;;  %v1750_v30 = vld [vmem:[%s7426_s1 + $0xc] sm:$0xf]  ;;  %v7575_v37 = vld [vmem:[%s7426_s1 + $0x10] sm:$0xf] }
  0xd7   : > { %v7534_v52 = vcombine.low %v3614_v27, %v3624_v50  ;;  %v3638_v0 = vsel %vm7362_vm4, %v3633_v48, %v3637_v21  ;;  %v3807_v8 = vrot.slane %v7507_v63, 5  ;;  %v3357_v10 = vshrl.u32 %v7369_v4, 16  ;;  %v7578_v45 = vld [vmem:[%s7426_s1 + $0x14] sm:$0x1] }
  0xd8   : > { %v3648_v43 = vsel %vm7362_vm4, %v3643_v54, %v3647_v33  ;;  %v3801_v6 = vsel %vm7384_vm6, %v3799_v57, %v3800_v51  ;;  %v3360_v18 = vshll.u32 %v7369_v4, 16  ;;  %v3806_v21 = vrot.slane %v3804_v7, 4  ;;  %v7587_v51 = vld [vmem:[%s8634_s29 + $0x64] sm:$0xf] }
  0xd9   : > { %3721 = vrot.lane.b32.xlu0 %v7534_v52, %s6973_s5  ;;  %v7554_v14 = vcombine.low %v3638_v0, %v3648_v43  ;;  %v7560_v19 = vcombine.low %v3798_v2, %v3801_v6  ;;  %v1754_v22 = vshrl.u32 %v1747_v59, 16  ;;  %v3805_v63 = vsel %vm7384_vm6, %v5815_v3, %v3804_v7 }
  0xda   : > { %v1757_v24 = vshll.u32 %v1747_v59, 16  ;;  %v8565_v26 = vshll.u32 %v7544_v5, 16  ;;  %v8564_v27 = vshrl.u32 %v7544_v5, 16  ;;  %v3808_v4 = vsel %vm7384_vm6, %v3806_v21, %v3807_v8 }
  0xdb   : > { %3723 = vrot.lane.b32.xlu1 %v7554_v14, %s6973_s5  ;;  %v1756_v31 = vrot.slane %v1754_v22, 4  ;;  %v1773_v33 = vshll.u32 %v7557_v15, 16  ;;  %v3359_v54 = vrot.slane %v3357_v10, 5  ;;  %v7590_v57 = vcombine.low %v3805_v63, %v3808_v4 }
  0xdc   : > { %v1759_v46 = vrot.slane %v1757_v24, 5  ;;  %v1765_v50 = vrot.slane %v8565_v26, 5  ;;  %v1769_v48 = vrot.slane %v8564_v27, 4  ;;  %v1778_v3 = vshrl.u32 %v1750_v30, 16  ;;  %v7603_v24 = vld [vmem:[%s7426_s1] sm:$0xe] }
  0xdd   : > { %1681 = vrot.lane.b32.xlu0 %v6788_v62, %s6973_s5  ;;  %v1775_v59 = vrot.slane %v1773_v33, 5  ;;  %v3116_v62 = vsel %vm1011_vm0, %v7323_v29, 0  ;;  %v1781_v43 = vshll.u32 %v1750_v30, 16  ;;  %v3362_v6 = vrot.slane %v3360_v18, 6 }
  0xde   : > { %v1760_v0 = vor.u32 %v1759_v46, %v1756_v31  ;;  %v1770_v2 = vor.u32 %v1769_v48, %v1765_v50  ;;  %6198 = vmatpush3.bf16.msra.mxu0 %v3116_v62  ;;  %v1787_v7 = vshll.u32 %v7575_v37, 16  ;;  %v1791_v8 = vshrl.u32 %v7575_v37, 16 }
  0xdf   : > { %3881 = vrot.lane.b32.xlu1 %v7560_v19, %s6973_s5  ;;  %v1797_v10 = vshll.u32 %v7578_v45, 16  ;;  %6564 = vmatprep.subr.msk.bf16.mxu0 %vm1011_vm0, %v7587_v51  ;;  %v1780_v22 = vrot.slane %v1778_v3, 4  ;;  %v1783_v63 = vrot.slane %v1781_v43, 5  ;;  %v3334_v48 = vshrl.u32 %v7358_v55, 16  ;;  %v7617_v3 = vld [vmem:[%s7426_s1 + $0xc] sm:$0xe] }
  0xe0   : > { %v1761_v29 = vrot.slane %v1760_v0, 4  ;;  %v1771_v21 = vrot.slane %v1770_v2, 4  ;;  %v1789_v18 = vrot.slane %v1787_v7, 5  ;;  %v2133_v30 = vrot.slane %v1791_v8, 5 }
  0xe1   : > { %1683 = vrot.lane.b32.xlu0 %v6789_v61, %s6973_s5  ;;  %v1793_v61 = vrot.slane %v1791_v8, 4  ;;  %v1784_v33 = vor.u32 %v1783_v63, %v1780_v22  ;;  %v2134_v46 = vrot.slane %v1787_v7, 6  ;;  %v1799_v2 = vrot.slane %v1797_v10, 5 }
  0xe2   : > { %v1766_v4 = vsel %vm7362_vm4, %v1761_v29, %v1765_v50  ;;  %v1776_v31 = vsel %vm7362_vm4, %v1771_v21, %v1775_v59  ;;  %v3337_v43 = vshll.u32 %v7358_v55, 16  ;;  %v3363_v8 = vor.u32 %v3362_v6, %v3359_v54  ;;  %v6790_v59 = vld [vmem:[%s7488_s8] sm:$0xff]  }
  0xe3   : > { %3883 = vrot.lane.b32.xlu1 %v7590_v57, %s6973_s5  ;;  %v7614_v62 = vcombine.low %v1766_v4, %v1776_v31  ;;  %v1794_v0 = vor.u32 %v1793_v61, %v1789_v18  ;;  %v1785_v27 = vrot.slane %v1784_v33, 4  ;;  %v7620_v26 = vor.u32 %v2134_v46, %v2133_v30 }
  0xe4   : > { %v5721_v7 = vrot.slane %v7603_v24, 9  ;;  %v1949_v29 = vrot.slane %v7544_v5, 5  ;;  %v1952_v21 = vrot.slane %v7557_v15, 5  ;;  %v3342_v10 = vrot.slane %v2999_v39, 5 }
  0xe5   : > { %1873 = vrot.lane.b32.xlu0 %v7614_v62, %s6973_s5  ;;  %v1795_v50 = vrot.slane %v1794_v0, 4  ;;  %v3343_v55 = vrot.slane %v2995_v38, 6  ;;  %v1790_v54 = vsel %vm7362_vm4, %v1785_v27, %v1789_v18  ;;  %v5722_v6 = vrot.slane %v7617_v3, 9 }
  0xe6   : > { %v1950_v63 = vsel %vm7384_vm6, %v5721_v7, %v1949_v29  ;;  %v1951_v15 = vrot.slane %v1949_v29, 4  ;;  %v1956_v61 = vrot.slane %v7575_v37, 5  ;;  %v3336_v39 = vrot.slane %v3334_v48, 5  ;;  %v6791_v37 = vld [vmem:[%s7488_s8 + $0xc] sm:$0xff]   ;;  %v3332_v7 = vld [vmem:[%s7335_s3 + $0x14] sm:$0x3] }
  0xe7   : > { %v1800_v22 = vsel %vm7362_vm4, %v1795_v50, %v1799_v2  ;;  %v3339_v30 = vrot.slane %v3337_v43, 6  ;;  %v1959_v38 = vrot.slane %v7578_v45, 5  ;;  %v7643_v27 = vrot.slane %v3363_v8, 4  ;;  %v3331_v45 = vld [vmem:[%s7335_s3 + $0x8] sm:$0x3] }
  0xe8   : > { %v7640_v34 = vcombine.low %v1790_v54, %v1800_v22  ;;  %v1486_v18 = vshrl.u32 %v7441_v60, 16  ;;  %v1953_v4 = vsel %vm7384_vm6, %v1951_v15, %v1952_v21  ;;  %v1958_v31 = vrot.slane %v1956_v61, 4 }
  0xe9   : > { %4145 = vrot.lane.b32.xlu0 %v6790_v59, %s6973_s5  ;;  %v1509_v33 = vshrl.u32 %v7454_v17, 16  ;;  %v7653_v46 = vcombine.low %v1950_v63, %v1953_v4  ;;  %v1957_v48 = vsel %vm7384_vm6, %v5722_v6, %v1956_v61  ;;  %v1489_v2 = vshll.u32 %v7441_v60, 16  ;;  %v7680_v63 = vld [vmem:[%s7488_s8 + $0x4] sm:$0xf] }
  0xea   : > { %1875 = vrot.lane.b32.xlu1 %v7640_v34, %s6973_s5  ;;  %v1960_v0 = vsel %vm7384_vm6, %v1958_v31, %v1959_v38  ;;  %v1512_v43 = vshll.u32 %v7454_v17, 16  ;;  %v3340_v50 = vor.u32 %v3339_v30, %v3336_v39  ;;  %v3344_v59 = vor.u32 %v3343_v55, %v3342_v10  ;;  %v4211_v17 = vld [vmem:[%s7488_s8] sm:$0xf]  ;;  %v7683_v38 = vld [vmem:[%s7488_s8 + $0x8] sm:$0x1] }
  0xeb   : > { %v7667_v29 = vrot.slane %v1486_v18, 5  ;;  %v3348_v21 = vshrl.u32 %v3331_v45, 16  ;;  %v3351_v54 = vshll.u32 %v3331_v45, 16  ;;  %v3368_v60 = vsel %vm7662_vm9, %v7643_v27, %v7380_v11 }
  0xec   : > { %v1511_v6 = vrot.slane %v1509_v33, 5  ;;  %v7677_v22 = vcombine.low %v1957_v48, %v1960_v0  ;;  %v3341_v10 = vrot.slane %v3340_v50, 4  ;;  %v3346_v55 = vrot.slane %v3344_v59, 4 }
  0xed   : > { %2033 = vrot.lane.b32.xlu0 %v7653_v46, %s6973_s5  ;;  %v3350_v15 = vrot.slane %v3348_v21, 5  ;;  %v3353_v61 = vrot.slane %v3351_v54, 6  ;;  %v3371_v39 = vshrl.u32 %v3332_v7, 16  ;;  %v3374_v30 = vshll.u32 %v3332_v7, 16 }
  0xee   : > { %4147 = vrot.lane.b32.xlu1 %v6791_v37, %s6973_s5  ;;  %v1514_v18 = vrot.slane %v1512_v43, 6  ;;  %v3345_v27 = vsel %vm7662_vm9, %v3341_v10, %v3344_v59  ;;  %v3369_v4 = vrot.slane %v7380_v11, 4  ;;  %v4218_v31 = vshrl.u32 %v4211_v17, 16  ;;  %v4214_v10 = vld [vmem:[%s7488_s8 + $0xc] sm:$0xf] }
  0xef   : > { %v3354_v33 = vor.u32 %v3353_v61, %v3350_v15  ;;  %v3373_v37 = vrot.slane %v3371_v39, 5  ;;  %v3376_v45 = vrot.slane %v3374_v30, 6  ;;  %v4221_v48 = vshll.u32 %v4211_v17, 16  ;;  %v7703_v39 = vld [vmem:[%s7488_s8 + $0x10] sm:$0xf] }
  0xf0   : > { %v4220_v0 = vrot.slane %v4218_v31, 4  ;;  %v8566_v50 = vshll.u32 %v7680_v63, 16  ;;  %v8567_v43 = vshrl.u32 %v7680_v63, 16  ;;  %v4237_v59 = vshll.u32 %v7683_v38, 16  ;;  %v7706_v30 = vld [vmem:[%s7488_s8 + $0x14] sm:$0x1] }
  0xf1   : > { %v1491_v7 = vrot.slane %v1489_v2, 6  ;;  %v3355_v11 = vsel %vm7662_vm9, %v3346_v55, %v3354_v33  ;;  %v3377_v21 = vor.u32 %v3376_v45, %v3373_v37  ;;  %v4223_v54 = vrot.slane %v4221_v48, 5 }
  0xf2   : > { %2035 = vrot.lane.b32.xlu1 %v7677_v22, %s6973_s5  ;;  %v7696_v15 = vcombine.low %v3345_v27, %v3355_v11  ;;  %v4229_v17 = vrot.slane %v8566_v50, 5  ;;  %v4233_v61 = vrot.slane %v8567_v43, 4  ;;  %v1515_v31 = vor.u32 %v1514_v18, %v1511_v6 }
  0xf3   : > { %v3378_v2 = vsel %vm7662_vm9, %v3369_v4, %v3377_v21  ;;  %v4224_v55 = vor.u32 %v4223_v54, %v4220_v0  ;;  %v4239_v33 = vrot.slane %v4237_v59, 5  ;;  %v4242_v45 = vshrl.u32 %v4214_v10, 16 }
  0xf4   : > { %v7710_v37 = vcombine.low %v3368_v60, %v3378_v2  ;;  %v4234_v27 = vor.u32 %v4233_v61, %v4229_v17  ;;  %v4245_v48 = vshll.u32 %v4214_v10, 16  ;;  %v4251_v50 = vshll.u32 %v7703_v39, 16  ;;  %v1480_v10 = vld [vmem:[%s7329_s18 + $0x8] sm:$0x3] }
  0xf5   : > { %v4225_v11 = vrot.slane %v4224_v55, 4  ;;  %v4255_v43 = vshrl.u32 %v7703_v39, 16  ;;  %v4261_v58 = vshll.u32 %v7706_v30, 16  ;;  %v1495_v6 = vrot.slane %v1141_v35, 6 }
  0xf6   : > { %v4235_v18 = vrot.slane %v4234_v27, 4  ;;  %v4244_v4 = vrot.slane %v4242_v45, 4  ;;  %v4247_v0 = vrot.slane %v4245_v48, 5  ;;  %v1516_v59 = vrot.slane %v1515_v31, 4 }
  0xf7   : > { %v4230_v60 = vsel %vm7362_vm4, %v4225_v11, %v4229_v17  ;;  %v4253_v21 = vrot.slane %v4251_v50, 5  ;;  %v4257_v54 = vrot.slane %v4255_v43, 4  ;;  %v4597_v55 = vrot.slane %v4255_v43, 5  ;;  %v6792_v43 = vld [vmem:[%s7605_s0] sm:$0xff]  }
  0xf8   : > { %v4240_v61 = vsel %vm7362_vm4, %v4235_v18, %v4239_v33  ;;  %v4248_v2 = vor.u32 %v4247_v0, %v4244_v4  ;;  %v4598_v53 = vrot.slane %v4251_v50, 6  ;;  %v4263_v45 = vrot.slane %v4261_v58, 5 }
  0xf9   : > { %v7722_v35 = vcombine.low %v4230_v60, %v4240_v61  ;;  %v4258_v27 = vor.u32 %v4257_v54, %v4253_v21  ;;  %v1492_v31 = vor.u32 %v1491_v7, %v7667_v29  ;;  %v1494_v11 = vrot.slane %v1145_v36, 5  ;;  %v7737_v29 = vld [vmem:[%s7488_s8] sm:$0xe] }
  0xfa   : > { %v4249_v48 = vrot.slane %v4248_v2, 4  ;;  %v7725_v17 = vor.u32 %v4598_v53, %v4597_v55  ;;  %v1500_v28 = vshrl.u32 %v1480_v10, 16  ;;  %v1503_v18 = vshll.u32 %v1480_v10, 16 }
  0xfb   : > { %8645 = vst [vmem:[#allocation33_spill] sm:$0xff] %v7722_v35  ;;  %4337 = vrot.lane.b32.xlu0 %v7722_v35, %s6973_s5  ;;  %v4259_v50 = vrot.slane %v4258_v27, 4  ;;  %v1493_v33 = vrot.slane %v1492_v31, 4  ;;  %v1520_v58 = vsel %vm7662_vm9, %v1516_v59, %v7451_v16  ;;  %v1496_v36 = vor.u32 %v1495_v6, %v1494_v11  ;;  %v7756_v27 = vld [vmem:[%s7488_s8 + $0xc] sm:$0xe] }
  0xfc   : > { %v4254_v23 = vsel %vm7362_vm4, %v4249_v48, %v4253_v21  ;;  %v1502_v53 = vrot.slane %v1500_v28, 5  ;;  %v1521_v7 = vrot.slane %v7451_v16, 4  ;;  %v1505_v0 = vrot.slane %v1503_v18, 6  ;;  %v6793_v28 = vld [vmem:[%s7605_s0 + $0xc] sm:$0xff]  }
  0xfd   : > { %v4264_v4 = vsel %vm7362_vm4, %v4259_v50, %v4263_v45  ;;  %v1523_v60 = vshrl.u32 %v1481_v9, 16  ;;  %v1526_v54 = vshll.u32 %v1481_v9, 16  ;;  %v1497_v59 = vsel %vm7662_vm9, %v1493_v33, %v1496_v36  ;;  %v2363_v50 = vld [vmem:[%s7605_s0] sm:$0xf]  ;;  %v7828_v35 = vld [vmem:[%s7605_s0 + $0xc] sm:$0xe] }
  0xfe   : > { %v7744_v10 = vcombine.low %v4254_v23, %v4264_v4  ;;  %v1498_v61 = vrot.slane %v1496_v36, 4  ;;  %v5845_v21 = vrot.slane %v7737_v29, 9  ;;  %v1506_v16 = vor.u32 %v1505_v0, %v1502_v53  ;;  %v7773_v36 = vld [vmem:[%s7605_s0 + $0x4] sm:$0xf] }
  0xff   : > { %2297 = vrot.lane.b32.xlu0 %v6792_v43, %s6973_s5  ;;  %v1525_v6 = vrot.slane %v1523_v60, 5  ;;  %v1528_v2 = vrot.slane %v1526_v54, 6  ;;  %v4413_v55 = vrot.slane %v7680_v63, 5  ;;  %v4416_v9 = vrot.slane %v7683_v38, 5  ;;  %v7781_v60 = vld [vmem:[%s7605_s0 + $0x8] sm:$0x1] }
 0x100   : > { %8646 = vst [vmem:[#allocation34_spill] sm:$0xff] %v7744_v10  ;;  %4339 = vrot.lane.b32.xlu1 %v7744_v10, %s6973_s5  ;;  %v1507_v45 = vsel %vm7662_vm9, %v1498_v61, %v1506_v16  ;;  %v5846_v18 = vrot.slane %v7756_v27, 9  ;;  %v4420_v23 = vrot.slane %v7703_v39, 5  ;;  %v4423_v0 = vrot.slane %v7706_v30, 5 }
 0x101   : > { %v1529_v31 = vor.u32 %v1528_v2, %v1525_v6  ;;  %v4414_v48 = vsel %vm7384_vm6, %v5845_v21, %v4413_v55  ;;  %v4415_v11 = vrot.slane %v4413_v55, 4  ;;  %v7762_v43 = vcombine.low %v1497_v59, %v1507_v45  ;;  %v2366_v21 = vld [vmem:[%s7605_s0 + $0xc] sm:$0xf]  ;;  %v7794_v6 = vld [vmem:[%s7605_s0 + $0x10] sm:$0xf] }
 0x102   : > { %v4422_v54 = vrot.slane %v4420_v23, 4  ;;  %v2370_v59 = vshrl.u32 %v2363_v50, 16  ;;  %v2373_v39 = vshll.u32 %v2363_v50, 16  ;;  %v8572_v61 = vshrl.u32 %v7773_v36, 16 }
 0x103   : > { %2299 = vrot.lane.b32.xlu0 %v6793_v28, %s6973_s5  ;;  %v1530_v33 = vsel %vm7662_vm9, %v1521_v7, %v1529_v31  ;;  %v4417_v38 = vsel %vm7384_vm6, %v4415_v11, %v4416_v9  ;;  %v4421_v7 = vsel %vm7384_vm6, %v5846_v18, %v4420_v23  ;;  %v2389_v16 = vshll.u32 %v7781_v60, 16  ;;  %v7803_v31 = vld [vmem:[%s7605_s0 + $0x14] sm:$0x1] }
 0x104   : > { %v7775_v53 = vcombine.low %v1520_v58, %v1530_v33  ;;  %v7777_v4 = vcombine.low %v4414_v48, %v4417_v38  ;;  %v8573_v58 = vshll.u32 %v7773_v36, 16  ;;  %v4424_v30 = vsel %vm7384_vm6, %v4422_v54, %v4423_v0 }
 0x105   : > { %v2372_v28 = vrot.slane %v2370_v59, 4  ;;  %v7796_v2 = vcombine.low %v4421_v7, %v4424_v30  ;;  %v2375_v55 = vrot.slane %v2373_v39, 5  ;;  %v2385_v45 = vrot.slane %v8572_v61, 4 }
 0x106   : > { %8647 = vst [vmem:[#allocation35_spill] sm:$0xff] %v7777_v4  ;;  %4497 = vrot.lane.b32.xlu1 %v7777_v4, %s6973_s5  ;;  %v2381_v9 = vrot.slane %v8573_v58, 5  ;;  %v3973_v48 = vshrl.u32 %v7529_v49, 16  ;;  %v2391_v11 = vrot.slane %v2389_v16, 5  ;;  %v2394_v50 = vshrl.u32 %v2366_v21, 16 }
 0x107   : > { %8648 = vst [vmem:[#allocation36_spill] sm:$0xff] %v7796_v2  ;;  %v2376_v33 = vor.u32 %v2375_v55, %v2372_v28  ;;  %v2397_v18 = vshll.u32 %v2366_v21, 16  ;;  %v2403_v23 = vshll.u32 %v7794_v6, 16  ;;  %v3976_v0 = vshll.u32 %v7529_v49, 16 }
 0x108   : > { %v2386_v38 = vor.u32 %v2385_v45, %v2381_v9  ;;  %v2396_v7 = vrot.slane %v2394_v50, 4  ;;  %v2407_v54 = vshrl.u32 %v7794_v6, 16  ;;  %v2413_v59 = vshll.u32 %v7803_v31, 16 }
 0x109   : > { %v2377_v39 = vrot.slane %v2376_v33, 4  ;;  %v2399_v16 = vrot.slane %v2397_v18, 5  ;;  %v2405_v61 = vrot.slane %v2403_v23, 5  ;;  %v2750_v55 = vrot.slane %v2403_v23, 6 }
 0x10a   : > { %4499 = vrot.lane.b32.xlu1 %v7796_v2, %s6973_s5  ;;  %v2387_v30 = vrot.slane %v2386_v38, 4  ;;  %v2409_v58 = vrot.slane %v2407_v54, 4  ;;  %v2749_v28 = vrot.slane %v2407_v54, 5  ;;  %v2415_v38 = vrot.slane %v2413_v59, 5  ;;  %v7824_v2 = vld [vmem:[%s7605_s0] sm:$0xe] }
 0x10b   : > { %v2382_v49 = vsel %vm7362_vm4, %v2377_v39, %v2381_v9  ;;  %v2400_v45 = vor.u32 %v2399_v16, %v2396_v7  ;;  %v3975_v54 = vrot.slane %v3973_v48, 5  ;;  %v3978_v23 = vrot.slane %v3976_v0, 6 }
 0x10c   : > { %v2392_v21 = vsel %vm7362_vm4, %v2387_v30, %v2391_v11  ;;  %v2410_v33 = vor.u32 %v2409_v58, %v2405_v61  ;;  %v7821_v18 = vor.u32 %v2750_v55, %v2749_v28  ;;  %v5752_v10 = vrot.slane %v7824_v2, 9  ;;  %v6794_v11 = vld [vmem:[%s7813_s12] sm:$0xff]  }
 0x10d   : > { %v7819_v50 = vcombine.low %v2382_v49, %v2392_v21  ;;  %v2401_v4 = vrot.slane %v2400_v45, 4  ;;  %v2565_v7 = vrot.slane %v7773_v36, 5  ;;  %v2568_v58 = vrot.slane %v7781_v60, 5 }
 0x10e   : > { %v2411_v9 = vrot.slane %v2410_v33, 4  ;;  %v3950_v59 = vshrl.u32 %v7518_v20, 16  ;;  %v3953_v39 = vshll.u32 %v7518_v20, 16  ;;  %v2572_v0 = vrot.slane %v7794_v6, 5 }
 0x10f   : > { %2489 = vrot.lane.b32.xlu0 %v7819_v50, %s6973_s5  ;;  %v2406_v48 = vsel %vm7362_vm4, %v2401_v4, %v2405_v61  ;;  %v2566_v16 = vsel %vm7384_vm6, %v5752_v10, %v2565_v7  ;;  %v2567_v28 = vrot.slane %v2565_v7, 4  ;;  %v5753_v55 = vrot.slane %v7828_v35, 9  ;;  %v7854_v10 = vld [vmem:[%s7813_s12 + $0xc] sm:$0xff]  }
 0x110   : > { %v2416_v30 = vsel %vm7362_vm4, %v2411_v9, %v2415_v38  ;;  %v3979_v60 = vor.u32 %v3978_v23, %v3975_v54  ;;  %v2574_v21 = vrot.slane %v2572_v0, 4  ;;  %v2575_v4 = vrot.slane %v7803_v31, 5  ;;  %8649 = vst [vmem:[#allocation37_spill] sm:$0xff] %v7854_v10 }
 0x111   : > { %v7845_v49 = vcombine.low %v2406_v48, %v2416_v30  ;;  %v2569_v20 = vsel %vm7384_vm6, %v2567_v28, %v2568_v58  ;;  %v3952_v61 = vrot.slane %v3950_v59, 5  ;;  %v3955_v6 = vrot.slane %v3953_v39, 6  ;;  %v3948_v28 = vld [vmem:[%s7376_s6 + $0x14] sm:$0x3] }
 0x112   : > { %v7856_v45 = vcombine.low %v2566_v16, %v2569_v20  ;;  %v2573_v33 = vsel %vm7384_vm6, %v5753_v55, %v2572_v0  ;;  %v2576_v38 = vsel %vm7384_vm6, %v2574_v21, %v2575_v4  ;;  %v8650_v54 = vshll.u32 %v7474_v32, 16 }
 0x113   : > { %4761 = vrot.lane.b32.xlu0 %v6794_v11, %s6973_s5  ;;  %2491 = vrot.lane.b32.xlu1 %v7845_v49, %s6973_s5  ;;  %v3980_v31 = vrot.slane %v3979_v60, 4  ;;  %v7868_v9 = vcombine.low %v2573_v33, %v2576_v38  ;;  %v3947_v11 = vld [vmem:[%s7376_s6 + $0x8] sm:$0x3]  ;;  %v3956_v7 = vor.u32 %v3955_v6, %v3952_v61  ;;  %v8652_v58 = vshrl.u32 %v7474_v32, 16 }
 0x114   : > { %v3959_v23 = vrot.slane %v8650_v54, 6  ;;  %v3964_v48 = vshrl.u32 %v3947_v11, 16  ;;  %v3967_v0 = vshll.u32 %v3947_v11, 16  ;;  %v3987_v20 = vshrl.u32 %v3948_v28, 16  ;;  %v5682_v38 = vld [vmem:[%s8634_s29 + $0x8] sm:$0xf] }
 0x115   : > { %8651 = vst [vmem:[#allocation38_spill] sm:$0xff] %v7868_v9  ;;  %v3958_v59 = vrot.slane %v8652_v58, 5  ;;  %v3957_v30 = vrot.slane %v3956_v7, 4  ;;  %v3984_v55 = vsel %vm7662_vm9, %v3980_v31, %v7524_v42  ;;  %v3990_v4 = vshll.u32 %v3948_v28, 16 }
 0x116   : > { %v3966_v60 = vrot.slane %v3964_v48, 5  ;;  %v3969_v21 = vrot.slane %v3967_v0, 6  ;;  %v1071_v32 = vsel %vm1011_vm0, %v7467_v25, 0  ;;  %v3989_v31 = vrot.slane %v3987_v20, 5  ;;  %v6798_v25 = vld [vmem:[%s7329_s18] sm:$0xff]  }
 0x117   : > { %2649 = vrot.lane.b32.xlu0 %v7856_v45, %s6973_s5  ;;  %4763 = vrot.lane.b32.xlu1 %v7854_v10, %s6973_s5  ;;  %v3960_v16 = vor.u32 %v3959_v23, %v3958_v59  ;;  %v3985_v23 = vrot.slane %v7524_v42, 4  ;;  %v3992_v11 = vrot.slane %v3990_v4, 6  ;;  %v4827_v48 = vld [vmem:[%s7813_s12] sm:$0xf]  ;;  %v7902_v0 = vld [vmem:[%s7813_s12 + $0x4] sm:$0xf] }
 0x118   : > { %v3970_v54 = vor.u32 %v3969_v21, %v3966_v60  ;;  %v8579_v28 = vshll.u32 %v7902_v0, 16  ;;  %v8578_v60 = vshrl.u32 %v7902_v0, 16  ;;  %v7907_v20 = vld [vmem:[%s7813_s12 + $0x8] sm:$0x1] }
 0x119   : > { %v3961_v61 = vsel %vm7662_vm9, %v3957_v30, %v3960_v16  ;;  %v3962_v6 = vrot.slane %v3960_v16, 4  ;;  %v3993_v58 = vor.u32 %v3992_v11, %v3989_v31  ;;  %v4834_v30 = vshrl.u32 %v4827_v48, 16 }
 0x11a   : > { %v4837_v16 = vshll.u32 %v4827_v48, 16 }
 0x11b   : > { %2651 = vrot.lane.b32.xlu1 %v7868_v9, %s6973_s5  ;;  %v3971_v7 = vsel %vm7662_vm9, %v3962_v6, %v3970_v54  ;;  %v3994_v42 = vsel %vm7662_vm9, %v3985_v23, %v3993_v58  ;;  %v4836_v4 = vrot.slane %v4834_v30, 4  ;;  %v4853_v6 = vshll.u32 %v7907_v20, 16 }
 0x11c   : > { %v7894_v59 = vcombine.low %v3961_v61, %v3971_v7  ;;  %v4849_v61 = vrot.slane %v8578_v60, 4  ;;  %v1194_v23 = vsel %vm1011_vm0, %v5682_v38, 0  ;;  %v7920_v7 = vld [vmem:[%s7813_s12 + $0x10] sm:$0xf] }
 0x11d   : > { %v4855_v11 = vrot.slane %v4853_v6, 5  ;;  %v4867_v30 = vshll.u32 %v7920_v7, 16  ;;  %v5687_v6 = vld [vmem:[%s8634_s29 + $0xc] sm:$0xf] }
 0x11e   : > { %v1262_v56 = vsel %vm1011_vm0, %v5687_v6, 0 }
 0x11f   : > { %v4869_v60 = vrot.slane %v4867_v30, 5 }
 0x129   : > { %v1001_v39 = vpop.permute.xlu1 %1000 }
 0x12a   : > { %6055 = vmatprep.mubr.msk.bf16.mxu1 %vm1004_vm10, %v1001_v39  ;;  %v7898_v39 = vcombine.low %v3984_v55, %v3994_v42  ;;  %v4845_v55 = vrot.slane %v8579_v28, 5 }
 0x12c   : > { %v4850_v31 = vor.u32 %v4849_v61, %v4845_v55  ;;  %v4871_v61 = vshrl.u32 %v7920_v7, 16 }
 0x12d   : > { %v1003_v33 = vpop.permute.xlu1 %1002 }
 0x12e   : > { %6056 = vmatmul.mubr.msk.bf16.vlgmr.msra.gmra.mrb[0].mxu1 %vm1004_vm10, %v1003_v33  ;;  %v3208_v33 = vsel %vm1011_vm0, %v7587_v51, 0  ;;  %v5790_v51 = vld [vmem:[%s8634_s29 + $0x68] sm:$0xf] }
 0x12f   : > { %6060 = vmatpush3.bf16.msra.mxu1 %v1071_v32  ;;  %6061 = vmatprep.mubr.msk.bf16.mxu1 %vm1004_vm10, %v6798_v25  ;;  %v4839_v32 = vrot.slane %v4837_v16, 5  ;;  %v4830_v25 = vld [vmem:[%s7813_s12 + $0xc] sm:$0xf] }
 0x130   : > { %6541 = vmatprep.subr.msk.bf16.mxu1 %vm1011_vm0, %v5682_v38  ;;  %v3106_v21 = vpop.permute.xlu0 %3105  ;;  %v4858_v42 = vshrl.u32 %v4830_v25, 16  ;;  %v4861_v48 = vshll.u32 %v4830_v25, 16  ;;  %v2125_v38 = vshrl.u32 %v7617_v3, 16 }
 0x131   : > { %6199 = vmatprep.mubr.msk.bf16.mxu0 %vm1004_vm10, %v3106_v21  ;;  %v4840_v54 = vor.u32 %v4839_v32, %v4836_v4  ;;  %v6799_v21 = vld [vmem:[%s7329_s18 + $0xc] sm:$0xff]   ;;  %v2128_v4 = vshll.u32 %v7617_v3, 16  ;;  %v4851_v32 = vrot.slane %v4850_v31, 4  ;;  %v2102_v3 = vshrl.u32 %v7603_v24, 16 }
 0x132   : > { %v4860_v25 = vrot.slane %v4858_v42, 4  ;;  %v2127_v42 = vrot.slane %v2125_v38, 5 }
 0x133   : > { %v4841_v58 = vrot.slane %v4840_v54, 4  ;;  %v4856_v31 = vsel %vm7362_vm4, %v4851_v32, %v4855_v11 }
 0x134   : > { %v3108_v16 = vpop.permute.xlu0 %3107 }
 0x135   : > { %6200 = vmatmul.mubr.msk.bf16.vlgmr.msra.gmra.mrb[0].mxu0 %vm1004_vm10, %v3108_v16  ;;  %v4846_v54 = vsel %vm7362_vm4, %v4841_v58, %v4845_v55  ;;  %v4873_v16 = vrot.slane %v4871_v61, 4  ;;  %v2105_v55 = vshll.u32 %v7603_v24, 16 }
 0x136   : > { %6204 = vmatpush3.bf16.msra.mxu0 %v3208_v33  ;;  %6205 = vmatprep.mubr.msk.bf16.mxu0 %vm1004_vm10, %v7419_v40  ;;  %v7949_v33 = vcombine.low %v4846_v54, %v4856_v31  ;;  %v5213_v54 = vrot.slane %v4871_v61, 5 }
 0x137   : > { %6565 = vmatprep.subr.msk.bf16.mxu0 %vm1011_vm0, %v5790_v51  ;;  %v4874_v11 = vor.u32 %v4873_v16, %v4869_v60  ;;  %v2107_v31 = vrot.slane %v2105_v55, 6 }
 0x138   : > { %8653 = vst [vmem:[#allocation39_spill] sm:$0xff] %v7949_v33  ;;  %4953 = vrot.lane.b32.xlu0 %v7949_v33, %s6973_s5  ;;  %v3266_v10 = vpop.permute.xlu0 %3265  ;;  %v2099_v33 = vld [vmem:[%s7426_s1 + $0x8] sm:$0x3] }
 0x139   : > { %v4875_v24 = vrot.slane %v4874_v11, 4  ;;  %v2119_v55 = vshll.u32 %v2099_v33, 16 }
 0x13a   : > { %6062 = vmatmul.mubr.msk.bf16.vlgmr.msra.gmra.mrb[0].mxu1 %vm1004_vm10, %v6799_v21  ;;  %v4863_v21 = vrot.slane %v4861_v48, 5  ;;  %v2130_v48 = vrot.slane %v2128_v4, 6  ;;  %v2104_v4 = vrot.slane %v2102_v3, 5  ;;  %v2116_v3 = vshrl.u32 %v2099_v33, 16  ;;  %v5793_v33 = vld [vmem:[%s8634_s29 + $0x6c] sm:$0xf] }
 0x13b   : > { %6066 = vmatpush3.bf16.msra.mxu1 %v1194_v23  ;;  %v7943_v23 = vld [vmem:[%s7813_s12 + $0x14] sm:$0x1]  ;;  %6067 = vmatprep.mubr.msk.bf16.mxu1 %vm1004_vm10, %v7449_v13 }
 0x13c   : > { %v4864_v58 = vor.u32 %v4863_v21, %v4860_v25  ;;  %v4877_v40 = vshll.u32 %v7943_v23, 16  ;;  %6542 = vmatprep.subr.msk.bf16.mxu1 %vm1011_vm0, %v5687_v6  ;;  %v7956_v13 = vld [vmem:[%s7335_s3] sm:$0xff]   ;;  %v5214_v25 = vrot.slane %v4867_v30, 6  ;;  %v8654_v21 = vshll.u32 %v7544_v5, 16 }
 0x13d   : > { %v2131_v9 = vor.u32 %v2130_v48, %v2127_v42  ;;  %2913 = vrot.lane.b32.xlu0 %v7956_v13, %s6973_s5  ;;  %v8655_v30 = vshrl.u32 %v7544_v5, 16  ;;  %v2108_v48 = vor.u32 %v2107_v31, %v2104_v4  ;;  %v2137_v31 = vrot.slane %v7620_v26, 4 }
 0x13e   : > { %v4865_v32 = vrot.slane %v4864_v58, 4  ;;  %v4879_v28 = vrot.slane %v4877_v40, 5  ;;  %v2111_v38 = vrot.slane %v8654_v21, 6  ;;  %v7964_v40 = vor.u32 %v5214_v25, %v5213_v54  ;;  %v2100_v21 = vld [vmem:[%s7426_s1 + $0x14] sm:$0x3]  ;;  %v7984_v25 = vld [vmem:[%s7335_s3 + $0xc] sm:$0xff]  }
 0x13f   : > { %v2110_v11 = vrot.slane %v8655_v30, 5  ;;  %v2142_v42 = vshll.u32 %v2100_v21, 16  ;;  %v2121_v54 = vrot.slane %v2119_v55, 6  ;;  %v2132_v5 = vrot.slane %v2131_v9, 4  ;;  %v3268_v30 = vpop.permute.xlu1 %3267  ;;  %s959_s3 = sand.u32 1, %s6899_s10  }
 0x140   : > { %v4870_v16 = vsel %vm7362_vm4, %v4865_v32, %v4869_v60  ;;  %v4880_v58 = vsel %vm7362_vm4, %v4875_v24, %v4879_v28  ;;  %v3276_v60 = vsel %vm1011_vm0, %v5790_v51, 0  ;;  %v2139_v28 = vshrl.u32 %v2100_v21, 16  ;;  %v1252_v51 = vpop.permute.xlu0 %1251  ;;  %s5334_s20 = scalar_lea.sflag [#allocation10], %s959_s3 }
 0x141   : > { %v7969_v61 = vcombine.low %v4870_v16, %v4880_v58  ;;  %v2112_v32 = vor.u32 %v2111_v38, %v2110_v11  ;;  %v2118_v24 = vrot.slane %v2116_v3, 5  ;;  %v2144_v16 = vrot.slane %v2142_v42, 6  ;;  %6206 = vmatmul.mubr.msk.bf16.vlgmr.msra.gmra.mrb[0].mxu0 %vm1004_vm10, %v7421_v41  ;;  %v5692_v38 = vld [vmem:[%s8634_s29 + $0x10] sm:$0xf]  ;;  %2915 = vrot.lane.b32.xlu0 %v7984_v25, %s6973_s5 }
 0x142   : > { %v2141_v6 = vrot.slane %v2139_v28, 5  ;;  %v2109_v4 = vrot.slane %v2108_v48, 4  ;;  %6210 = vmatpush3.bf16.msra.mxu0 %v3276_v60  ;;  %6211 = vmatprep.mubr.msk.bf16.mxu0 %vm1004_vm10, %v3266_v10  ;;  %v2136_v3 = vsel %vm7662_vm9, %v2132_v5, %v7620_v26  ;;  %v3394_v28 = vsel %vm1011_vm0, %v5793_v33, 0  ;;  %v5798_v48 = vld [vmem:[%s8634_s29 + $0x70] sm:$0xf] }
 0x143   : > { %4955 = vrot.lane.b32.xlu1 %v7969_v61, %s6973_s5  ;;  %v2122_v9 = vor.u32 %v2121_v54, %v2118_v24  ;;  %6566 = vmatprep.subr.msk.bf16.mxu0 %vm1011_vm0, %v5793_v33  ;;  %v1254_v60 = vpop.permute.xlu1 %1253  ;;  %v5029_v42 = vrot.slane %v7902_v0, 5  ;;  %v5697_v26 = vld [vmem:[%s8634_s29 + $0x14] sm:$0xf]  ;;  %v5032_v5 = vrot.slane %v7907_v20, 5 }
 0x144   : > { %v2145_v58 = vor.u32 %v2144_v16, %v2141_v6  ;;  %v2113_v41 = vsel %vm7662_vm9, %v2109_v4, %v2112_v32  ;;  %v5036_v6 = vrot.slane %v7920_v7, 5  ;;  %v8041_v16 = vld [vmem:[%s7813_s12 + $0xc] sm:$0xe]  ;;  %v5039_v4 = vrot.slane %v7943_v23, 5 }
 0x145   : > { %v5031_v54 = vrot.slane %v5029_v42, 4  ;;  %v3472_v23 = vsel %vm1011_vm0, %v5798_v48, 0 }
 0x146   : > { %6068 = vmatmul.mubr.msk.bf16.vlgmr.msra.gmra.mrb[0].mxu1 %vm1004_vm10, %v7483_v44  ;;  %v2114_v44 = vrot.slane %v2112_v32, 4  ;;  %v2146_v55 = vsel %vm7662_vm9, %v2137_v31, %v2145_v58  ;;  %v8019_v32 = vld [vmem:[%s7813_s12] sm:$0xe]  ;;  %v1425_v31 = vsel %vm1011_vm0, %v5697_v26, 0  ;;  %v5803_v58 = vld [vmem:[%s8634_s29 + $0x74] sm:$0xf] }
 0x147   : > { %6072 = vmatpush3.bf16.msra.mxu1 %v1262_v56  ;;  %6073 = vmatprep.mubr.msk.bf16.mxu1 %vm1004_vm10, %v1252_v51  ;;  %v8009_v21 = vcombine.low %v2136_v3, %v2146_v55  ;;  %v1357_v56 = vsel %vm1011_vm0, %v5692_v38, 0  ;;  %v5876_v24 = vrot.slane %v8019_v32, 9  ;;  %v5033_v51 = vsel %vm7384_vm6, %v5031_v54, %v5032_v5  ;;  %v5806_v55 = vld [vmem:[%s8634_s29 + $0x78] sm:$0xf] }
 0x148   : > { %v2123_v11 = vsel %vm7662_vm9, %v2114_v44, %v2122_v9  ;;  %6543 = vmatprep.subr.msk.bf16.mxu1 %vm1011_vm0, %v5692_v38  ;;  %v5038_v38 = vrot.slane %v5036_v6, 4  ;;  %v1546_v3 = vsel %vm1011_vm0, %v5700_v12, 0  ;;  %v4569_v54 = vshll.u32 %v7737_v29, 16 }
 0x149   : > { %v8002_v10 = vcombine.low %v2113_v41, %v2123_v11  ;;  %v5030_v33 = vsel %vm7384_vm6, %v5876_v24, %v5029_v42  ;;  %v6800_v41 = vld [vmem:[%s7376_s6] sm:$0xff]   ;;  %v3532_v11 = vpop.permute.xlu1 %3531  ;;  %v4592_v42 = vshll.u32 %v7756_v27, 16  ;;  %v4566_v24 = vshrl.u32 %v7737_v29, 16 }
 0x14a   : > { %v8038_v20 = vcombine.low %v5030_v33, %v5033_v51  ;;  %v5040_v7 = vsel %vm7384_vm6, %v5038_v38, %v5039_v4  ;;  %v3664_v33 = vsel %vm1011_vm0, %v5806_v55, 0  ;;  %v5710_v29 = vld [vmem:[%s8634_s29 + $0x20] sm:$0xf]  ;;  %v8656_v38 = vshll.u32 %v7680_v63, 16 }
 0x14c   : > { %5113 = vrot.lane.b32.xlu1 %v8038_v20, %s6973_s5  ;;  %v4575_v4 = vrot.slane %v8656_v38, 6 }
 0x14d   : > { %6212 = vmatmul.mubr.msk.bf16.vlgmr.msra.gmra.mrb[0].mxu0 %vm1004_vm10, %v3268_v30 }
 0x14e   : > { %6216 = vmatpush3.bf16.msra.mxu0 %v3394_v28  ;;  %6217 = vmatprep.mubr.msk.bf16.mxu0 %vm1004_vm10, %v7696_v15  ;;  %v5877_v15 = vrot.slane %v8041_v16, 9  ;;  %v4589_v28 = vshrl.u32 %v7756_v27, 16  ;;  %v5811_v27 = vld [vmem:[%s8634_s29 + $0x7c] sm:$0xf] }
 0x14f   : > { %6567 = vmatprep.subr.msk.bf16.mxu0 %vm1011_vm0, %v5798_v48 }
 0x150   : > { %v5037_v44 = vsel %vm7384_vm6, %v5877_v15, %v5036_v6  ;;  %v4591_v48 = vrot.slane %v4589_v28, 5  ;;  %v4571_v6 = vrot.slane %v4569_v54, 6  ;;  %v6803_v54 = vld [vmem:[%s7426_s1 + $0xc] sm:$0xff]  }
 0x151   : > { %v8051_v9 = vcombine.low %v5037_v44, %v5040_v7  ;;  %v8657_v7 = vshrl.u32 %v7680_v63, 16  ;;  %v1692_v63 = vsel %vm1011_vm0, %v5710_v29, 0 }
 0x152   : > { %6074 = vmatmul.mubr.msk.bf16.vlgmr.msra.gmra.mrb[0].mxu1 %vm1004_vm10, %v1254_v60  ;;  %v6801_v60 = vld [vmem:[%s7376_s6 + $0xc] sm:$0xff]  }
 0x153   : > { %6078 = vmatpush3.bf16.msra.mxu1 %v1357_v56  ;;  %6079 = vmatprep.mubr.msk.bf16.mxu1 %vm1004_vm10, %v7491_v47  ;;  %v3530_v47 = vpop.permute.xlu0 %3529  ;;  %v5705_v56 = vld [vmem:[%s8634_s29 + $0x1c] sm:$0xf] }
 0x154   : > { %6544 = vmatprep.subr.msk.bf16.mxu1 %vm1011_vm0, %v5697_v26  ;;  %5115 = vrot.lane.b32.xlu1 %v8051_v9, %s6973_s5  ;;  %v4594_v26 = vrot.slane %v4592_v42, 6  ;;  %v1624_v5 = vsel %vm1011_vm0, %v5705_v56, 0 }
 0x156   : > { %v4595_v51 = vor.u32 %v4594_v26, %v4591_v48  ;;  %v4601_v48 = vrot.slane %v7725_v17, 4 }
 0x157   : > { %v1415_v30 = vpop.permute.xlu0 %1414 }
 0x158   : > { %v4596_v15 = vrot.slane %v4595_v51, 4 }
 0x159   : > { %6218 = vmatmul.mubr.msk.bf16.vlgmr.msra.gmra.mrb[0].mxu0 %vm1004_vm10, %v7710_v37  ;;  %v3540_v37 = vsel %vm1011_vm0, %v5803_v58, 0 }
 0x15a   : > { %6222 = vmatpush3.bf16.msra.mxu0 %v3472_v23  ;;  %6223 = vmatprep.mubr.msk.bf16.mxu0 %vm1004_vm10, %v6800_v41 }
 0x15b   : > { %6568 = vmatprep.subr.msk.bf16.mxu0 %vm1011_vm0, %v5803_v58  ;;  %v4600_v58 = vsel %vm7662_vm9, %v4596_v15, %v7725_v17 }
 0x15e   : > { %6080 = vmatmul.mubr.msk.bf16.vlgmr.msra.gmra.mrb[0].mxu1 %vm1004_vm10, %v7511_v1  ;;  %v1417_v1 = vpop.permute.xlu1 %1416 }
 0x15f   : > { %6084 = vmatpush3.bf16.msra.mxu1 %v1425_v31  ;;  %6085 = vmatprep.mubr.msk.bf16.mxu1 %vm1004_vm10, %v1415_v30  ;;  %v4574_v31 = vrot.slane %v8657_v7, 5  ;;  %v3722_v30 = vpop.permute.xlu0 %3721  ;;  %v5718_v7 = vld [vmem:[%s8634_s29 + $0x28] sm:$0xf] }
 0x160   : > { %6545 = vmatprep.subr.msk.bf16.mxu1 %vm1011_vm0, %v5700_v12 }
 0x161   : > { %v4576_v41 = vor.u32 %v4575_v4, %v4574_v31  ;;  %v5821_v4 = vld [vmem:[%s8634_s29 + $0x84] sm:$0xf]  ;;  %v2721_v31 = vshll.u32 %v7824_v2, 16 }
 0x163   : > { %v4578_v28 = vrot.slane %v4576_v41, 4 }
 0x165   : > { %6224 = vmatmul.mubr.msk.bf16.vlgmr.msra.gmra.mrb[0].mxu0 %vm1004_vm10, %v6801_v60  ;;  %v3732_v60 = vsel %vm1011_vm0, %v5811_v27, 0 }
 0x166   : > { %6228 = vmatpush3.bf16.msra.mxu0 %v3540_v37  ;;  %6229 = vmatprep.mubr.msk.bf16.mxu0 %vm1004_vm10, %v3530_v47  ;;  %v4563_v47 = vld [vmem:[%s7488_s8 + $0x8] sm:$0x3] }
 0x167   : > { %6569 = vmatprep.subr.msk.bf16.mxu0 %vm1011_vm0, %v5806_v55  ;;  %v4583_v23 = vshll.u32 %v4563_v47, 16 }
 0x16a   : > { %6086 = vmatmul.mubr.msk.bf16.vlgmr.msra.gmra.mrb[0].mxu1 %vm1004_vm10, %v1417_v1 }
 0x16b   : > { %6090 = vmatpush3.bf16.msra.mxu1 %v1546_v3  ;;  %6091 = vmatprep.mubr.msk.bf16.mxu1 %vm1004_vm10, %v7762_v43  ;;  %v4568_v43 = vrot.slane %v4566_v24, 5  ;;  %v4585_v3 = vrot.slane %v4583_v23, 6 }
 0x16c   : > { %6546 = vmatprep.subr.msk.bf16.mxu1 %vm1011_vm0, %v5705_v56 }
 0x16d   : > { %v4572_v44 = vor.u32 %v4571_v6, %v4568_v43 }
 0x16f   : > { %v4573_v12 = vrot.slane %v4572_v44, 4  ;;  %v2744_v44 = vshll.u32 %v7828_v35, 16 }
 0x171   : > { %6230 = vmatmul.mubr.msk.bf16.vlgmr.msra.gmra.mrb[0].mxu0 %vm1004_vm10, %v3532_v11  ;;  %v4564_v11 = vld [vmem:[%s7488_s8 + $0x14] sm:$0x3]  ;;  %v4577_v56 = vsel %vm7662_vm9, %v4573_v12, %v4576_v41  ;;  %v2746_v23 = vrot.slane %v2744_v44, 6  ;;  %v2723_v41 = vrot.slane %v2721_v31, 6 }
 0x172   : > { %6234 = vmatpush3.bf16.msra.mxu0 %v3664_v33  ;;  %6235 = vmatprep.mubr.msk.bf16.mxu0 %vm1004_vm10, %v7534_v52  ;;  %v4580_v52 = vshrl.u32 %v4563_v47, 16  ;;  %v4603_v37 = vshrl.u32 %v4564_v11, 16  ;;  %v4606_v55 = vshll.u32 %v4564_v11, 16  ;;  %v5713_v33 = vld [vmem:[%s8634_s29 + $0x24] sm:$0xf]  ;;  %v2741_v47 = vshrl.u32 %v7828_v35, 16 }
 0x173   : > { %6570 = vmatprep.subr.msk.bf16.mxu0 %vm1011_vm0, %v5811_v27  ;;  %v1682_v27 = vpop.permute.xlu0 %1681  ;;  %v1816_v15 = vsel %vm1011_vm0, %v5713_v33, 0  ;;  %v2718_v35 = vshrl.u32 %v7824_v2, 16  ;;  %v2715_v11 = vld [vmem:[%s7605_s0 + $0x8] sm:$0x3]  ;;  %v3892_v2 = vsel %vm1011_vm0, %v5821_v4, 0 }
 0x174   : > { %v4582_v1 = vrot.slane %v4580_v52, 5  ;;  %v4605_v26 = vrot.slane %v4603_v37, 5  ;;  %v4608_v24 = vrot.slane %v4606_v55, 6  ;;  %v2743_v52 = vrot.slane %v2741_v47, 5 }
 0x175   : > { %v2720_v12 = vrot.slane %v2718_v35, 5  ;;  %v2735_v55 = vshll.u32 %v2715_v11, 16 }
 0x176   : > { %6092 = vmatmul.mubr.msk.bf16.vlgmr.msra.gmra.mrb[0].mxu1 %vm1004_vm10, %v7775_v53  ;;  %v6802_v53 = vld [vmem:[%s7426_s1] sm:$0xff]   ;;  %v4586_v42 = vor.u32 %v4585_v3, %v4582_v1  ;;  %v4609_v51 = vor.u32 %v4608_v24, %v4605_v26  ;;  %v8659_v3 = vshrl.u32 %v7773_v36, 16 }
 0x177   : > { %6096 = vmatpush3.bf16.msra.mxu1 %v1624_v5  ;;  %6097 = vmatprep.mubr.msk.bf16.mxu1 %vm1004_vm10, %v6802_v53  ;;  %v5816_v5 = vld [vmem:[%s8634_s29 + $0x80] sm:$0xf]  ;;  %v1684_v6 = vpop.permute.xlu0 %1683  ;;  %v3724_v53 = vpop.permute.xlu1 %3723  ;;  %v2737_v24 = vrot.slane %v2735_v55, 6  ;;  %v5205_v55 = vshrl.u32 %v8041_v16, 16 }
 0x178   : > { %6547 = vmatprep.subr.msk.bf16.mxu1 %vm1011_vm0, %v5710_v29  ;;  %v4587_v17 = vsel %vm7662_vm9, %v4578_v28, %v4586_v42  ;;  %v3824_v38 = vsel %vm1011_vm0, %v5816_v5, 0  ;;  %v2726_v37 = vrot.slane %v8659_v3, 5  ;;  %v2724_v42 = vor.u32 %v2723_v41, %v2720_v12  ;;  %v5834_v41 = vld [vmem:[%s8634_s29 + $0x90] sm:$0xf]  ;;  %v5837_v3 = vld [vmem:[%s8634_s29 + $0x94] sm:$0xf] }
 0x179   : > { %v8136_v29 = vcombine.low %v4577_v56, %v4587_v17 }
 0x17b   : > { %v3882_v1 = vpop.permute.xlu1 %3881 }
 0x17d   : > { %6236 = vmatmul.mubr.msk.bf16.vlgmr.msra.gmra.mrb[0].mxu0 %vm1004_vm10, %v7554_v14  ;;  %v4610_v14 = vsel %vm7662_vm9, %v4601_v48, %v4609_v51  ;;  %v5723_v51 = vld [vmem:[%s8634_s29 + $0x2c] sm:$0xf] }
 0x17e   : > { %6240 = vmatpush3.bf16.msra.mxu0 %v3732_v60  ;;  %6241 = vmatprep.mubr.msk.bf16.mxu0 %vm1004_vm10, %v3722_v30  ;;  %v8143_v43 = vcombine.low %v4600_v58, %v4610_v14  ;;  %v8658_v58 = vshll.u32 %v7773_v36, 16  ;;  %v2716_v60 = vld [vmem:[%s7605_s0 + $0x14] sm:$0x3]  ;;  %v5824_v36 = vld [vmem:[%s8634_s29 + $0x88] sm:$0xf]  ;;  %v1976_v31 = vsel %vm1011_vm0, %v5723_v51, 0 }
 0x17f   : > { %6571 = vmatprep.subr.msk.bf16.mxu0 %vm1011_vm0, %v5816_v5  ;;  %v2755_v56 = vshrl.u32 %v2716_v60, 16  ;;  %v2758_v28 = vshll.u32 %v2716_v60, 16  ;;  %v1874_v5 = vpop.permute.xlu0 %1873  ;;  %v5208_v60 = vshll.u32 %v8041_v16, 16  ;;  %v5741_v16 = vld [vmem:[%s8634_s29 + $0x3c] sm:$0xf] }
 0x180   : > { %v2727_v30 = vrot.slane %v8658_v58, 6 }
 0x181   : > { %v2760_v17 = vrot.slane %v2758_v28, 6  ;;  %v5182_v28 = vshrl.u32 %v8019_v32, 16 }
 0x182   : > { %6098 = vmatmul.mubr.msk.bf16.vlgmr.msra.gmra.mrb[0].mxu1 %vm1004_vm10, %v6803_v54  ;;  %v2728_v48 = vor.u32 %v2727_v30, %v2726_v37  ;;  %v6805_v37 = vld [vmem:[%s7488_s8 + $0xc] sm:$0xff]  }
 0x183   : > { %6102 = vmatpush3.bf16.msra.mxu1 %v1692_v63  ;;  %6103 = vmatprep.mubr.msk.bf16.mxu1 %vm1004_vm10, %v1682_v27  ;;  %v1884_v63 = vsel %vm1011_vm0, %v5718_v7, 0  ;;  %v2725_v27 = vrot.slane %v2724_v42, 4  ;;  %v4146_v58 = vpop.permute.xlu0 %4145  ;;  %v5185_v42 = vshll.u32 %v8019_v32, 16  ;;  %v8660_v32 = vld [vmem:[#allocation33_spill] sm:$0xff] }
 0x184   : > { %6548 = vmatprep.subr.msk.bf16.mxu1 %vm1011_vm0, %v5713_v33  ;;  %v2757_v33 = vrot.slane %v2755_v56, 5  ;;  %v2730_v14 = vrot.slane %v2728_v48, 4 }
 0x189   : > { %6242 = vmatmul.mubr.msk.bf16.vlgmr.msra.gmra.mrb[0].mxu0 %vm1004_vm10, %v3724_v53  ;;  %v2761_v53 = vor.u32 %v2760_v17, %v2757_v33  ;;  %v5179_v17 = vld [vmem:[%s7813_s12 + $0x8] sm:$0x3] }
 0x18a   : > { %6246 = vmatpush3.bf16.msra.mxu0 %v3824_v38  ;;  %6247 = vmatprep.mubr.msk.bf16.mxu0 %vm1004_vm10, %v7560_v19  ;;  %v2747_v19 = vor.u32 %v2746_v23, %v2743_v52  ;;  %v4010_v52 = vsel %vm1011_vm0, %v5824_v36, 0  ;;  %v5829_v23 = vld [vmem:[%s8634_s29 + $0x8c] sm:$0xf] }
 0x18b   : > { %6572 = vmatprep.subr.msk.bf16.mxu0 %vm1011_vm0, %v5821_v4  ;;  %v4088_v12 = vsel %vm1011_vm0, %v5829_v23, 0 }
 0x18c   : > { %v2748_v54 = vrot.slane %v2747_v19, 4  ;;  %v6804_v19 = vld [vmem:[%s7488_s8] sm:$0xff]  }
 0x18e   : > { %6104 = vmatmul.mubr.msk.bf16.vlgmr.msra.gmra.mrb[0].mxu1 %vm1004_vm10, %v1684_v6  ;;  %v2752_v47 = vsel %vm7662_vm9, %v2748_v54, %v7821_v18  ;;  %v5187_v54 = vrot.slane %v5185_v42, 6 }
 0x18f   : > { %6108 = vmatpush3.bf16.msra.mxu1 %v1816_v15  ;;  %6109 = vmatprep.mubr.msk.bf16.mxu1 %vm1004_vm10, %v7614_v62  ;;  %v2732_v62 = vshrl.u32 %v2715_v11, 16  ;;  %v3884_v15 = vpop.permute.xlu1 %3883 }
 0x190   : > { %6549 = vmatprep.subr.msk.bf16.mxu1 %vm1011_vm0, %v5718_v7 }
 0x191   : > { %v2734_v26 = vrot.slane %v2732_v62, 5  ;;  %v5736_v62 = vld [vmem:[%s8634_s29 + $0x38] sm:$0xf] }
 0x192   : > { %v2240_v56 = vsel %vm1011_vm0, %v5736_v62, 0 }
 0x193   : > { %v2738_v6 = vor.u32 %v2737_v24, %v2734_v26  ;;  %v1876_v35 = vpop.permute.xlu1 %1875  ;;  %v4280_v26 = vsel %vm1011_vm0, %v5837_v3, 0  ;;  %v5184_v24 = vrot.slane %v5182_v28, 5  ;;  %v8664_v28 = vld [vmem:[#allocation35_spill] sm:$0xff] }
 0x195   : > { %6248 = vmatmul.mubr.msk.bf16.vlgmr.msra.gmra.mrb[0].mxu0 %vm1004_vm10, %v7590_v57  ;;  %v2729_v57 = vsel %vm7662_vm9, %v2725_v27, %v2728_v48  ;;  %v2739_v38 = vsel %vm7662_vm9, %v2730_v14, %v2738_v6  ;;  %v8662_v27 = vshrl.u32 %v7902_v0, 16  ;;  %v5180_v6 = vld [vmem:[%s7813_s12 + $0x14] sm:$0x3] }
 0x196   : > { %6252 = vmatpush3.bf16.msra.mxu0 %v3892_v2  ;;  %6253 = vmatprep.mubr.msk.bf16.mxu0 %vm1004_vm10, %v3882_v1  ;;  %v8192_v4 = vcombine.low %v2729_v57, %v2739_v38  ;;  %v5207_v2 = vrot.slane %v5205_v55, 5  ;;  %v5219_v57 = vshrl.u32 %v5180_v6, 16  ;;  %v5222_v38 = vshll.u32 %v5180_v6, 16  ;;  %v6808_v6 = vld [vmem:[%s7813_s12] sm:$0xff]   ;;  %s5674_s12 = sshll.u32 %s959_s3, 4 }
 0x197   : > { %6573 = vmatprep.subr.msk.bf16.mxu0 %vm1011_vm0, %v5824_v36  ;;  %v4148_v11 = vpop.permute.xlu1 %4147  ;;  %v5190_v14 = vrot.slane %v8662_v27, 5  ;;  %v8666_v27 = vld [vmem:[#allocation38_spill] sm:$0xff]  ;;  %s961_s22 = scalar_lea.vmem [#allocation9], %s5674_s12 }
 0x19a   : > { %6110 = vmatmul.mubr.msk.bf16.vlgmr.msra.gmra.mrb[0].mxu1 %vm1004_vm10, %v7640_v34  ;;  %v2753_v34 = vrot.slane %v7821_v18, 4  ;;  %v5728_v18 = vld [vmem:[%s8634_s29 + $0x30] sm:$0xf] }
 0x19b   : > { %6114 = vmatpush3.bf16.msra.mxu1 %v1884_v63  ;;  %6115 = vmatprep.mubr.msk.bf16.mxu1 %vm1004_vm10, %v1874_v5  ;;  %v2044_v30 = vsel %vm1011_vm0, %v5728_v18, 0  ;;  %v5210_v63 = vrot.slane %v5208_v60, 6  ;;  %v8661_v5 = vshll.u32 %v7902_v0, 16  ;;  %v5224_v0 = vrot.slane %v5222_v38, 6  ;;  %v8667_v38 = vld [vmem:[#allocation37_spill] sm:$0xff] }
 0x19c   : > { %6550 = vmatprep.subr.msk.bf16.mxu1 %vm1011_vm0, %v5723_v51  ;;  %v2762_v44 = vsel %vm7662_vm9, %v2753_v34, %v2761_v53  ;;  %v5188_v51 = vor.u32 %v5187_v54, %v5184_v24  ;;  %v5196_v53 = vshrl.u32 %v5179_v17, 16 }
 0x19d   : > { %v8199_v7 = vcombine.low %v2752_v47, %v2762_v44  ;;  %v5211_v48 = vor.u32 %v5210_v63, %v5207_v2  ;;  %v5191_v33 = vrot.slane %v8661_v5, 6  ;;  %v5852_v63 = vld [vmem:[%s8634_s29 + $0xa0] sm:$0xf]  ;;  %v5759_v5 = vld [vmem:[%s8634_s29 + $0x4c] sm:$0xf] }
 0x19e   : > { %v5189_v44 = vrot.slane %v5188_v51, 4 }
 0x19f   : > { %v5212_v36 = vrot.slane %v5211_v48, 4 }
 0x1a1   : > { %6254 = vmatmul.mubr.msk.bf16.vlgmr.msra.gmra.mrb[0].mxu0 %vm1004_vm10, %v3884_v15  ;;  %v5216_v34 = vsel %vm7662_vm9, %v5212_v36, %v7964_v40  ;;  %v5199_v15 = vshll.u32 %v5179_v17, 16  ;;  %v2660_v17 = vsel %vm1011_vm0, %v5759_v5, 0 }
 0x1a2   : > { %6258 = vmatpush3.bf16.msra.mxu0 %v4010_v52  ;;  %6259 = vmatprep.mubr.msk.bf16.mxu0 %vm1004_vm10, %v7894_v59  ;;  %v2034_v59 = vpop.permute.xlu0 %2033  ;;  %v5198_v52 = vrot.slane %v5196_v53, 5 }
 0x1a3   : > { %6574 = vmatprep.subr.msk.bf16.mxu0 %vm1011_vm0, %v5829_v23  ;;  %v5201_v23 = vrot.slane %v5199_v15, 6 }
 0x1a6   : > { %6116 = vmatmul.mubr.msk.bf16.vlgmr.msra.gmra.mrb[0].mxu1 %vm1004_vm10, %v1876_v35  ;;  %v4338_v47 = vpop.permute.xlu0 %4337  ;;  %v5192_v35 = vor.u32 %v5191_v33, %v5190_v14  ;;  %v5865_v14 = vld [vmem:[%s8634_s29 + $0xac] sm:$0xf] }
 0x1a7   : > { %6120 = vmatpush3.bf16.msra.mxu1 %v1976_v31  ;;  %6121 = vmatprep.mubr.msk.bf16.mxu1 %vm1004_vm10, %v7653_v46  ;;  %v5731_v46 = vld [vmem:[%s8634_s29 + $0x34] sm:$0xf]  ;;  %v5217_v31 = vrot.slane %v7964_v40, 4  ;;  %v5847_v40 = vld [vmem:[%s8634_s29 + $0x9c] sm:$0xf] }
 0x1a8   : > { %6551 = vmatprep.subr.msk.bf16.mxu1 %vm1011_vm0, %v5728_v18  ;;  %v2162_v1 = vsel %vm1011_vm0, %v5731_v46, 0  ;;  %v5221_v18 = vrot.slane %v5219_v57, 5  ;;  %v4440_v8 = vsel %vm1011_vm0, %v5847_v40, 0  ;;  %v5868_v57 = vld [vmem:[%s8634_s29 + $0xb0] sm:$0xf] }
 0x1ad   : > { %6260 = vmatmul.mubr.msk.bf16.vlgmr.msra.gmra.mrb[0].mxu0 %vm1004_vm10, %v7898_v39  ;;  %v4156_v39 = vsel %vm1011_vm0, %v5834_v41, 0 }
 0x1ae   : > { %6264 = vmatpush3.bf16.msra.mxu0 %v4088_v12  ;;  %6265 = vmatprep.mubr.msk.bf16.mxu0 %vm1004_vm10, %v6804_v19  ;;  %v5194_v12 = vrot.slane %v5192_v35, 4  ;;  %v6807_v19 = vld [vmem:[%s7605_s0 + $0xc] sm:$0xff]  }
 0x1af   : > { %6575 = vmatprep.subr.msk.bf16.mxu0 %vm1011_vm0, %v5834_v41 }
 0x1b2   : > { %6122 = vmatmul.mubr.msk.bf16.vlgmr.msra.gmra.mrb[0].mxu1 %vm1004_vm10, %v7677_v22  ;;  %v2036_v22 = vpop.permute.xlu1 %2035 }
 0x1b3   : > { %6126 = vmatpush3.bf16.msra.mxu1 %v2044_v30  ;;  %6127 = vmatprep.mubr.msk.bf16.mxu1 %vm1004_vm10, %v2034_v59  ;;  %v5193_v30 = vsel %vm7662_vm9, %v5189_v44, %v5192_v35  ;;  %v5202_v59 = vor.u32 %v5201_v23, %v5198_v52  ;;  %v4896_v35 = vsel %vm1011_vm0, %v5868_v57, 0  ;;  %v8668_v52 = vld [vmem:[#allocation39_spill] sm:$0xff] }
 0x1b4   : > { %6552 = vmatprep.subr.msk.bf16.mxu1 %vm1011_vm0, %v5731_v46  ;;  %v5225_v46 = vor.u32 %v5224_v0, %v5221_v18  ;;  %v5878_v0 = vld [vmem:[%s8634_s29 + $0xb8] sm:$0xf] }
 0x1b6   : > { %v4340_v60 = vpop.permute.xlu1 %4339 }
 0x1b9   : > { %6266 = vmatmul.mubr.msk.bf16.vlgmr.msra.gmra.mrb[0].mxu0 %vm1004_vm10, %v6805_v37 }
 0x1ba   : > { %6270 = vmatpush3.bf16.msra.mxu0 %v4156_v39  ;;  %6271 = vmatprep.mubr.msk.bf16.mxu0 %vm1004_vm10, %v4146_v58  ;;  %v2308_v58 = vsel %vm1011_vm0, %v5741_v16, 0  ;;  %v5226_v39 = vsel %vm7662_vm9, %v5217_v31, %v5225_v46  ;;  %v4498_v42 = vpop.permute.xlu1 %4497  ;;  %v5873_v31 = vld [vmem:[%s8634_s29 + $0xb4] sm:$0xf] }
 0x1bb   : > { %6576 = vmatprep.subr.msk.bf16.mxu0 %vm1011_vm0, %v5837_v3  ;;  %v2298_v3 = vpop.permute.xlu0 %2297  ;;  %v4964_v18 = vsel %vm1011_vm0, %v5873_v31, 0 }
 0x1be   : > { %6128 = vmatmul.mubr.msk.bf16.vlgmr.msra.gmra.mrb[0].mxu1 %vm1004_vm10, %v2036_v22  ;;  %v5744_v22 = vld [vmem:[%s8634_s29 + $0x40] sm:$0xf]  ;;  %v4500_v24 = vpop.permute.xlu1 %4499 }
 0x1bf   : > { %6132 = vmatpush3.bf16.msra.mxu1 %v2162_v1  ;;  %6133 = vmatprep.mubr.msk.bf16.mxu1 %vm1004_vm10, %v8002_v10  ;;  %v5842_v10 = vld [vmem:[%s8634_s29 + $0x98] sm:$0xf]  ;;  %v5203_v1 = vsel %vm7662_vm9, %v5194_v12, %v5202_v59  ;;  %v2300_v55 = vpop.permute.xlu0 %2299  ;;  %v2432_v2 = vsel %vm1011_vm0, %v5744_v22, 0  ;;  %v8669_v59 = vld [vmem:[#allocation31_spill] sm:$0xff] }
 0x1c0   : > { %6553 = vmatprep.subr.msk.bf16.mxu1 %vm1011_vm0, %v5736_v62  ;;  %v4348_v41 = vsel %vm1011_vm0, %v5842_v10, 0  ;;  %v8300_v37 = vcombine.low %v5193_v30, %v5203_v1  ;;  %v8302_v62 = vcombine.low %v5216_v34, %v5226_v39 }
 0x1c5   : > { %6272 = vmatmul.mubr.msk.bf16.vlgmr.msra.gmra.mrb[0].mxu0 %vm1004_vm10, %v4148_v11  ;;  %v8663_v11 = vld [vmem:[#allocation34_spill] sm:$0xff] }
 0x1c6   : > { %6276 = vmatpush3.bf16.msra.mxu0 %v4280_v26  ;;  %6277 = vmatprep.mubr.msk.bf16.mxu0 %vm1004_vm10, %v8660_v32  ;;  %v4508_v26 = vsel %vm1011_vm0, %v5852_v63, 0  ;;  %v8665_v32 = vld [vmem:[#allocation36_spill] sm:$0xff] }
 0x1c7   : > { %6577 = vmatprep.subr.msk.bf16.mxu0 %vm1011_vm0, %v5842_v10  ;;  %v5855_v10 = vld [vmem:[%s8634_s29 + $0xa4] sm:$0xf] }
 0x1c8   : > { %v4626_v36 = vsel %vm1011_vm0, %v5855_v10, 0 }
 0x1ca   : > { %6134 = vmatmul.mubr.msk.bf16.vlgmr.msra.gmra.mrb[0].mxu1 %vm1004_vm10, %v8009_v21  ;;  %v6806_v21 = vld [vmem:[%s7605_s0] sm:$0xff]   ;;  %s8671_s0 = sld [smem:[#allocation48_spill]] }
 0x1cb   : > { %6138 = vmatpush3.bf16.msra.mxu1 %v2240_v56  ;;  %6139 = vmatprep.mubr.msk.bf16.mxu1 %vm1004_vm10, %v6806_v21  ;;  %v5749_v56 = vld [vmem:[%s8634_s29 + $0x44] sm:$0xf]  ;;  %v5860_v21 = vld [vmem:[%s8634_s29 + $0xa8] sm:$0xf] }
 0x1cc   : > { %6554 = vmatprep.subr.msk.bf16.mxu1 %vm1011_vm0, %v5741_v16  ;;  %v2500_v48 = vsel %vm1011_vm0, %v5749_v56, 0  ;;  %v2490_v16 = vpop.permute.xlu0 %2489  ;;  %v4704_v51 = vsel %vm1011_vm0, %v5860_v21, 0 }
 0x1d0   : > { %v4762_v33 = vpop.permute.xlu0 %4761 }
 0x1d1   : > { %6278 = vmatmul.mubr.msk.bf16.vlgmr.msra.gmra.mrb[0].mxu0 %vm1004_vm10, %v8663_v11  ;;  %v5886_v11 = vld [vmem:[%s8634_s29 + $0xc0] sm:$0xf] }
 0x1d2   : > { %6282 = vmatpush3.bf16.msra.mxu0 %v4348_v41  ;;  %6283 = vmatprep.mubr.msk.bf16.mxu0 %vm1004_vm10, %v4338_v47  ;;  %v5767_v47 = vld [vmem:[%s8634_s29 + $0x54] sm:$0xf]  ;;  %v5883_v41 = vld [vmem:[%s8634_s29 + $0xbc] sm:$0xf] }
 0x1d3   : > { %6578 = vmatprep.subr.msk.bf16.mxu0 %vm1011_vm0, %v5847_v40  ;;  %v2856_v44 = vsel %vm1011_vm0, %v5767_v47, 0  ;;  %v5124_v46 = vsel %vm1011_vm0, %v5883_v41, 0  ;;  %v8670_v40 = vld [vmem:[#allocation32_spill] sm:$0xff] }
 0x1d6   : > { %6140 = vmatmul.mubr.msk.bf16.vlgmr.msra.gmra.mrb[0].mxu1 %vm1004_vm10, %v6807_v19 }
 0x1d7   : > { %6144 = vmatpush3.bf16.msra.mxu1 %v2308_v58  ;;  %6145 = vmatprep.mubr.msk.bf16.mxu1 %vm1004_vm10, %v2298_v3 }
 0x1d8   : > { %6555 = vmatprep.subr.msk.bf16.mxu1 %vm1011_vm0, %v5744_v22  ;;  %v5242_v22 = vsel %vm1011_vm0, %v5886_v11, 0 }
 0x1dd   : > { %6284 = vmatmul.mubr.msk.bf16.vlgmr.msra.gmra.mrb[0].mxu0 %vm1004_vm10, %v4340_v60  ;;  %v5891_v60 = vld [vmem:[%s8671_s0] ss:$0 sm:$0xff] }
 0x1de   : > { %6288 = vmatpush3.bf16.msra.mxu0 %v4440_v8  ;;  %6289 = vmatprep.mubr.msk.bf16.mxu0 %vm1004_vm10, %v8664_v28 }
 0x1df   : > { %6579 = vmatprep.subr.msk.bf16.mxu0 %vm1011_vm0, %v5852_v63 }
 0x1e2   : > { %6146 = vmatmul.mubr.msk.bf16.vlgmr.msra.gmra.mrb[0].mxu1 %vm1004_vm10, %v2300_v55 }
 0x1e3   : > { %6150 = vmatpush3.bf16.msra.mxu1 %v2432_v2  ;;  %6151 = vmatprep.mubr.msk.bf16.mxu1 %vm1004_vm10, %v7819_v50  ;;  %v5754_v50 = vld [vmem:[%s8634_s29 + $0x48] sm:$0xf] }
 0x1e4   : > { %6556 = vmatprep.subr.msk.bf16.mxu1 %vm1011_vm0, %v5749_v56  ;;  %v2592_v54 = vsel %vm1011_vm0, %v5754_v50, 0 }
 0x1e9   : > { %6290 = vmatmul.mubr.msk.bf16.vlgmr.msra.gmra.mrb[0].mxu0 %vm1004_vm10, %v8665_v32 }
 0x1ea   : > { %6294 = vmatpush3.bf16.msra.mxu0 %v4508_v26  ;;  %6295 = vmatprep.mubr.msk.bf16.mxu0 %vm1004_vm10, %v4498_v42 }
 0x1eb   : > { %6580 = vmatprep.subr.msk.bf16.mxu0 %vm1011_vm0, %v5855_v10 }
 0x1ee   : > { %6152 = vmatmul.mubr.msk.bf16.vlgmr.msra.gmra.mrb[0].mxu1 %vm1004_vm10, %v7845_v49  ;;  %v2492_v49 = vpop.permute.xlu1 %2491 }
 0x1ef   : > { %6156 = vmatpush3.bf16.msra.mxu1 %v2500_v48  ;;  %6157 = vmatprep.mubr.msk.bf16.mxu1 %vm1004_vm10, %v2490_v16 }
 0x1f0   : > { %6557 = vmatprep.subr.msk.bf16.mxu1 %vm1011_vm0, %v5754_v50 }
 0x1f2   : > { %v4764_v34 = vpop.permute.xlu1 %4763 }
 0x1f5   : > { %6296 = vmatmul.mubr.msk.bf16.vlgmr.msra.gmra.mrb[0].mxu0 %vm1004_vm10, %v4500_v24 }
 0x1f6   : > { %6300 = vmatpush3.bf16.msra.mxu0 %v4626_v36  ;;  %6301 = vmatprep.mubr.msk.bf16.mxu0 %vm1004_vm10, %v8136_v29  ;;  %v2650_v29 = vpop.permute.xlu0 %2649  ;;  %v2652_v53 = vpop.permute.xlu1 %2651 }
 0x1f7   : > { %6581 = vmatprep.subr.msk.bf16.mxu0 %vm1011_vm0, %v5860_v21 }
 0x1fa   : > { %6158 = vmatmul.mubr.msk.bf16.vlgmr.msra.gmra.mrb[0].mxu1 %vm1004_vm10, %v2492_v49  ;;  %v4956_v30 = vpop.permute.xlu1 %4955 }
 0x1fb   : > { %6162 = vmatpush3.bf16.msra.mxu1 %v2592_v54  ;;  %6163 = vmatprep.mubr.msk.bf16.mxu1 %vm1004_vm10, %v7856_v45  ;;  %v5762_v45 = vld [vmem:[%s8634_s29 + $0x50] sm:$0xf] }
 0x1fc   : > { %6558 = vmatprep.subr.msk.bf16.mxu1 %vm1011_vm0, %v5759_v5  ;;  %v2778_v15 = vsel %vm1011_vm0, %v5762_v45, 0 }
 0x1fe   : > { %v5114_v19 = vpop.permute.xlu1 %5113 }
 0x201   : > { %6302 = vmatmul.mubr.msk.bf16.vlgmr.msra.gmra.mrb[0].mxu0 %vm1004_vm10, %v8143_v43  ;;  %v4772_v43 = vsel %vm1011_vm0, %v5865_v14, 0 }
 0x202   : > { %6306 = vmatpush3.bf16.msra.mxu0 %v4704_v51  ;;  %6307 = vmatprep.mubr.msk.bf16.mxu0 %vm1004_vm10, %v6808_v6 }
 0x203   : > { %6582 = vmatprep.subr.msk.bf16.mxu0 %vm1011_vm0, %v5865_v14 }
 0x206   : > { %6164 = vmatmul.mubr.msk.bf16.vlgmr.msra.gmra.mrb[0].mxu1 %vm1004_vm10, %v8666_v27 }
 0x207   : > { %6168 = vmatpush3.bf16.msra.mxu1 %v2660_v17  ;;  %6169 = vmatprep.mubr.msk.bf16.mxu1 %vm1004_vm10, %v2650_v29 }
 0x208   : > { %6559 = vmatprep.subr.msk.bf16.mxu1 %vm1011_vm0, %v5762_v45 }
 0x20d   : > { %6308 = vmatmul.mubr.msk.bf16.vlgmr.msra.gmra.mrb[0].mxu0 %vm1004_vm10, %v8667_v38 }
 0x20e   : > { %6312 = vmatpush3.bf16.msra.mxu0 %v4772_v43  ;;  %6313 = vmatprep.mubr.msk.bf16.mxu0 %vm1004_vm10, %v4762_v33 }
 0x20f   : > { %6583 = vmatprep.subr.msk.bf16.mxu0 %vm1011_vm0, %v5868_v57 }
 0x212   : > { %6170 = vmatmul.mubr.msk.bf16.vlgmr.msra.gmra.mrb[0].mxu1 %vm1004_vm10, %v2652_v53 }
 0x213   : > { %6174 = vmatpush3.bf16.msra.mxu1 %v2778_v15  ;;  %6175 = vmatprep.mubr.msk.bf16.mxu1 %vm1004_vm10, %v8192_v4  ;;  %v5772_v4 = vld [vmem:[%s8634_s29 + $0x58] sm:$0xf] }
 0x214   : > { %6560 = vmatprep.subr.msk.bf16.mxu1 %vm1011_vm0, %v5767_v47  ;;  %v2924_v23 = vsel %vm1011_vm0, %v5772_v4, 0 }
 0x219   : > { %6314 = vmatmul.mubr.msk.bf16.vlgmr.msra.gmra.mrb[0].mxu0 %vm1004_vm10, %v4764_v34 }
 0x21a   : > { %6318 = vmatpush3.bf16.msra.mxu0 %v4896_v35  ;;  %6319 = vmatprep.mubr.msk.bf16.mxu0 %vm1004_vm10, %v8668_v52 }
 0x21b   : > { %6584 = vmatprep.subr.msk.bf16.mxu0 %vm1011_vm0, %v5873_v31 }
 0x21e   : > { %6176 = vmatmul.mubr.msk.bf16.vlgmr.msra.gmra.mrb[0].mxu1 %vm1004_vm10, %v8199_v7  ;;  %v4954_v7 = vpop.permute.xlu0 %4953 }
 0x21f   : > { %6180 = vmatpush3.bf16.msra.mxu1 %v2856_v44  ;;  %6181 = vmatprep.mubr.msk.bf16.mxu1 %vm1004_vm10, %v7956_v13  ;;  %v5775_v13 = vld [vmem:[%s8634_s29 + $0x5c] sm:$0xf] }
 0x220   : > { %6561 = vmatprep.subr.msk.bf16.mxu1 %vm1011_vm0, %v5772_v4  ;;  %v3048_v12 = vsel %vm1011_vm0, %v5775_v13, 0 }
 0x222   : > { %v2914_v58 = vpop.permute.xlu0 %2913 }
 0x225   : > { %6320 = vmatmul.mubr.msk.bf16.vlgmr.msra.gmra.mrb[0].mxu0 %vm1004_vm10, %v7969_v61  ;;  %v5056_v61 = vsel %vm1011_vm0, %v5878_v0, 0 }
 0x226   : > { %6324 = vmatpush3.bf16.msra.mxu0 %v4964_v18  ;;  %6325 = vmatprep.mubr.msk.bf16.mxu0 %vm1004_vm10, %v4954_v7 }
 0x227   : > { %6585 = vmatprep.subr.msk.bf16.mxu0 %vm1011_vm0, %v5878_v0 }
 0x22a   : > { %6182 = vmatmul.mubr.msk.bf16.vlgmr.msra.gmra.mrb[0].mxu1 %vm1004_vm10, %v7984_v25  ;;  %v2916_v25 = vpop.permute.xlu0 %2915 }
 0x22b   : > { %6186 = vmatpush3.bf16.msra.mxu1 %v2924_v23  ;;  %6187 = vmatprep.mubr.msk.bf16.mxu1 %vm1004_vm10, %v2914_v58 }
 0x22c   : > { %6562 = vmatprep.subr.msk.bf16.mxu1 %vm1011_vm0, %v5775_v13 }
 0x231   : > { %6326 = vmatmul.mubr.msk.bf16.vlgmr.msra.gmra.mrb[0].mxu0 %vm1004_vm10, %v4956_v30 }
 0x232   : > { %6330 = vmatpush3.bf16.msra.mxu0 %v5056_v61  ;;  %6331 = vmatprep.mubr.msk.bf16.mxu0 %vm1004_vm10, %v8038_v20  ;;  %v5116_v20 = vpop.permute.xlu1 %5115 }
 0x233   : > { %6586 = vmatprep.subr.msk.bf16.mxu0 %vm1011_vm0, %v5883_v41 }
 0x236   : > { %6188 = vmatmul.mubr.msk.bf16.vlgmr.msra.gmra.mrb[0].mxu1 %vm1004_vm10, %v2916_v25 }
 0x237   : > { %6192 = vmatpush3.bf16.msra.mxu1 %v3048_v12  ;;  %6193 = vmatprep.mubr.msk.bf16.mxu1 %vm1004_vm10, %v8669_v59 }
 0x23d   : > { %6332 = vmatmul.mubr.msk.bf16.vlgmr.msra.gmra.mrb[0].mxu0 %vm1004_vm10, %v8051_v9 }
 0x23e   : > { %6336 = vmatpush3.bf16.msra.mxu0 %v5124_v46  ;;  %6337 = vmatprep.mubr.msk.bf16.mxu0 %vm1004_vm10, %v5114_v19 }
 0x23f   : > { %6587 = vmatprep.subr.msk.bf16.mxu0 %vm1011_vm0, %v5886_v11 }
 0x242   : > { %6194 = vmatmul.mubr.msk.bf16.vlgmr.msra.gmra.mrb[0].mxu1 %vm1004_vm10, %v8670_v40 }
 0x249   : > { %6338 = vmatmul.mubr.msk.bf16.vlgmr.msra.gmra.mrb[0].mxu0 %vm1004_vm10, %v5116_v20 }
 0x24a   : > { %6342 = vmatpush3.bf16.msra.mxu0 %v5242_v22  ;;  %6343 = vmatprep.mubr.msk.bf16.mxu0 %vm1004_vm10, %v8300_v37 }
 0x255   : > { %6344 = vmatmul.mubr.msk.bf16.vlgmr.msra.gmra.mrb[0].mxu0 %vm1004_vm10, %v8302_v62 }
 0x315   : > { %v6195_v9 = vpop.f32.mrb[0].mxu1 }
 0x316   : > { %v3084_v1 = vpop.f32.mrb[1].mxu1 }
 0x317   : > { %v6196_v39 = vpop.f32.mrb[2].mxu1 }
 0x318   : > { %v3087_v3 = vpop.f32.mrb[3].mxu1 }
 0x328   : > { %v6345_v55 = vpop.f32.mrb[0].mxu0 }
 0x329   : > { %v6347_v2 = vadd.f32 %v6345_v55, %v6195_v9  ;;  %v5278_v8 = vpop.f32.mrb[1].mxu0 }
 0x32a   : > { %v6348_v63 = vadd.f32 %v5278_v8, %v3084_v1  ;;  %v6346_v56 = vpop.f32.mrb[2].mxu0 }
 0x32b   : > { %v5306_v37 = vadd.f32 %v6347_v2, %v5891_v60  ;;  %v6349_v28 = vadd.f32 %v6346_v56, %v6196_v39  ;;  %v5281_v42 = vpop.f32.mrb[3].mxu0 }
 0x32c   : > { %v5304_v62 = vadd.f32 %v6348_v63, %v5891_v60  ;;  %v6350_v48 = vadd.f32 %v5281_v42, %v3087_v3 }
 0x32d   : > { %v5310_v26 = vmax.f32 %v5306_v37, 0.0  ;;  %v5307_v10 = vadd.f32 %v6349_v28, %v5891_v60 }
 0x32e   : > { %v5308_v16 = vmax.f32 %v5304_v62, 0.0  ;;  %v5305_v32 = vadd.f32 %v6350_v48, %v5891_v60 }
 0x32f   : > { %v5903_v50 = vpack.c.bf16 %v5310_v26, %v5310_v26  ;;  %v5311_v24 = vmax.f32 %v5307_v10, 0.0 }
 0x330   : > { %v5901_v49 = vpack.c.bf16 %v5308_v16, %v5308_v16  ;;  %v5309_v54 = vmax.f32 %v5305_v32, 0.0 }
 0x331   : > { %5331 = vst.msk [vmem:[%s961_s22 + $0x8] sm:$0xf] %vm5328_vm11, %v5903_v50  ;;  %v5904_v36 = vpack.c.bf16 %v5311_v24, %v5311_v24 }
 0x332   : > { %5329 = vst.msk [vmem:[%s961_s22] sm:$0xf] %vm5328_vm11, %v5901_v49  ;;  %v5902_v21 = vpack.c.bf16 %v5309_v54, %v5309_v54 }
 0x333   : > { %5332 = vst.msk [vmem:[%s961_s22 + $0xc] sm:$0xf] %vm5328_vm11, %v5904_v36 }
 0x334   : > { %5330 = vst.msk [vmem:[%s961_s22 + $0x4] sm:$0xf] %vm5328_vm11, %v5902_v21 }
 0x335   : > { %s8672_s16 = sld [smem:[#allocation20_spill]]  ;;  %s5364_s25 = sshll.u32 %s961_s22, 4  ;;  %s5365_s25 = int_to_ptr.vmem [resolvable:$true] %s5364_s25 }
 0x336   : > { %s8673_s18 = sld [smem:[#allocation49_spill]]  ;;  %s6974_s9 = smov 128  }
 0x337   : > { %6603 = sst [smem:[#allocation12]] (%p7255_p4), %s6974_s9  ;;  %s6975_s7 = smov 2048  }
 0x338   : > { %6604 = sst [smem:[#allocation12 + $0x1]] (%p7255_p4), %s6975_s7  ;;  %s6976_s6 = smov 2  }
 0x339   : > { %6605 = sst [smem:[#allocation12 + $0x2]] (%p7255_p4), %s6976_s6  ;;  %s6977_s11 = smov 64  }
 0x33a   : > { %6606 = sst [smem:[#allocation12 + $0x3]] (%p7255_p4), %s6977_s11  ;;  %s6978_s3 = smov 4  }
 0x33b   : > { %s5905_s1 = sshll.u32 %s8672_s16, 7  ;;  %6607 = sst [smem:[#allocation12 + $0x4]] (%p7255_p4), %s6977_s11 }
 0x33c   : > { %s5347_s8 = scalar_lea.hbm %s8673_s18, %s5905_s1  ;;  %6608 = sst [smem:[#allocation12 + $0x5]] (%p7255_p4), %s6978_s3 }
 0x33d   : > { %s6979_s4 = smov [#allocation11]   ;;  %s6980_s14 = smov 0  }
 0x33e   : > { %6609 = dma.general (%p7255_p4), %s5365_s25, 256, %s5347_s8, %s5334_s20, %s6979_s4, [#allocation12], %s6980_s14, 0  }
 0x33f PF: > { %p6615_p11 = scmp.ge.s32.totalorder %s6971_s28, 2  ;;  %s5392_s0 = sand.u32 1, %s6895_s30  }
 0x340   : > { %s5393_s12 = scalar_lea.sflag [#allocation10], %s5392_s0 }
 0x341   : > { %p6612_p12 = pnand %p6615_p11, %p7259_p9 }
 0x343   : > { %6890 = dma.done.wait (!%p6612_p12), %s5393_s12, 256  }
 0x344   : > { %6892 = vsyncadd (!%p6612_p12), %s5393_s12, 4294967040  ;;  %s22_s28 = sadd.s32 1, %s6971_s28   ;;  %s8675_s24 = sld [smem:[#allocation14_spill]] }
 0x345   : > { %p8480_p0 = scmp.ge.s32.totalorder %s22_s28, 18   ;;  %s8676_s11 = sld [smem:[#allocation30_spill]] }
 0x346   : > { %s8677_s20 = sld [smem:[#allocation29_spill]]  ;;  %s8678_s16 = sld [smem:[#allocation28_spill]] }
 0x347   : > { %s8679_s1 = sld [smem:[#allocation27_spill]]  ;;  %s8680_s2 = sld [smem:[#allocation26_spill]] }
 0x348   : > { %s8681_s25 = sld [smem:[#allocation25_spill]]  ;;  %s8682_s26 = sld [smem:[#allocation24_spill]] }
 0x349   : > { %s8683_s5 = sld [smem:[#allocation19_spill]]  ;;  %s8684_s30 = smov %s6899_s10 }
 0x34a   : > { %s8685_s8 = sld [smem:[#allocation23_spill]]  ;;  %s8686_s10 = smov %s8675_s24 }
 0x34b   : > { %s8687_s9 = sld [smem:[#allocation21_spill]]  ;;  %s8688_s12 = smov %s6911_s13 }
 0x34c   : > { %s8689_s13 = smov %s8677_s20  ;;  %s8691_s14 = smov %s6919_s15 }
 0x34d   : > { %s8692_s15 = smov %s8678_s16  ;;  %s8693_s16 = smov %s6927_s17 }
 0x34e   : > { %s8694_s17 = smov %s8679_s1  ;;  %s8695_s18 = smov %s6935_s19 }
 0x34f   : > { %s8696_s19 = smov %s8680_s2  ;;  %s8697_s20 = smov %s6943_s21 }
 0x350   : > { %s8698_s21 = smov %s8681_s25  ;;  %s8699_s22 = smov %s6951_s23 }
 0x351   : > { %s8700_s23 = smov %s8682_s26  ;;  %s8701_s24 = smov %s8683_s5 }
 0x352   : > { %s8702_s25 = smov %s8685_s8  ;;  %s8703_s26 = smov %s6967_s27 }
 0x353   : > { %s8704_s27 = smov %s8687_s9  ;;  %21 = sbr.rel (!%p8480_p0) target bundleno = 22 (0x16), region = 490 }
 0x35a   :  { %5398 = vsyncpa [#allocation10], 1 }
 0x35b   :  { %5400 = vsyncpa [#allocation10 + $0x1], 1 }

</bundles_post_ra>
